<compile_context>
chip_gen: v5e
topology: v5e:2x2
jax: 0.10.0
libtpu: 0.0.40
codegen_flags: <defaults>
</compile_context>

<pallas_src>
import jax
import jax.numpy as jnp
from jax.experimental import pallas as pl
from jax.experimental.pallas import tpu as pltpu


# ----------------------- CoefficientShuffler (module semantics) -----------------------

def coefficient_shuffler_channels(x, channels):
    """== CoefficientShuffler(channels, 'channels'): (N,C,H,W) -> (N,64*C,H/8,W/8), ch=k*C+c."""
    N, C, H, W = x.shape
    Hb, Wb = H // 8, W // 8
    y = x.reshape(N, C, Hb, 8, Wb, 8).transpose(0, 3, 5, 1, 2, 4)   # (N,ky,kx,c,bh,bw)
    return y.reshape(N, 64 * C, Hb, Wb)


def coefficient_shuffler_blocks(x, channels, padding_like=None):
    """== CoefficientShuffler(channels, 'blocks'): (N,64*C,Hb,Wb) -> (N,C,8*Hb,8*Wb)."""
    N, _, Hb, Wb = x.shape
    C = channels
    y = x.reshape(N, 8, 8, C, Hb, Wb).transpose(0, 3, 4, 1, 5, 2)   # (N,c,bh,ky,bw,kx)
    y = y.reshape(N, C, 8 * Hb, 8 * Wb)
    if padding_like is not None:
        dY = padding_like.shape[2] - y.shape[2]
        dX = padding_like.shape[3] - y.shape[3]
        y = jnp.pad(y, ((0, 0), (0, 0), (dY // 2, dY - dY // 2), (dX // 2, dX - dX // 2)))
    return y


# ----------------------------------- Pallas kernel ------------------------------------

def _freqconv_kernel(xp_ref, w1_ref, b1_ref, a1_ref, w2_ref, b2_ref, a2_ref,
                     out_ref, h1pad_ref):
    NB, Hp, Wp, _ = xp_ref.shape
    _, Hb, Wb, Cout64 = out_ref.shape
    F64 = w1_ref.shape[2]
    M = NB * Hb * Wb

    def conv3x3(src_ref, w_ref, bias):
        # "Per-frequency" grouped 3x3 conv as block-diagonal MXU matmuls.
        # dx (width) taps are folded into the contraction dim: concatenate the three
        # sublane-shifted slabs along the lane axis, then one matmul per dy with
        # K = 3 * 64 * C.  Bias is folded into the first tap's epilogue.
        k_dim = src_ref.shape[3]
        xcat = jnp.concatenate(
            [src_ref[:, :, dx:dx + Wb, :] for dx in range(3)], axis=-1)  # (NB,Hp,Wb,3k)

        def tap(dy):
            win = xcat[:, dy:dy + Hb, :, :].reshape(M, 3 * k_dim)
            return jnp.dot(win, w_ref[dy], preferred_element_type=jnp.float32)

        acc = tap(0) + bias
        acc = acc + tap(1)
        acc = acc + tap(2)
        return acc

    # --- conv1 + PReLU (f32 epilogue) ---
    h1 = conv3x3(xp_ref, w1_ref, b1_ref[...])
    h1 = jnp.where(h1 >= 0, h1, a1_ref[0] * h1)

    # --- stage zero-padded h1 in bf16.  Only the 1-element halo border is zeroed
    # (interior is fully rewritten every step; zeroing stays per-step so the persistent
    # scratch is valid under v7x megacore sharding).  conv2 reads columns 0..Wb+1 only
    # (dx <= 2), so columns >= Wb+2 of the round-to-8 pad are dead and stay uninitialized.
    zdt = h1pad_ref.dtype
    h1pad_ref[:, 0:1, :, :] = jnp.zeros((NB, 1, Wp, F64), zdt)
    h1pad_ref[:, Hb + 1:Hb + 2, :, :] = jnp.zeros((NB, 1, Wp, F64), zdt)
    h1pad_ref[:, :, 0:1, :] = jnp.zeros((NB, Hp, 1, F64), zdt)
    h1pad_ref[:, :, Wb + 1:Wb + 2, :] = jnp.zeros((NB, Hp, 1, F64), zdt)
    h1pad_ref[:, 1:Hb + 1, 1:Wb + 1, :] = h1.reshape(NB, Hb, Wb, F64).astype(zdt)

    # --- conv2 + PReLU ---
    h2 = conv3x3(h1pad_ref, w2_ref, b2_ref[...])
    h2 = jnp.where(h2 >= 0, h2, a2_ref[0] * h2)

    out_ref[...] = h2.reshape(NB, Hb, Wb, Cout64).astype(out_ref.dtype)


def _block_diag_weight(w, cin, cout):
    """(cout*64, cin, 3, 3) grouped-conv weight -> (3, 3*64*cin, 64*cout).

    Block-diagonal over the 64 frequency groups (group-major channel ordering, matching
    the shuffled representation and lax grouped conv), with the dx (width) taps folded
    into the contraction dim (dx-major, then group, then cin) to match the kernel's
    lane-concatenated xcat."""
    wr = w.reshape(64, cout, cin, 9)                  # (group, o, i, tap); tap = dy*3 + dx
    eye = jnp.eye(64, dtype=w.dtype)
    bd = jnp.einsum('gh,hoit->tgiho', eye, wr)        # (tap, g, i, h, o)
    w9 = bd.reshape(9, 64 * cin, 64 * cout)           # tap-major block-diag matmul weights
    return w9.reshape(3, 3 * 64 * cin, 64 * cout)     # fold dx into K (dy, dx*64*cin + gi, out)


def _vmem_limit_bytes():
    """Generation-aware VMEM budget: half of physical VMEM, capped at 64 MiB.
    -> 64 MiB on v5e/v6e (128 MiB physical), 32 MiB on v7x (64 MiB/TC physical)."""
    try:
        cap = int(pltpu.get_tpu_info().vmem_capacity_bytes)
    except Exception:
        cap = 64 * 1024 * 1024
    return max(32 * 1024 * 1024, min(cap // 2, 64 * 1024 * 1024))


def frequency_net_forward(x, params, feature_channels, batch_block=None):
    N, Cin, H, W = x.shape
    assert H % 8 == 0 and W % 8 == 0, "spatial dims must be multiples of the 8x8 block size"
    Hb, Wb = H // 8, W // 8
    F = feature_channels
    Cout = params['b2'].shape[0] // 64

    # Images per grid step: aim for ~512 matmul rows per step (amortizes MXU weight pushes
    # and per-step pipeline overhead), but keep grid_n >= 2 whenever N >= 2 so both v7x
    # TensorCores get work on the parallel batch axis.
    if batch_block is None:
        nb = max(1, min(N, 512 // max(1, Hb * Wb)))
        if N >= 2:
            nb = min(nb, max(1, N // 2))
        while N % nb:
            nb -= 1
    else:
        nb = batch_block
        assert N % nb == 0
    grid_n = N // nb

    Hp = Hb + 2
    Wp = ((Wb + 2 + 7) // 8) * 8                      # pad sublane axis to a multiple of 8

    # CoefficientShuffler(direction='channels'), then NHWC + spatial zero-pad for the 3x3 conv.
    xs = coefficient_shuffler_channels(x, Cin)                      # (N, 64*Cin, Hb, Wb)
    xs = xs.transpose(0, 2, 3, 1)                                   # (N, Hb, Wb, 64*Cin)
    xp = jnp.pad(xs, ((0, 0), (1, 1), (1, Wp - Wb - 1), (0, 0))).astype(jnp.bfloat16)

    w1bd = _block_diag_weight(params['w1'], Cin, F).astype(jnp.bfloat16)    # (3, 3*64*Cin, 64*F)
    w2bd = _block_diag_weight(params['w2'], F, Cout).astype(jnp.bfloat16)   # (3, 3*64*F, 64*Cout)
    b1 = params['b1'].reshape(1, 64 * F).astype(jnp.float32)
    b2 = params['b2'].reshape(1, 64 * Cout).astype(jnp.float32)
    a1 = params['a1'].reshape(1).astype(jnp.float32)
    a2 = params['a2'].reshape(1).astype(jnp.float32)

    out_shuf = pl.pallas_call(
        _freqconv_kernel,
        out_shape=jax.ShapeDtypeStruct((N, Hb, Wb, 64 * Cout), x.dtype),
        grid=(grid_n,),
        in_specs=[
            pl.BlockSpec((nb, Hp, Wp, 64 * Cin), lambda n: (n, 0, 0, 0)),
            pl.BlockSpec((3, 3 * 64 * Cin, 64 * F), lambda n: (0, 0, 0)),
            pl.BlockSpec((1, 64 * F), lambda n: (0, 0)),
            pl.BlockSpec(memory_space=pltpu.MemorySpace.SMEM),
            pl.BlockSpec((3, 3 * 64 * F, 64 * Cout), lambda n: (0, 0, 0)),
            pl.BlockSpec((1, 64 * Cout), lambda n: (0, 0)),
            pl.BlockSpec(memory_space=pltpu.MemorySpace.SMEM),
        ],
        out_specs=pl.BlockSpec((nb, Hb, Wb, 64 * Cout), lambda n: (n, 0, 0, 0)),
        scratch_shapes=[pltpu.VMEM((nb, Hp, Wp, 64 * F), jnp.bfloat16)],
        compiler_params=pltpu.CompilerParams(
            dimension_semantics=("parallel",),
            vmem_limit_bytes=_vmem_limit_bytes()),
    )(xp, w1bd, b1, a1, w2bd, b2, a2)

    # CoefficientShuffler(direction='blocks'): back to (N, Cout, H, W).
    out_nchw = out_shuf.transpose(0, 3, 1, 2)                       # (N, 64*Cout, Hb, Wb)
    return coefficient_shuffler_blocks(out_nchw, Cout)


# -------------------------------- pure-JAX reference ----------------------------------

def _ref_forward(x, params, feature_channels):
    """Reference reproducing the PyTorch module chain (grouped convs via lax).

    Operands and the staged intermediate are rounded through bf16 to mirror the kernel's
    storage precision; all accumulation is f32, so the comparison isolates kernel math.
    """
    Cin = x.shape[1]
    Cout = params['b2'].shape[0] // 64
    q = lambda t: t.astype(jnp.bfloat16).astype(jnp.float32)

    xs = coefficient_shuffler_channels(q(x), Cin)                   # (N, 64*Cin, Hb, Wb)

    def gconv(z, w, b):
        o = jax.lax.conv_general_dilated(
            z, w, window_strides=(1, 1), padding=((1, 1), (1, 1)),
            dimension_numbers=('NCHW', 'OIHW', 'NCHW'), feature_group_count=64)
        return o + b[None, :, None, None]

    h = gconv(xs, q(params['w1']), params['b1'])
    h = jnp.where(h >= 0, h, params['a1'][0] * h)
    h = q(h)                                                        # kernel stages h1 in bf16
    h = gconv(h, q(params['w2']), params['b2'])
    h = jnp.where(h >= 0, h, params['a2'][0] * h)
    return coefficient_shuffler_blocks(h, Cout)


if __name__ == "__main__":
    N, Cin, Cout, F = 2, 4, 4, 4
    H = W = 32  # must be divisible by 8 (8x8 DCT-block structure)

    key = jax.random.PRNGKey(0)
    k1, k2, k3, k4, kx = jax.random.split(key, 5)
    params = {
        'w1': jax.random.normal(k1, (F * 64, Cin, 3, 3), jnp.float32) * 0.1,
        'b1': jax.random.normal(k2, (F * 64,), jnp.float32) * 0.1,
        'w2': jax.random.normal(k3, (Cout * 64, F, 3, 3), jnp.float32) * 0.1,
        'b2': jax.random.normal(k4, (Cout * 64,), jnp.float32) * 0.1,
        'a1': jnp.full((1,), 0.25, jnp.float32),   # PReLU default init
        'a2': jnp.full((1,), 0.25, jnp.float32),
    }
    x = jax.random.normal(kx, (N, Cin, H, W), jnp.float32)

    out = jax.block_until_ready(frequency_net_forward(x, params, F))
    assert out.shape == (N, Cout, H, W)

    ref = jax.block_until_ready(_ref_forward(x, params, F))
    if not jnp.allclose(out, ref, atol=2e-3, rtol=2e-3):
        raise AssertionError(
            f"kernel/reference mismatch, max abs err = {jnp.max(jnp.abs(out - ref))}")
    print("KERNEL_OK")
</pallas_src>

<mosaic_0001>
module attributes {stable_mosaic.version = 11 : i64} {
  func.func @_freqconv_kernel(%arg0: i32, %arg1: memref<1x6x8x256xbf16, #tpu.memory_space<vmem>>, %arg2: memref<3x768x256xbf16, #tpu.memory_space<vmem>>, %arg3: memref<1x256xf32, #tpu.memory_space<vmem>>, %arg4: memref<1xf32, #tpu.memory_space<smem>>, %arg5: memref<3x768x256xbf16, #tpu.memory_space<vmem>>, %arg6: memref<1x256xf32, #tpu.memory_space<vmem>>, %arg7: memref<1xf32, #tpu.memory_space<smem>>, %arg8: memref<1x4x4x256xf32, #tpu.memory_space<vmem>>, %arg9: memref<1x6x8x256xbf16, #tpu.memory_space<vmem>>) attributes {dimension_semantics = [#tpu.dimension_semantics<parallel>], iteration_bounds = array<i64: 2>, scalar_prefetch = 0 : i64, scratch_operands = 1 : i64, tpu.core_type = #tpu.core_type<tc>, window_params = [{transform_indices = @transform_0, window_bounds = array<i64: 1, 6, 8, 256>}, {pipeline_mode = #tpu.pipeline_mode<synchronous>, transform_indices = @transform_1, window_bounds = array<i64: 3, 768, 256>}, {pipeline_mode = #tpu.pipeline_mode<synchronous>, transform_indices = @transform_2, window_bounds = array<i64: 1, 256>}, {transform_indices = @transform_3, window_bounds = array<i64: 1>}, {pipeline_mode = #tpu.pipeline_mode<synchronous>, transform_indices = @transform_4, window_bounds = array<i64: 3, 768, 256>}, {pipeline_mode = #tpu.pipeline_mode<synchronous>, transform_indices = @transform_5, window_bounds = array<i64: 1, 256>}, {transform_indices = @transform_6, window_bounds = array<i64: 1>}, {transform_indices = @transform_7, window_bounds = array<i64: 1, 4, 4, 256>}]} {
    %c0 = arith.constant 0 : index
    %c0_0 = arith.constant 0 : index
    %0 = vector.load %arg3[%c0, %c0_0] : memref<1x256xf32, #tpu.memory_space<vmem>>, vector<1x256xf32>
    %c0_1 = arith.constant 0 : index
    %c0_2 = arith.constant 0 : index
    %c0_3 = arith.constant 0 : index
    %c0_4 = arith.constant 0 : index
    %1 = vector.load %arg1[%c0_1, %c0_2, %c0_3, %c0_4] : memref<1x6x8x256xbf16, #tpu.memory_space<vmem>>, vector<1x6x4x256xbf16>
    %c0_5 = arith.constant 0 : index
    %c0_6 = arith.constant 0 : index
    %c1 = arith.constant 1 : index
    %c0_7 = arith.constant 0 : index
    %2 = vector.load %arg1[%c0_5, %c0_6, %c1, %c0_7] : memref<1x6x8x256xbf16, #tpu.memory_space<vmem>>, vector<1x6x4x256xbf16>
    %c0_8 = arith.constant 0 : index
    %c0_9 = arith.constant 0 : index
    %c2 = arith.constant 2 : index
    %c0_10 = arith.constant 0 : index
    %3 = vector.load %arg1[%c0_8, %c0_9, %c2, %c0_10] : memref<1x6x8x256xbf16, #tpu.memory_space<vmem>>, vector<1x6x4x256xbf16>
    %4 = tpu.concatenate %1, %2, %3 in 3 : vector<1x6x4x256xbf16>, vector<1x6x4x256xbf16>, vector<1x6x4x256xbf16> -> vector<1x6x4x768xbf16>
    %5 = vector.extract_strided_slice %4 {offsets = [0, 0, 0, 0], sizes = [1, 4, 4, 768], strides = [1, 1, 1, 1]} : vector<1x6x4x768xbf16> to vector<1x4x4x768xbf16>
    %6 = vector.shape_cast %5 : vector<1x4x4x768xbf16> to vector<16x768xbf16>
    %c0_11 = arith.constant 0 : index
    %c0_12 = arith.constant 0 : index
    %c0_13 = arith.constant 0 : index
    %7 = vector.load %arg2[%c0_11, %c0_12, %c0_13] : memref<3x768x256xbf16, #tpu.memory_space<vmem>>, vector<1x768x256xbf16>
    %8 = vector.shape_cast %7 : vector<1x768x256xbf16> to vector<768x256xbf16>
    %cst = arith.constant dense<0.000000e+00> : vector<16x256xf32>
    %9 = tpu.matmul %6, %8, %cst {dimension_numbers = #tpu.dot_dimension_numbers<[1], [0], [0], [1], [0, 0, 1, 1], [], []>} : vector<16x768xbf16>, vector<768x256xbf16>, vector<16x256xf32> -> vector<16x256xf32>
    %10 = vector.broadcast %0 : vector<1x256xf32> to vector<16x256xf32>
    %11 = arith.addf %9, %10 : vector<16x256xf32>
    %12 = vector.extract_strided_slice %4 {offsets = [0, 1, 0, 0], sizes = [1, 4, 4, 768], strides = [1, 1, 1, 1]} : vector<1x6x4x768xbf16> to vector<1x4x4x768xbf16>
    %13 = vector.shape_cast %12 : vector<1x4x4x768xbf16> to vector<16x768xbf16>
    %c1_14 = arith.constant 1 : index
    %c0_15 = arith.constant 0 : index
    %c0_16 = arith.constant 0 : index
    %14 = vector.load %arg2[%c1_14, %c0_15, %c0_16] : memref<3x768x256xbf16, #tpu.memory_space<vmem>>, vector<1x768x256xbf16>
    %15 = vector.shape_cast %14 : vector<1x768x256xbf16> to vector<768x256xbf16>
    %cst_17 = arith.constant dense<0.000000e+00> : vector<16x256xf32>
    %16 = tpu.matmul %13, %15, %cst_17 {dimension_numbers = #tpu.dot_dimension_numbers<[1], [0], [0], [1], [0, 0, 1, 1], [], []>} : vector<16x768xbf16>, vector<768x256xbf16>, vector<16x256xf32> -> vector<16x256xf32>
    %17 = arith.addf %11, %16 : vector<16x256xf32>
    %18 = vector.extract_strided_slice %4 {offsets = [0, 2, 0, 0], sizes = [1, 4, 4, 768], strides = [1, 1, 1, 1]} : vector<1x6x4x768xbf16> to vector<1x4x4x768xbf16>
    %19 = vector.shape_cast %18 : vector<1x4x4x768xbf16> to vector<16x768xbf16>
    %c2_18 = arith.constant 2 : index
    %c0_19 = arith.constant 0 : index
    %c0_20 = arith.constant 0 : index
    %20 = vector.load %arg2[%c2_18, %c0_19, %c0_20] : memref<3x768x256xbf16, #tpu.memory_space<vmem>>, vector<1x768x256xbf16>
    %21 = vector.shape_cast %20 : vector<1x768x256xbf16> to vector<768x256xbf16>
    %cst_21 = arith.constant dense<0.000000e+00> : vector<16x256xf32>
    %22 = tpu.matmul %19, %21, %cst_21 {dimension_numbers = #tpu.dot_dimension_numbers<[1], [0], [0], [1], [0, 0, 1, 1], [], []>} : vector<16x768xbf16>, vector<768x256xbf16>, vector<16x256xf32> -> vector<16x256xf32>
    %23 = arith.addf %17, %22 : vector<16x256xf32>
    %cst_22 = arith.constant 0.000000e+00 : f32
    %24 = vector.broadcast %cst_22 : f32 to vector<16x256xf32>
    %25 = arith.cmpf oge, %23, %24 : vector<16x256xf32>
    %c0_23 = arith.constant 0 : index
    %26 = memref.load %arg4[%c0_23] : memref<1xf32, #tpu.memory_space<smem>>
    %27 = vector.broadcast %26 : f32 to vector<16x256xf32>
    %28 = arith.mulf %27, %23 : vector<16x256xf32>
    %29 = arith.select %25, %23, %28 : vector<16x256xi1>, vector<16x256xf32>
    %cst_24 = arith.constant 0.000000e+00 : bf16
    %30 = vector.broadcast %cst_24 : bf16 to vector<1x1x8x256xbf16>
    %c0_25 = arith.constant 0 : index
    %c0_26 = arith.constant 0 : index
    %c0_27 = arith.constant 0 : index
    %c0_28 = arith.constant 0 : index
    %31 = vector.load %arg9[%c0_25, %c0_26, %c0_27, %c0_28] : memref<1x6x8x256xbf16, #tpu.memory_space<vmem>>, vector<1x1x8x256xbf16>
    tpu.vector_store %arg9[%c0_25, %c0_26, %c0_27, %c0_28], %30 {strides = array<i32>} : memref<1x6x8x256xbf16, #tpu.memory_space<vmem>>, vector<1x1x8x256xbf16>,
    %cst_29 = arith.constant 0.000000e+00 : bf16
    %32 = vector.broadcast %cst_29 : bf16 to vector<1x1x8x256xbf16>
    %c0_30 = arith.constant 0 : index
    %c5 = arith.constant 5 : index
    %c0_31 = arith.constant 0 : index
    %c0_32 = arith.constant 0 : index
    %33 = vector.load %arg9[%c0_30, %c5, %c0_31, %c0_32] : memref<1x6x8x256xbf16, #tpu.memory_space<vmem>>, vector<1x1x8x256xbf16>
    tpu.vector_store %arg9[%c0_30, %c5, %c0_31, %c0_32], %32 {strides = array<i32>} : memref<1x6x8x256xbf16, #tpu.memory_space<vmem>>, vector<1x1x8x256xbf16>,
    %cst_33 = arith.constant 0.000000e+00 : bf16
    %34 = vector.broadcast %cst_33 : bf16 to vector<1x6x1x256xbf16>
    %c0_34 = arith.constant 0 : index
    %c0_35 = arith.constant 0 : index
    %c0_36 = arith.constant 0 : index
    %c0_37 = arith.constant 0 : index
    %35 = vector.load %arg9[%c0_34, %c0_35, %c0_36, %c0_37] : memref<1x6x8x256xbf16, #tpu.memory_space<vmem>>, vector<1x6x1x256xbf16>
    tpu.vector_store %arg9[%c0_34, %c0_35, %c0_36, %c0_37], %34 {strides = array<i32>} : memref<1x6x8x256xbf16, #tpu.memory_space<vmem>>, vector<1x6x1x256xbf16>,
    %cst_38 = arith.constant 0.000000e+00 : bf16
    %36 = vector.broadcast %cst_38 : bf16 to vector<1x6x1x256xbf16>
    %c0_39 = arith.constant 0 : index
    %c0_40 = arith.constant 0 : index
    %c5_41 = arith.constant 5 : index
    %c0_42 = arith.constant 0 : index
    %37 = vector.load %arg9[%c0_39, %c0_40, %c5_41, %c0_42] : memref<1x6x8x256xbf16, #tpu.memory_space<vmem>>, vector<1x6x1x256xbf16>
    tpu.vector_store %arg9[%c0_39, %c0_40, %c5_41, %c0_42], %36 {strides = array<i32>} : memref<1x6x8x256xbf16, #tpu.memory_space<vmem>>, vector<1x6x1x256xbf16>,
    %38 = vector.shape_cast %29 : vector<16x256xf32> to vector<1x4x4x256xf32>
    %39 = arith.truncf %38 : vector<1x4x4x256xf32> to vector<1x4x4x256xbf16>
    %c0_43 = arith.constant 0 : index
    %c1_44 = arith.constant 1 : index
    %c1_45 = arith.constant 1 : index
    %c0_46 = arith.constant 0 : index
    %40 = vector.load %arg9[%c0_43, %c1_44, %c1_45, %c0_46] : memref<1x6x8x256xbf16, #tpu.memory_space<vmem>>, vector<1x4x4x256xbf16>
    tpu.vector_store %arg9[%c0_43, %c1_44, %c1_45, %c0_46], %39 {strides = array<i32>} : memref<1x6x8x256xbf16, #tpu.memory_space<vmem>>, vector<1x4x4x256xbf16>,
    %c0_47 = arith.constant 0 : index
    %c0_48 = arith.constant 0 : index
    %41 = vector.load %arg6[%c0_47, %c0_48] : memref<1x256xf32, #tpu.memory_space<vmem>>, vector<1x256xf32>
    %c0_49 = arith.constant 0 : index
    %c0_50 = arith.constant 0 : index
    %c0_51 = arith.constant 0 : index
    %c0_52 = arith.constant 0 : index
    %42 = vector.load %arg9[%c0_49, %c0_50, %c0_51, %c0_52] : memref<1x6x8x256xbf16, #tpu.memory_space<vmem>>, vector<1x6x4x256xbf16>
    %c0_53 = arith.constant 0 : index
    %c0_54 = arith.constant 0 : index
    %c1_55 = arith.constant 1 : index
    %c0_56 = arith.constant 0 : index
    %43 = vector.load %arg9[%c0_53, %c0_54, %c1_55, %c0_56] : memref<1x6x8x256xbf16, #tpu.memory_space<vmem>>, vector<1x6x4x256xbf16>
    %c0_57 = arith.constant 0 : index
    %c0_58 = arith.constant 0 : index
    %c2_59 = arith.constant 2 : index
    %c0_60 = arith.constant 0 : index
    %44 = vector.load %arg9[%c0_57, %c0_58, %c2_59, %c0_60] : memref<1x6x8x256xbf16, #tpu.memory_space<vmem>>, vector<1x6x4x256xbf16>
    %45 = tpu.concatenate %42, %43, %44 in 3 : vector<1x6x4x256xbf16>, vector<1x6x4x256xbf16>, vector<1x6x4x256xbf16> -> vector<1x6x4x768xbf16>
    %46 = vector.extract_strided_slice %45 {offsets = [0, 0, 0, 0], sizes = [1, 4, 4, 768], strides = [1, 1, 1, 1]} : vector<1x6x4x768xbf16> to vector<1x4x4x768xbf16>
    %47 = vector.shape_cast %46 : vector<1x4x4x768xbf16> to vector<16x768xbf16>
    %c0_61 = arith.constant 0 : index
    %c0_62 = arith.constant 0 : index
    %c0_63 = arith.constant 0 : index
    %48 = vector.load %arg5[%c0_61, %c0_62, %c0_63] : memref<3x768x256xbf16, #tpu.memory_space<vmem>>, vector<1x768x256xbf16>
    %49 = vector.shape_cast %48 : vector<1x768x256xbf16> to vector<768x256xbf16>
    %cst_64 = arith.constant dense<0.000000e+00> : vector<16x256xf32>
    %50 = tpu.matmul %47, %49, %cst_64 {dimension_numbers = #tpu.dot_dimension_numbers<[1], [0], [0], [1], [0, 0, 1, 1], [], []>} : vector<16x768xbf16>, vector<768x256xbf16>, vector<16x256xf32> -> vector<16x256xf32>
    %51 = vector.broadcast %41 : vector<1x256xf32> to vector<16x256xf32>
    %52 = arith.addf %50, %51 : vector<16x256xf32>
    %53 = vector.extract_strided_slice %45 {offsets = [0, 1, 0, 0], sizes = [1, 4, 4, 768], strides = [1, 1, 1, 1]} : vector<1x6x4x768xbf16> to vector<1x4x4x768xbf16>
    %54 = vector.shape_cast %53 : vector<1x4x4x768xbf16> to vector<16x768xbf16>
    %c1_65 = arith.constant 1 : index
    %c0_66 = arith.constant 0 : index
    %c0_67 = arith.constant 0 : index
    %55 = vector.load %arg5[%c1_65, %c0_66, %c0_67] : memref<3x768x256xbf16, #tpu.memory_space<vmem>>, vector<1x768x256xbf16>
    %56 = vector.shape_cast %55 : vector<1x768x256xbf16> to vector<768x256xbf16>
    %cst_68 = arith.constant dense<0.000000e+00> : vector<16x256xf32>
    %57 = tpu.matmul %54, %56, %cst_68 {dimension_numbers = #tpu.dot_dimension_numbers<[1], [0], [0], [1], [0, 0, 1, 1], [], []>} : vector<16x768xbf16>, vector<768x256xbf16>, vector<16x256xf32> -> vector<16x256xf32>
    %58 = arith.addf %52, %57 : vector<16x256xf32>
    %59 = vector.extract_strided_slice %45 {offsets = [0, 2, 0, 0], sizes = [1, 4, 4, 768], strides = [1, 1, 1, 1]} : vector<1x6x4x768xbf16> to vector<1x4x4x768xbf16>
    %60 = vector.shape_cast %59 : vector<1x4x4x768xbf16> to vector<16x768xbf16>
    %c2_69 = arith.constant 2 : index
    %c0_70 = arith.constant 0 : index
    %c0_71 = arith.constant 0 : index
    %61 = vector.load %arg5[%c2_69, %c0_70, %c0_71] : memref<3x768x256xbf16, #tpu.memory_space<vmem>>, vector<1x768x256xbf16>
    %62 = vector.shape_cast %61 : vector<1x768x256xbf16> to vector<768x256xbf16>
    %cst_72 = arith.constant dense<0.000000e+00> : vector<16x256xf32>
    %63 = tpu.matmul %60, %62, %cst_72 {dimension_numbers = #tpu.dot_dimension_numbers<[1], [0], [0], [1], [0, 0, 1, 1], [], []>} : vector<16x768xbf16>, vector<768x256xbf16>, vector<16x256xf32> -> vector<16x256xf32>
    %64 = arith.addf %58, %63 : vector<16x256xf32>
    %cst_73 = arith.constant 0.000000e+00 : f32
    %65 = vector.broadcast %cst_73 : f32 to vector<16x256xf32>
    %66 = arith.cmpf oge, %64, %65 : vector<16x256xf32>
    %c0_74 = arith.constant 0 : index
    %67 = memref.load %arg7[%c0_74] : memref<1xf32, #tpu.memory_space<smem>>
    %68 = vector.broadcast %67 : f32 to vector<16x256xf32>
    %69 = arith.mulf %68, %64 : vector<16x256xf32>
    %70 = arith.select %66, %64, %69 : vector<16x256xi1>, vector<16x256xf32>
    %71 = vector.shape_cast %70 : vector<16x256xf32> to vector<1x4x4x256xf32>
    %c0_75 = arith.constant 0 : index
    %c0_76 = arith.constant 0 : index
    %c0_77 = arith.constant 0 : index
    %c0_78 = arith.constant 0 : index
    %72 = vector.load %arg8[%c0_75, %c0_76, %c0_77, %c0_78] : memref<1x4x4x256xf32, #tpu.memory_space<vmem>>, vector<1x4x4x256xf32>
    tpu.vector_store %arg8[%c0_75, %c0_76, %c0_77, %c0_78], %71 {strides = array<i32>} : memref<1x4x4x256xf32, #tpu.memory_space<vmem>>, vector<1x4x4x256xf32>,
    return
  }
  func.func @transform_0(%arg0: i32) -> (i32, i32, i32, i32) {
    %c0_i32 = arith.constant 0 : i32
    %c0_i32_0 = arith.constant 0 : i32
    %c0_i32_1 = arith.constant 0 : i32
    %c0_i32_2 = arith.constant 0 : i32
    return %arg0, %c0_i32, %c0_i32_0, %c0_i32_1 : i32, i32, i32, i32
  }
  func.func @transform_1(%arg0: i32) -> (i32, i32, i32) {
    %c0_i32 = arith.constant 0 : i32
    %c0_i32_0 = arith.constant 0 : i32
    %c0_i32_1 = arith.constant 0 : i32
    %c0_i32_2 = arith.constant 0 : i32
    return %c0_i32, %c0_i32_0, %c0_i32_1 : i32, i32, i32
  }
  func.func @transform_2(%arg0: i32) -> (i32, i32) {
    %c0_i32 = arith.constant 0 : i32
    %c0_i32_0 = arith.constant 0 : i32
    %c0_i32_1 = arith.constant 0 : i32
    return %c0_i32, %c0_i32_0 : i32, i32
  }
  func.func @transform_3(%arg0: i32) -> i32 {
    %c0_i32 = arith.constant 0 : i32
    %c0_i32_0 = arith.constant 0 : i32
    return %c0_i32 : i32
  }
  func.func @transform_4(%arg0: i32) -> (i32, i32, i32) {
    %c0_i32 = arith.constant 0 : i32
    %c0_i32_0 = arith.constant 0 : i32
    %c0_i32_1 = arith.constant 0 : i32
    %c0_i32_2 = arith.constant 0 : i32
    return %c0_i32, %c0_i32_0, %c0_i32_1 : i32, i32, i32
  }
  func.func @transform_5(%arg0: i32) -> (i32, i32) {
    %c0_i32 = arith.constant 0 : i32
    %c0_i32_0 = arith.constant 0 : i32
    %c0_i32_1 = arith.constant 0 : i32
    return %c0_i32, %c0_i32_0 : i32, i32
  }
  func.func @transform_6(%arg0: i32) -> i32 {
    %c0_i32 = arith.constant 0 : i32
    %c0_i32_0 = arith.constant 0 : i32
    return %c0_i32 : i32
  }
  func.func @transform_7(%arg0: i32) -> (i32, i32, i32, i32) {
    %c0_i32 = arith.constant 0 : i32
    %c0_i32_0 = arith.constant 0 : i32
    %c0_i32_1 = arith.constant 0 : i32
    %c0_i32_2 = arith.constant 0 : i32
    return %arg0, %c0_i32, %c0_i32_0, %c0_i32_1 : i32, i32, i32, i32
  }
}

</mosaic_0001>

<bundles_post_ra>
// kernel: tpu_custom_call.1
= control target key start
LH: loop header
LB: loop body
LE: loop exit
PB: predicated region body
PF: predicated region fallthrough
CT: control target
= control target key end

     0   :  { %s10192_s0 = inlined_call_operand.hbm [shape: bf16[2,6,8,256], index: 0, kind: input, shape index: {}]   ;;  %s10193_s1 = inlined_call_operand.hbm [shape: bf16[3,768,256], index: 1, kind: input, shape index: {}]   ;;  %s10194_s2 = inlined_call_operand.hbm [shape: f32[1,256], index: 2, kind: input, shape index: {}]   ;;  %s10195_s3 = inlined_call_operand.<no memory space> [shape: f32[1], index: 3, kind: input, shape index: {}]   ;;  %s10196_s4 = inlined_call_operand.hbm [shape: bf16[3,768,256], index: 4, kind: input, shape index: {}]   ;;  %s10197_s5 = inlined_call_operand.hbm [shape: f32[1,256], index: 5, kind: input, shape index: {}]   ;;  %s10198_s6 = inlined_call_operand.<no memory space> [shape: f32[1], index: 6, kind: input, shape index: {}]   ;;  %s10199_s7 = inlined_call_operand.hbm [shape: f32[2,4,4,256], index: 7, kind: output, shape index: {}]  }
   0x1   :  { %10202 = sst [smem:[#allocation19_spill]] %s10193_s1 }
   0x2   :  { %12 = sst [smem:[#allocation3]] %s10195_s3 }
   0x3   :  { %13 = sst [smem:[#allocation4]] %s10198_s6 }
   0x4   :  { %14 = vsyncpa [#allocation6], 0 }
   0x5   :  { %16 = vsyncpa [#allocation6 + $0x1], 0 }
   0x6   :  { %17 = vsyncpa [#allocation9], 0 }
   0x7   :  { %18 = vsyncpa [#allocation12], 0 }
   0x8   :  { %19 = vsyncpa [#allocation7], 0 }
   0x9   :  { %21 = vsyncpa [#allocation7 + $0x1], 0  ;;  %s9208_s28 = smov 0   ;;  %s9210_s29 = smov 0  }
   0xa   :  { %s9212_s30 = smov 0   ;;  %s9214_s8 = smov 0  }
   0xb LB: > { %s9229_s3 = sadd.s32 4294967295, %s9151_s8   ;;  %s5920_s6 = sadd.s32 4294967294, %s9151_s8   ;;  %s9151_s8 = sphi %s9214_s8, %s10224_s8   ;;  %s9147_s30 = sphi %s9212_s30, %s10223_s30   ;;  %s9143_s29 = sphi %s9210_s29, %s10222_s29   ;;  %s9139_s28 = sphi %s9208_s28, %s10221_s28  }
   0xc   : > { %p47_p0 = scmp.ne.s32.totalorder %s9143_s29, %s9139_s28  ;;  %p48_p1 = scmp.eq.s32.totalorder %s9229_s3, 0 }
   0xd   : > { %p197_p2 = scmp.eq.s32.totalorder %s9229_s3, 1  ;;  %p203_p3 = scmp.eq.s32.totalorder %s5920_s6, 1 }
   0xe   : > { %p9238_p4 = por %p48_p1, %p47_p0  ;;  %p5921_p5 = scmp.ge.s32.totalorder %s9151_s8, 1 }
   0xf   : > { %p9243_p6 = por %p203_p3, %p47_p0  ;;  %p210_p7 = scmp.lt.s32.totalorder %s9151_s8, 3 }
  0x10   : > { %s10205_s1 = sld [smem:[#allocation19_spill]]  ;;  %s9153_s15 = smov [#allocation8]  }
  0x11   : > { %p9251_p8 = pnand %p5921_p5, %p210_p7  ;;  %s223_s16 = sshll.u32 %s9153_s15, 4  ;;  %s224_s16 = int_to_ptr.vmem [resolvable:$true] %s223_s16 }
  0x12   : > { %s250_s20 = sshll.u32 %s10196_s4, 4  ;;  %s10200_s21 = smov 128   ;;  %s251_s20 = int_to_ptr.hbm [resolvable:$true] %s250_s20 }
  0x13   : > { %p8855_p9 = pneg %p9251_p8  ;;  %s10201_s22 = smov 8  }
  0x14   : > { %s9156_s23 = smov [#allocation11]   ;;  %s236_s27 = sshll.u32 %s10194_s2, 4  ;;  %s237_s27 = int_to_ptr.hbm [resolvable:$true] %s236_s27 }
  0x15   : > { %p9259_p10 = pnand %p8855_p9, %p48_p1  ;;  %s252_s24 = sshll.u32 %s9156_s23, 4  ;;  %s253_s24 = int_to_ptr.vmem [resolvable:$true] %s252_s24 }
  0x16   : > { %s221_s13 = sshll.u32 %s10205_s1, 4  ;;  %s265_s12 = sshll.u32 %s10197_s5, 4  ;;  %s222_s13 = int_to_ptr.hbm [resolvable:$true] %s221_s13  ;;  %s266_s12 = int_to_ptr.hbm [resolvable:$true] %s265_s12 }
  0x17   : > { %8858 = dma.hbm_to_vmem [thread:$0]  (!%p9259_p10), %s222_s13, 36864, %s224_s16, [#allocation9], %s10200_s21, %s10200_s21, %s10201_s22  }
  0x18   : > { %8864 = dma.hbm_to_vmem [thread:$0]  (!%p9259_p10), %s251_s20, 36864, %s253_s24, [#allocation12], %s10200_s21, %s10200_s21, %s10201_s22  }
  0x19   : > { %s9157_s13 = smov [#allocation10]   ;;  %s9158_s16 = smov [#allocation13]  }
  0x1a   : > { %s238_s15 = sshll.u32 %s9157_s13, 4  ;;  %s267_s18 = sshll.u32 %s9158_s16, 4  ;;  %s239_s15 = int_to_ptr.vmem [resolvable:$true] %s238_s15  ;;  %s268_s18 = int_to_ptr.vmem [resolvable:$true] %s267_s18 }
  0x1b   : > { %8861 = dma.hbm_to_vmem [thread:$0]  (!%p9259_p10), %s237_s27, 32, %s239_s15, [#allocation9]  }
  0x1c   : > { %8867 = dma.hbm_to_vmem [thread:$0]  (!%p9259_p10), %s266_s12, 32, %s268_s18, [#allocation12]  }
  0x1d   : > { %s9288_s19 = sadd.s32 1, %s9151_s8   ;;  %s34_s20 = sadd.s32 1, %s9147_s30 }
  0x1e   : > { %s31_s23 = ssub.s32 %s9151_s8, %s9288_s19  ;;  %p41_p12 = scmp.ne.s32.totalorder %s9147_s30, %s9143_s29 }
  0x1f   : > { %p32_p13 = scmp.eq.s32.totalorder %s31_s23, 0  ;;  %p42_p0 = scmp.eq.s32.totalorder %s9151_s8, 0 }
  0x20   : > { %p9298_p3 = por %p197_p2, %p41_p12  ;;  %p8880_p5 = scmp.lt.s32.totalorder %s9151_s8, 2 }
  0x21   : > { %s9304_s25 = scalar_select %p32_p13, %s9147_s30, %s34_s20  }
  0x22   : > { %p43_p7 = por %p42_p0, %p41_p12  ;;  %s281_s26 = sand.u32 1, %s9147_s30  }
  0x23   : > { %s8832_s17 = smul.u32 48, %s281_s26  ;;  %s282_s20 = scalar_lea.sflag [#allocation6], %s281_s26 }
  0x24   : > { %s8833_s27 = smul.u32 48, %s9151_s8  ;;  %p9308_p9 = pnand %p8880_p5, %p43_p7 }
  0x25   : > { %s285_s15 = scalar_lea.vmem [#allocation5], %s8832_s17  ;;  %s9054_s11 = scalar_lea.hbm %s10192_s0, 96 }
  0x26   : > { %s290_s13 = scalar_lea.hbm %s10192_s0, %s8833_s27  ;;  %s293_s16 = sshll.u32 %s285_s15, 4  ;;  %s294_s16 = int_to_ptr.vmem [resolvable:$true] %s293_s16 }
  0x27   : > { %s291_s18 = sshll.u32 %s290_s13, 4  ;;  %p9051_p10 = pneg %p9308_p9  ;;  %s292_s18 = int_to_ptr.hbm [resolvable:$true] %s291_s18 }
  0x28   : > { %s9047_s23 = sshra.s32 %s292_s18, 4  ;;  %s9048_s23 = int_to_ptr.hbm [resolvable:$true] %s9047_s23 }
  0x29   : > { %s9049_s21 = scalar_lea.hbm %s9048_s23, 48  ;;  %p9055_p0 = scmp.lt.s32.totalorder %s9048_s23, %s10192_s0 }
  0x2a   : > { %p9050_p2 = scmp.ne.s32.totalorder %s9048_s23, %s9049_s21  ;;  %p9056_p5 = scmp.lt.s32.totalorder %s9054_s11, %s9049_s21 }
  0x2c   : > { %p9052_p12 = pnand %p9051_p10, %p9050_p2  ;;  %p9057_p7 = por %p9056_p5, %p9055_p0 }
  0x2e   : > { %p9053_p13 = pneg %p9052_p12 }
  0x30   : > { %p9058_p11 = pnand %p9057_p7, %p9053_p13 }
  0x32   : > { %9061 = shalt.err (!%p9058_p11)
}
  0x33   : > { %s10210_s26 = smov 8   ;;  %s10211_s17 = smov 128  }
  0x34   : > { %8871 = dma.hbm_to_vmem [thread:$0]  (!%p9308_p9), %s292_s18, 768, %s294_s16, %s282_s20, %s10211_s17, %s10211_s17, %s10210_s26  }
  0x35   : > { %305 = sbr.rel (%p9251_p8) target bundleno = 955 (0x3bb), region = 48  ;;  %s9331_s1 = sand.u32 (!%p9251_p8), 1, %s9143_s29  }
  0x36   : > { %s8834_s22 = smul.u32 (!%p9251_p8), 48, %s9331_s1  ;;  %s308_s21 = scalar_lea.sflag (!%p9251_p8), [#allocation6], %s9331_s1 }
  0x38   : > { %s9335_s13 = scalar_lea.vmem (!%p9251_p8), [#allocation5], %s8834_s22 }
  0x3a   : > { %9122 = dma.done.wait (%p9238_p4), %s308_s21, 768  }
  0x3b   : > { %9124 = vsyncadd (%p9238_p4), %s308_s21, 4294966528 }
  0x3c   : > { %9126 = dma.done.wait (%p48_p1), [#allocation9], 36896  }
  0x3d   : > { %9128 = vsyncadd (%p48_p1), [#allocation9], 4294930400 }
  0x3e   : > { %9130 = dma.done.wait (%p48_p1), [#allocation12], 36896  }
  0x3f   : > { %9132 = vsyncadd (%p48_p1), [#allocation12], 4294930400  ;;  %v5996_v0 = vld [vmem:[#allocation8 + $0x70] sm:$0xf]  ;;  %v8270_v1 = vld [vmem:[#allocation8 + $0x74] sm:$0xf0] }
  0x40   : > { %v6060_v2 = vld [vmem:[#allocation8 + $0xf0] sm:$0xf]  ;;  %v5997_v3 = vor.u32 %v8270_v1, %v5996_v0  ;;  %v8286_v4 = vld [vmem:[#allocation8 + $0xf4] sm:$0xf0]  ;;  %v5988_v11 = vld [vmem:[#allocation8 + $0x60] sm:$0xf] }
  0x41   : > { %v6124_v5 = vld [vmem:[#allocation8 + $0x170] sm:$0xf]  ;;  %v8302_v6 = vld [vmem:[#allocation8 + $0x174] sm:$0xf0]  ;;  %v6061_v7 = vor.u32 %v8286_v4, %v6060_v2  ;;  %v8268_v13 = vld [vmem:[#allocation8 + $0x64] sm:$0xf0] }
  0x42   : > { %v6125_v8 = vor.u32 %v8302_v6, %v6124_v5  ;;  %v6188_v9 = vld [vmem:[#allocation8 + $0x1f0] sm:$0xf]  ;;  %v8318_v10 = vld [vmem:[#allocation8 + $0x1f4] sm:$0xf0]  ;;  %1236 = vmatpush.bf16.msra.mxu0 %v5997_v3  ;;  %v6052_v14 = vld [vmem:[#allocation8 + $0xe0] sm:$0xf]  ;;  %v5989_v16 = vor.u32 %v8268_v13, %v5988_v11 }
  0x43   : > { %v6189_v12 = vor.u32 %v8318_v10, %v6188_v9  ;;  %v8284_v15 = vld [vmem:[#allocation8 + $0xe4] sm:$0xf0]  ;;  %1250 = vmatpush.bf16.msra.mxu1 %v6061_v7  ;;  %v6116_v18 = vld [vmem:[#allocation8 + $0x160] sm:$0xf]  ;;  %v5980_v23 = vld [vmem:[#allocation8 + $0x50] sm:$0xf] }
  0x44   : > { %1264 = vmatpush.bf16.msra.mxu2 %v6125_v8  ;;  %v6053_v17 = vor.u32 %v8284_v15, %v6052_v14  ;;  %v8300_v19 = vld [vmem:[#allocation8 + $0x164] sm:$0xf0]  ;;  %v6180_v20 = vld [vmem:[#allocation8 + $0x1e0] sm:$0xf]  ;;  %v8266_v24 = vld [vmem:[#allocation8 + $0x54] sm:$0xf0] }
  0x45   : > { %1278 = vmatpush.bf16.msra.mxu3 %v6189_v12  ;;  %v6117_v21 = vor.u32 %v8300_v19, %v6116_v18  ;;  %v8316_v22 = vld [vmem:[#allocation8 + $0x1e4] sm:$0xf0]  ;;  %v6044_v26 = vld [vmem:[#allocation8 + $0xd0] sm:$0xf]  ;;  %v8282_v27 = vld [vmem:[#allocation8 + $0xd4] sm:$0xf0]  ;;  %v5981_v29 = vor.u32 %v8266_v24, %v5980_v23 }
  0x46   : > { %v6181_v25 = vor.u32 %v8316_v22, %v6180_v20  ;;  %v6108_v28 = vld [vmem:[#allocation8 + $0x150] sm:$0xf]  ;;  %1237 = vmatpush.bf16.msra.mxu0 %v5989_v16  ;;  %v8298_v30 = vld [vmem:[#allocation8 + $0x154] sm:$0xf0]  ;;  %v6045_v33 = vor.u32 %v8282_v27, %v6044_v26  ;;  %v5972_v35 = vld [vmem:[#allocation8 + $0x40] sm:$0xf] }
  0x47   : > { %v6172_v31 = vld [vmem:[#allocation8 + $0x1d0] sm:$0xf]  ;;  %v8314_v32 = vld [vmem:[#allocation8 + $0x1d4] sm:$0xf0]  ;;  %1251 = vmatpush.bf16.msra.mxu1 %v6053_v17  ;;  %v6109_v34 = vor.u32 %v8298_v30, %v6108_v28  ;;  %v8264_v36 = vld [vmem:[#allocation8 + $0x44] sm:$0xf0] }
  0x48   : > { %1265 = vmatpush.bf16.msra.mxu2 %v6117_v21  ;;  %v6036_v37 = vld [vmem:[#allocation8 + $0xc0] sm:$0xf]  ;;  %v6173_v38 = vor.u32 %v8314_v32, %v6172_v31  ;;  %v8280_v39 = vld [vmem:[#allocation8 + $0xc4] sm:$0xf0]  ;;  %v5973_v44 = vor.u32 %v8264_v36, %v5972_v35  ;;  %v5964_v47 = vld [vmem:[#allocation8 + $0x30] sm:$0xf] }
  0x49   : > { %1279 = vmatpush.bf16.msra.mxu3 %v6181_v25  ;;  %v6100_v40 = vld [vmem:[#allocation8 + $0x140] sm:$0xf]  ;;  %v8296_v41 = vld [vmem:[#allocation8 + $0x144] sm:$0xf0]  ;;  %v6037_v45 = vor.u32 %v8280_v39, %v6036_v37  ;;  %v8262_v48 = vld [vmem:[#allocation8 + $0x34] sm:$0xf0] }
  0x4a   : > { %v6164_v42 = vld [vmem:[#allocation8 + $0x1c0] sm:$0xf]  ;;  %v8312_v43 = vld [vmem:[#allocation8 + $0x1c4] sm:$0xf0]  ;;  %1238 = vmatpush.bf16.msra.mxu0 %v5981_v29  ;;  %v6101_v46 = vor.u32 %v8296_v41, %v6100_v40  ;;  %v6028_v49 = vld [vmem:[#allocation8 + $0xb0] sm:$0xf]  ;;  %v5965_v56 = vor.u32 %v8262_v48, %v5964_v47 }
  0x4b   : > { %1252 = vmatpush.bf16.msra.mxu1 %v6045_v33  ;;  %v6165_v50 = vor.u32 %v8312_v43, %v6164_v42  ;;  %v8278_v51 = vld [vmem:[#allocation8 + $0xb4] sm:$0xf0]  ;;  %v6092_v52 = vld [vmem:[#allocation8 + $0x130] sm:$0xf]  ;;  %v5956_v59 = vld [vmem:[#allocation8 + $0x20] sm:$0xf] }
  0x4c   : > { %1266 = vmatpush.bf16.msra.mxu2 %v6109_v34  ;;  %v8294_v53 = vld [vmem:[#allocation8 + $0x134] sm:$0xf0]  ;;  %v6156_v54 = vld [vmem:[#allocation8 + $0x1b0] sm:$0xf]  ;;  %v6029_v57 = vor.u32 %v8278_v51, %v6028_v49  ;;  %v8260_v60 = vld [vmem:[#allocation8 + $0x24] sm:$0xf0] }
  0x4d   : > { %1280 = vmatpush.bf16.msra.mxu3 %v6173_v38  ;;  %v8310_v55 = vld [vmem:[#allocation8 + $0x1b4] sm:$0xf0]  ;;  %v6093_v58 = vor.u32 %v8294_v53, %v6092_v52  ;;  %v6020_v61 = vld [vmem:[#allocation8 + $0xa0] sm:$0xf]  ;;  %v8276_v63 = vld [vmem:[#allocation8 + $0xa4] sm:$0xf0]  ;;  %v5957_v4 = vor.u32 %v8260_v60, %v5956_v59 }
  0x4e   : > { %1239 = vmatpush.bf16.msra.mxu0 %v5973_v44  ;;  %v6157_v62 = vor.u32 %v8310_v55, %v6156_v54  ;;  %v6084_v0 = vld [vmem:[#allocation8 + $0x120] sm:$0xf]  ;;  %v8292_v1 = vld [vmem:[#allocation8 + $0x124] sm:$0xf0]  ;;  %v5948_v5 = vld [vmem:[#allocation8 + $0x10] sm:$0xf]  ;;  %v6021_v7 = vor.u32 %v8276_v63, %v6020_v61 }
  0x4f   : > { %1253 = vmatpush.bf16.msra.mxu1 %v6037_v45  ;;  %v6148_v2 = vld [vmem:[#allocation8 + $0x1a0] sm:$0xf]  ;;  %v8308_v3 = vld [vmem:[#allocation8 + $0x1a4] sm:$0xf0]  ;;  %v8258_v6 = vld [vmem:[#allocation8 + $0x14] sm:$0xf0]  ;;  %v6085_v8 = vor.u32 %v8292_v1, %v6084_v0 }
  0x50   : > { %1267 = vmatpush.bf16.msra.mxu2 %v6101_v46  ;;  %v6012_v9 = vld [vmem:[#allocation8 + $0x90] sm:$0xf]  ;;  %v8274_v10 = vld [vmem:[#allocation8 + $0x94] sm:$0xf0]  ;;  %v6149_v12 = vor.u32 %v8308_v3, %v6148_v2  ;;  %v5940_v16 = vld [vmem:[#allocation8] sm:$0xf]  ;;  %v5949_v20 = vor.u32 %v8258_v6, %v5948_v5 }
  0x51   : > { %1281 = vmatpush.bf16.msra.mxu3 %v6165_v50  ;;  %v6076_v11 = vld [vmem:[#allocation8 + $0x110] sm:$0xf]  ;;  %v8290_v13 = vld [vmem:[#allocation8 + $0x114] sm:$0xf0]  ;;  %v8256_v17 = vld [vmem:[#allocation8 + $0x4] sm:$0xf0]  ;;  %v6013_v27 = vor.u32 %v8274_v10, %v6012_v9 }
  0x52   : > { %1240 = vmatpush.bf16.msra.mxu0 %v5965_v56  ;;  %v6140_v14 = vld [vmem:[#allocation8 + $0x190] sm:$0xf]  ;;  %v8306_v15 = vld [vmem:[#allocation8 + $0x194] sm:$0xf0]  ;;  %v9349_v18 = vld [vmem:[#allocation8 + $0x80] sm:$0xf]  ;;  %v6077_v28 = vor.u32 %v8290_v13, %v6076_v11  ;;  %v5941_v45 = vor.u32 %v8256_v17, %v5940_v16 }
  0x53   : > { %1254 = vmatpush.bf16.msra.mxu1 %v6029_v57  ;;  %v9351_v19 = vld [vmem:[#allocation8 + $0x84] sm:$0xf0]  ;;  %v9353_v21 = vld [vmem:[#allocation8 + $0x100] sm:$0xf]  ;;  %v9361_v25 = vld [vmem:[#allocation8 + $0x270] sm:$0xf]  ;;  %v6141_v37 = vor.u32 %v8306_v15, %v6140_v14 }
  0x54   : > { %1268 = vmatpush.bf16.msra.mxu2 %v6093_v58  ;;  %v9355_v22 = vld [vmem:[#allocation8 + $0x104] sm:$0xf0]  ;;  %v9357_v23 = vld [vmem:[#allocation8 + $0x180] sm:$0xf]  ;;  %v9363_v26 = vld [vmem:[#allocation8 + $0x274] sm:$0xf0]  ;;  %v6005_v46 = vor.u32 %v9351_v19, %v9349_v18 }
  0x55   : > { %1282 = vmatpush.bf16.msra.mxu3 %v6157_v62  ;;  %v9359_v24 = vld [vmem:[#allocation8 + $0x184] sm:$0xf0]  ;;  %v9365_v29 = vld [vmem:[#allocation8 + $0x2f0] sm:$0xf]  ;;  %v9367_v30 = vld [vmem:[#allocation8 + $0x2f4] sm:$0xf0]  ;;  %v6069_v50 = vor.u32 %v9355_v22, %v9353_v21  ;;  %v6253_v52 = vor.u32 %v9363_v26, %v9361_v25 }
  0x56   : > { %1241 = vmatpush.bf16.msra.mxu0 %v5957_v4  ;;  %v9369_v31 = vld [vmem:[#allocation8 + $0x74] sm:$0xf]  ;;  %v9371_v32 = vld [vmem:[#allocation8 + $0x78] sm:$0xf0]  ;;  %v9377_v35 = vld [vmem:[#allocation8 + $0x260] sm:$0xf]  ;;  %v6133_v51 = vor.u32 %v9359_v24, %v9357_v23  ;;  %v6317_v56 = vor.u32 %v9367_v30, %v9365_v29 }
  0x57   : > { %1255 = vmatpush.bf16.msra.mxu1 %v6021_v7  ;;  %v9373_v33 = vld [vmem:[#allocation8 + $0xf4] sm:$0xf]  ;;  %v9375_v34 = vld [vmem:[#allocation8 + $0xf8] sm:$0xf0]  ;;  %v9379_v36 = vld [vmem:[#allocation8 + $0x264] sm:$0xf0]  ;;  %v6001_v57 = vor.u32 %v9369_v31, %v9371_v32 }
  0x58   : > { %1269 = vmatpush.bf16.msra.mxu2 %v6085_v8  ;;  %v9381_v38 = vld [vmem:[#allocation8 + $0x2e0] sm:$0xf]  ;;  %v9383_v39 = vld [vmem:[#allocation8 + $0x2e4] sm:$0xf0]  ;;  %v9385_v40 = vld [vmem:[#allocation8 + $0x64] sm:$0xf]  ;;  %v6065_v58 = vor.u32 %v9373_v33, %v9375_v34  ;;  %v6245_v59 = vor.u32 %v9379_v36, %v9377_v35 }
  0x59   : > { %1283 = vmatpush.bf16.msra.mxu3 %v6149_v12  ;;  %v9387_v41 = vld [vmem:[#allocation8 + $0x68] sm:$0xf0]  ;;  %v9389_v42 = vld [vmem:[#allocation8 + $0xe4] sm:$0xf]  ;;  %v9393_v44 = vld [vmem:[#allocation8 + $0x250] sm:$0xf]  ;;  %v6309_v63 = vor.u32 %v9383_v39, %v9381_v38 }
  0x5a   : > { %v9391_v43 = vld [vmem:[#allocation8 + $0xe8] sm:$0xf0]  ;;  %1242 = vmatpush.bf16.msra.mxu0 %v5949_v20  ;;  %v9397_v47 = vld [vmem:[#allocation8 + $0x254] sm:$0xf0]  ;;  %v9399_v48 = vld [vmem:[#allocation8 + $0x2d0] sm:$0xf]  ;;  %v5993_v0 = vor.u32 %v9385_v40, %v9387_v41 }
  0x5b   : > { %v9401_v49 = vld [vmem:[#allocation8 + $0x2d4] sm:$0xf0]  ;;  %1256 = vmatpush.bf16.msra.mxu1 %v6013_v27  ;;  %v9409_v53 = vld [vmem:[#allocation8 + $0x54] sm:$0xf]  ;;  %v9411_v54 = vld [vmem:[#allocation8 + $0x58] sm:$0xf0]  ;;  %v6057_v1 = vor.u32 %v9389_v42, %v9391_v43  ;;  %v6237_v2 = vor.u32 %v9397_v47, %v9393_v44 }
  0x5c   : > { %1270 = vmatpush.bf16.msra.mxu2 %v6077_v28  ;;  %v9413_v55 = vld [vmem:[#allocation8 + $0xd4] sm:$0xf]  ;;  %v9423_v60 = vld [vmem:[#allocation8 + $0xd8] sm:$0xf0]  ;;  %v9425_v61 = vld [vmem:[#allocation8 + $0x240] sm:$0xf]  ;;  %v6301_v6 = vor.u32 %v9401_v49, %v9399_v48  ;;  %v5985_v7 = vor.u32 %v9409_v53, %v9411_v54 }
  0x5d   : > { %1284 = vmatpush.bf16.msra.mxu3 %v6141_v37  ;;  %v9427_v62 = vld [vmem:[#allocation8 + $0x244] sm:$0xf0]  ;;  %v9437_v3 = vld [vmem:[#allocation8 + $0x2c0] sm:$0xf]  ;;  %v9441_v5 = vld [vmem:[#allocation8 + $0x44] sm:$0xf]  ;;  %v6049_v8 = vor.u32 %v9413_v55, %v9423_v60 }
  0x5e   : > { %v9439_v4 = vld [vmem:[#allocation8 + $0x2c4] sm:$0xf0]  ;;  %1243 = vmatpush.bf16.msra.mxu0 %v5941_v45  ;;  %v6229_v9 = vor.u32 %v9427_v62, %v9425_v61  ;;  %v9451_v10 = vld [vmem:[#allocation8 + $0x48] sm:$0xf0]  ;;  %v9453_v11 = vld [vmem:[#allocation8 + $0xc4] sm:$0xf] }
  0x5f   : > { %v9455_v12 = vld [vmem:[#allocation8 + $0xc8] sm:$0xf0]  ;;  %1257 = vmatpush.bf16.msra.mxu1 %v6005_v46  ;;  %v6293_v13 = vor.u32 %v9439_v4, %v9437_v3  ;;  %v5977_v14 = vor.u32 %v9441_v5, %v9451_v10  ;;  %v365_v16 = vld [vmem:[%s9335_s13] sm:$0x33]  ;;  %v367_v18 = vld [vmem:[%s9335_s13 + $0x10] sm:$0x33] }
  0x60   : > { %1271 = vmatpush.bf16.msra.mxu2 %v6069_v50  ;;  %v6041_v15 = vor.u32 %v9453_v11, %v9455_v12  ;;  %v366_v17 = vld [vmem:[%s9335_s13 + $0x8] sm:$0x33]  ;;  %v368_v19 = vld [vmem:[%s9335_s13 + $0x18] sm:$0x33]  ;;  %v389_v20 = vunpack.c.l.b16 %v365_v16  ;;  %v390_v21 = vunpack.c.h.b16 %v365_v16  ;;  %v371_v24 = vld [vmem:[%s9335_s13] sm:$0x77]  ;;  %v393_v26 = vunpack.c.l.b16 %v367_v18 }
  0x61   : > { %1285 = vmatpush.bf16.msra.mxu3 %v6133_v51  ;;  %v391_v22 = vunpack.c.l.b16 %v366_v17  ;;  %v392_v23 = vunpack.c.h.b16 %v366_v17  ;;  %v372_v25 = vld [vmem:[%s9335_s13 + $0x8] sm:$0x77]  ;;  %v394_v27 = vunpack.c.h.b16 %v367_v18  ;;  %v395_v28 = vunpack.c.l.b16 %v368_v19  ;;  %v373_v30 = vld [vmem:[%s9335_s13 + $0x10] sm:$0x77]  ;;  %v374_v31 = vld [vmem:[%s9335_s13 + $0x18] sm:$0x77] }
  0x62   : > { %1292 = vmatpush.bf16.msrb.mxu0 %v6253_v52  ;;  %v396_v29 = vunpack.c.h.b16 %v368_v19  ;;  %v9471_v32 = vpack.c.b16 %v389_v20, %v389_v20  ;;  %v9473_v33 = vpack.c.b16 %v390_v21, %v390_v21  ;;  %v9479_v36 = vpack.c.b16 %v393_v26, %v393_v26  ;;  %v6220_v12 = vld [vmem:[#allocation8 + $0x230] sm:$0xf]  ;;  %s9845_s9 = sld [smem:[#allocation3]]  ;;  %s5933_s6 = sshll.u32 %s9331_s1, 5 }
  0x63   : > { %1306 = vmatpush.bf16.msrb.mxu1 %v6317_v56  ;;  %v9475_v34 = vpack.c.b16 %v391_v22, %v391_v22  ;;  %v9477_v35 = vpack.c.b16 %v392_v23, %v392_v23  ;;  %v9481_v37 = vpack.c.b16 %v394_v27, %v394_v27  ;;  %v9483_v38 = vpack.c.b16 %v395_v28, %v395_v28  ;;  %s5763_s14 = sld [smem:[#allocation4]]  ;;  %s8831_s15 = sshll.u32 %s9229_s3, 5 }
  0x64   : > { %1320 = vmatpush.bf16.msrb.mxu2 %v6001_v57  ;;  %v9485_v39 = vpack.c.b16 %v396_v29, %v396_v29  ;;  %v419_v40 = vunpack.c.l.b16 %v371_v24  ;;  %v420_v41 = vunpack.c.h.b16 %v371_v24  ;;  %v421_v42 = vunpack.c.l.b16 %v372_v25  ;;  %s362_s16 = scalar_lea.vmem [#allocation14], %s5933_s6  ;;  %s5805_s23 = scalar_lea.hbm %s10199_s7, %s8831_s15 }
  0x65   : > { %1334 = vmatpush.bf16.msrb.mxu3 %v6065_v58  ;;  %v422_v43 = vunpack.c.h.b16 %v372_v25  ;;  %v423_v45 = vunpack.c.l.b16 %v373_v30  ;;  %v424_v46 = vunpack.c.h.b16 %v373_v30  ;;  %v425_v50 = vunpack.c.l.b16 %v374_v31  ;;  %s5806_s3 = sshll.u32 %s362_s16, 4  ;;  %s5808_s11 = sshll.u32 %s5805_s23, 4  ;;  %s5807_s3 = int_to_ptr.vmem [resolvable:$true] %s5806_s3  ;;  %s5809_s11 = int_to_ptr.hbm [resolvable:$true] %s5808_s11 }
  0x66   : > { %1293 = vmatpush.bf16.msrb.mxu0 %v6245_v59  ;;  %v426_v51 = vunpack.c.h.b16 %v374_v31  ;;  %v431_v52 = vpack.c.b16 %v419_v40, %v419_v40  ;;  %v432_v56 = vpack.c.b16 %v420_v41, %v420_v41  ;;  %v433_v57 = vpack.c.b16 %v421_v42, %v421_v42  ;;  %v6284_v42 = vld [vmem:[#allocation8 + $0x2b0] sm:$0xf]  ;;  %s5794_s12 = scalar_lea.sflag [#allocation7], %s9331_s1  ;;  %s9091_s27 = sshra.s32 %s5809_s11, 4  ;;  %s9092_s27 = int_to_ptr.hbm [resolvable:$true] %s9091_s27 }
  0x67   : > { %1307 = vmatpush.bf16.msrb.mxu1 %v6309_v63  ;;  %v434_v58 = vpack.c.b16 %v422_v43, %v422_v43  ;;  %v435_v16 = vpack.c.b16 %v423_v45, %v423_v45  ;;  %v436_v17 = vpack.c.b16 %v424_v46, %v424_v46  ;;  %v437_v18 = vpack.c.b16 %v425_v50, %v425_v50  ;;  %v8342_v43 = vld [vmem:[#allocation8 + $0x2b4] sm:$0xf0]  ;;  %v8261_v46 = vld [vmem:[#allocation8 + $0x34] sm:$0xf]  ;;  %v5966_v50 = vld [vmem:[#allocation8 + $0x38] sm:$0xf0]  ;;  %p9098_p11 = scmp.lt.s32.totalorder %s9092_s27, %s10199_s7 }
  0x68   : > { %1321 = vmatpush.bf16.msrb.mxu2 %v5993_v0  ;;  %v438_v19 = vpack.c.b16 %v426_v51, %v426_v51  ;;  %v444_v59 = vshrl.u32 %v431_v52, 16  ;;  %v446_v63 = vshll.u32 %v431_v52, 16  ;;  %v451_v0 = vshrl.u32 %v432_v56, 16  ;;  %v8277_v51 = vld [vmem:[#allocation8 + $0xb4] sm:$0xf]  ;;  %s9093_s26 = scalar_lea.hbm %s9092_s27, 32 }
  0x69   : > { %1335 = vmatpush.bf16.msrb.mxu3 %v6057_v1  ;;  %v453_v20 = vshll.u32 %v432_v56, 16  ;;  %v458_v1 = vshrl.u32 %v433_v57, 16  ;;  %v460_v21 = vshll.u32 %v433_v57, 16  ;;  %v465_v22 = vshrl.u32 %v434_v58, 16  ;;  %v6212_v57 = vld [vmem:[#allocation8 + $0x220] sm:$0xf]  ;;  %p9094_p1 = scmp.ne.s32.totalorder %s9092_s27, %s9093_s26 }
  0x6a   : > { %1294 = vmatpush.bf16.msrb.mxu0 %v6237_v2  ;;  %v467_v23 = vshll.u32 %v434_v58, 16  ;;  %v448_v44 = vrot.slane %v446_v63, 1  ;;  %v472_v2 = vshrl.u32 %v435_v16, 16  ;;  %v474_v24 = vshll.u32 %v435_v16, 16  ;;  %v8324_v58 = vld [vmem:[#allocation8 + $0x224] sm:$0xf0] }
  0x6b   : > { %1308 = vmatpush.bf16.msrb.mxu1 %v6301_v6  ;;  %v455_v47 = vrot.slane %v453_v20, 1  ;;  %v462_v25 = vrot.slane %v460_v21, 1  ;;  %v479_v48 = vshrl.u32 %v436_v17, 16  ;;  %v481_v49 = vshll.u32 %v436_v17, 16  ;;  %v6276_v16 = vld [vmem:[#allocation8 + $0x2a0] sm:$0xf]  ;;  %p9095_p4 = pnand %p9094_p1, %p9298_p3 }
  0x6c   : > { %1322 = vmatpush.bf16.msrb.mxu2 %v5985_v7  ;;  %v469_v26 = vrot.slane %v467_v23, 1  ;;  %v449_v53 = vor.u32 %v448_v44, %v444_v59  ;;  %v476_v6 = vrot.slane %v474_v24, 1  ;;  %v486_v7 = vshrl.u32 %v437_v18, 16  ;;  %v8340_v17 = vld [vmem:[#allocation8 + $0x2a4] sm:$0xf0]  ;;  %s9097_s21 = scalar_lea.hbm %s10199_s7, 64 }
  0x6d   : > { %1336 = vmatpush.bf16.msrb.mxu3 %v6049_v8  ;;  %v456_v54 = vor.u32 %v455_v47, %v451_v0  ;;  %v463_v55 = vor.u32 %v462_v25, %v458_v1  ;;  %v483_v8 = vrot.slane %v481_v49, 1  ;;  %v488_v27 = vshll.u32 %v437_v18, 16  ;;  %v8259_v63 = vld [vmem:[#allocation8 + $0x24] sm:$0xf]  ;;  %v5958_v0 = vld [vmem:[#allocation8 + $0x28] sm:$0xf0]  ;;  %p9096_p8 = pneg %p9095_p4  ;;  %p9099_p9 = scmp.lt.s32.totalorder %s9097_s21, %s9093_s26 }
  0x6e   : > { %1295 = vmatpush.bf16.msrb.mxu0 %v6229_v9  ;;  %v470_v60 = vor.u32 %v469_v26, %v465_v22  ;;  %v477_v61 = vor.u32 %v476_v6, %v472_v2  ;;  %v493_v62 = vshrl.u32 %v438_v19, 16  ;;  %v495_v9 = vshll.u32 %v438_v19, 16  ;;  %v8275_v22 = vld [vmem:[#allocation8 + $0xa4] sm:$0xf]  ;;  %v6022_v23 = vld [vmem:[#allocation8 + $0xa8] sm:$0xf0] }
  0x6f   : > { %1309 = vmatpush.bf16.msrb.mxu1 %v6293_v13  ;;  %v569_v28 = vrot.slane %v9473_v33, 6  ;;  %v484_v29 = vor.u32 %v483_v8, %v479_v48  ;;  %v490_v3 = vrot.slane %v488_v27, 1  ;;  %v570_v4 = vrot.slane %v449_v53, 4  ;;  %v9535_v24 = vld [vmem:[#allocation8 + $0x210] sm:$0xf]  ;;  %p9100_p2 = por %p9099_p9, %p9098_p11 }
  0x70   : > { %1323 = vmatpush.bf16.msrb.mxu2 %v5977_v14  ;;  %v571_v13 = vrot.slane %v456_v54, 2  ;;  %v497_v30 = vrot.slane %v495_v9, 1  ;;  %v573_v5 = vrot.slane %v9477_v35, 6  ;;  %v574_v10 = vrot.slane %v463_v55, 4  ;;  %v6030_v35 = vld [vmem:[#allocation8 + $0xb8] sm:$0xf0] }
  0x71   : > { %1337 = vmatpush.bf16.msrb.mxu3 %v6041_v15  ;;  %v575_v14 = vrot.slane %v470_v60, 2  ;;  %v491_v31 = vor.u32 %v490_v3, %v486_v7  ;;  %v577_v40 = vrot.slane %v9481_v37, 6  ;;  %v578_v41 = vrot.slane %v477_v61, 4  ;;  %v8326_v15 = vld [vmem:[#allocation8 + $0x234] sm:$0xf0]  ;;  %p9101_p10 = pnand %p9100_p2, %p9096_p8 }
  0x72   : > { %v579_v11 = vrot.slane %v484_v29, 2  ;;  %v498_v45 = vor.u32 %v497_v30, %v493_v62  ;;  %v581_v33 = vrot.slane %v9485_v39, 6  ;;  %vm585_vm0 = vcmask 1041408   ;;  %v9539_v25 = vld [vmem:[#allocation8 + $0x290] sm:$0xf] }
  0x73   : > { %vm589_vm1 = vcmask 1045508   ;;  %v582_v52 = vrot.slane %v491_v31, 4  ;;  %v588_v56 = vsel %vm585_vm0, %v9471_v32, %v569_v28  ;;  %vm593_vm2 = vcmask 1043456   ;;  %v9545_v49 = vld [vmem:[#allocation8 + $0x294] sm:$0xf0] }
  0x74   : > { %v592_v37 = vsel %vm589_vm1, %v570_v4, %v571_v13  ;;  %v583_v18 = vrot.slane %v498_v45, 2  ;;  %v600_v19 = vsel %vm585_vm0, %v9475_v34, %v573_v5  ;;  %v603_v59 = vsel %vm589_vm1, %v574_v10, %v575_v14  ;;  %v377_v53 = vld [vmem:[%s9335_s13] sm:$0x66]  ;;  %v9551_v55 = vld [vmem:[#allocation8 + $0x18] sm:$0xf0] }
  0x75   : > { %v594_v39 = vsel %vm593_vm2, %v588_v56, %v592_v37  ;;  %v9523_v20 = vsel %vm593_vm2, %v600_v19, %v603_v59  ;;  %v610_v32 = vsel %vm585_vm0, %v9479_v36, %v577_v40  ;;  %v613_v1 = vsel %vm589_vm1, %v578_v41, %v579_v11  ;;  %v9537_v36 = vld [vmem:[#allocation8 + $0x214] sm:$0xf0]  ;;  %v9549_v7 = vld [vmem:[#allocation8 + $0x14] sm:$0xf]  ;;  %v9555_v61 = vld [vmem:[#allocation8 + $0x98] sm:$0xf0] }
  0x76   : > { %v620_v21 = vsel %vm585_vm0, %v9483_v38, %v581_v33  ;;  %729 = vst [vmem:[#allocation1] ss:$4 sm:$0xff] %v594_v39  ;;  %v9531_v34 = vsel %vm593_vm2, %v610_v32, %v613_v1  ;;  %v623_v44 = vsel %vm589_vm1, %v582_v52, %v583_v18  ;;  %v6221_v47 = vor.u32 %v8326_v15, %v6220_v12  ;;  %v9553_v27 = vld [vmem:[#allocation8 + $0x94] sm:$0xf]  ;;  %v378_v62 = vld [vmem:[%s9335_s13 + $0x8] sm:$0x66] }
  0x77   : > { %731 = vst [vmem:[#allocation1 + $0x1] ss:$4 sm:$0xff] %v9523_v20  ;;  %v6285_v2 = vor.u32 %v8342_v43, %v6284_v42  ;;  %v9542_v38 = vsel %vm593_vm2, %v620_v21, %v623_v44  ;;  %v5969_v26 = vor.u32 %v8261_v46, %v5966_v50  ;;  %v6033_v48 = vor.u32 %v8277_v51, %v6030_v35  ;;  %v379_v9 = vld [vmem:[%s9335_s13 + $0x10] sm:$0x66]  ;;  %v380_v28 = vld [vmem:[%s9335_s13 + $0x18] sm:$0x66] }
  0x78   : > { %733 = vst [vmem:[#allocation1 + $0x2] ss:$4 sm:$0xff] %v9531_v34  ;;  %1296 = vmatpush.bf16.msrb.mxu0 %v6221_v47  ;;  %v6213_v54 = vor.u32 %v8324_v58, %v6212_v57  ;;  %v6277_v6 = vor.u32 %v8340_v17, %v6276_v16  ;;  %v5961_v60 = vor.u32 %v8259_v63, %v5958_v0  ;;  %v533_v29 = vunpack.c.l.b16 %v377_v53  ;;  %v9568_v5 = vld [vmem:[#allocation8 + $0x200] sm:$0xf]  ;;  %v9570_v40 = vld [vmem:[#allocation8 + $0x204] sm:$0xf0] }
  0x79   : > { %735 = vst [vmem:[#allocation1 + $0x3] ss:$4 sm:$0xff] %v9542_v38  ;;  %1310 = vmatpush.bf16.msrb.mxu1 %v6285_v2  ;;  %1324 = vmatpush.bf16.msrb.mxu2 %v5969_v26  ;;  %v6025_v8 = vor.u32 %v8275_v22, %v6022_v23  ;;  %v6205_v3 = vor.u32 %v9537_v36, %v9535_v24  ;;  %v534_v10 = vunpack.c.h.b16 %v377_v53  ;;  %v535_v14 = vunpack.c.l.b16 %v378_v62  ;;  %v9572_v41 = vld [vmem:[#allocation8 + $0x280] sm:$0xf]  ;;  %v9574_v11 = vld [vmem:[#allocation8 + $0x284] sm:$0xf0] }
  0x7a   : > { %1338 = vmatpush.bf16.msrb.mxu3 %v6033_v48  ;;  %v6269_v4 = vor.u32 %v9545_v49, %v9539_v25  ;;  %v5953_v13 = vor.u32 %v9549_v7, %v9551_v55  ;;  %v6017_v30 = vor.u32 %v9553_v27, %v9555_v61  ;;  %v536_v31 = vunpack.c.h.b16 %v378_v62  ;;  %v9576_v45 = vld [vmem:[#allocation8 + $0x4] sm:$0xf]  ;;  %v9578_v33 = vld [vmem:[#allocation8 + $0x8] sm:$0xf0]  ;;  %v9584_v51 = vld [vmem:[#allocation8 + $0x174] sm:$0xf] }
  0x7b   : > { %v537_v12 = vunpack.c.l.b16 %v379_v9  ;;  %v538_v15 = vunpack.c.h.b16 %v379_v9  ;;  %v539_v42 = vunpack.c.l.b16 %v380_v28  ;;  %v540_v43 = vunpack.c.h.b16 %v380_v28  ;;  %v9580_v46 = vld [vmem:[#allocation8 + $0x84] sm:$0xf]  ;;  %v9582_v50 = vld [vmem:[#allocation8 + $0x88] sm:$0xf0]  ;;  %v9586_v35 = vld [vmem:[#allocation8 + $0x178] sm:$0xf0] }
  0x7c   : > { %1297 = vmatpush.bf16.msrb.mxu0 %v6213_v54  ;;  %v545_v52 = vpack.c.b16 %v533_v29, %v533_v29  ;;  %v546_v56 = vpack.c.b16 %v534_v10, %v534_v10  ;;  %v547_v37 = vpack.c.b16 %v535_v14, %v535_v14  ;;  %v548_v57 = vpack.c.b16 %v536_v31, %v536_v31  ;;  %v8317_v17 = vld [vmem:[#allocation8 + $0x1f4] sm:$0xf]  ;;  %v6190_v18 = vld [vmem:[#allocation8 + $0x1f8] sm:$0xf0]  ;;  %v8299_v7 = vld [vmem:[#allocation8 + $0x164] sm:$0xf] }
  0x7d   : > { %1311 = vmatpush.bf16.msrb.mxu1 %v6277_v6  ;;  %1325 = vmatpush.bf16.msrb.mxu2 %v5961_v60  ;;  %v549_v39 = vpack.c.b16 %v537_v12, %v537_v12  ;;  %v550_v19 = vpack.c.b16 %v538_v15, %v538_v15  ;;  %v551_v59 = vpack.c.b16 %v539_v42, %v539_v42  ;;  %v8333_v22 = vld [vmem:[#allocation8 + $0x274] sm:$0xf]  ;;  %v6254_v23 = vld [vmem:[#allocation8 + $0x278] sm:$0xf0]  ;;  %v6118_v61 = vld [vmem:[#allocation8 + $0x168] sm:$0xf0] }
  0x7e   : > { %1339 = vmatpush.bf16.msrb.mxu3 %v6025_v8  ;;  %v552_v63 = vpack.c.b16 %v540_v43, %v540_v43  ;;  %v6197_v1 = vor.u32 %v9570_v40, %v9568_v5  ;;  %v6261_v21 = vor.u32 %v9574_v11, %v9572_v41  ;;  %v8349_v44 = vld [vmem:[#allocation8 + $0x2f4] sm:$0xf]  ;;  %v6318_v47 = vld [vmem:[#allocation8 + $0x2f8] sm:$0xf0]  ;;  %v557_v2 = vrot.slane %v545_v52, 1 }
  0x7f   : > { %v559_v24 = vrot.slane %v547_v37, 1  ;;  %v561_v36 = vrot.slane %v549_v39, 1  ;;  %v563_v25 = vrot.slane %v551_v59, 1  ;;  %v5934_v26 = vrot.slane %v546_v56, 7  ;;  %v8315_v62 = vld [vmem:[#allocation8 + $0x1e4] sm:$0xf] }
  0x80   : > { %v9588_v58 = vld.sshfl [vmem:[#allocation1] sm:$0xff pattern:$0x73625140]  ;;  %v9590_v16 = vld.sshfl [vmem:[#allocation1 + $0x8] sm:$0xff pattern:$0x73625140]  ;;  %1298 = vmatpush.bf16.msrb.mxu0 %v6205_v3  ;;  %v5945_v54 = vor.u32 %v9576_v45, %v9578_v33  ;;  %v6129_v6 = vor.u32 %v9584_v51, %v9586_v35  ;;  %v6193_v55 = vor.u32 %v8317_v17, %v6190_v18  ;;  %v6257_v28 = vor.u32 %v8333_v22, %v6254_v23 }
  0x81   : > { %1244 = vmatmul.bf16.vlgmr.msra.gmra.mxu0 %v9588_v58  ;;  %1258 = vmatmul.bf16.vlgmr.msra.gmra.mxu1 %v9590_v16  ;;  %v9594_v0 = vld.sshfl [vmem:[#allocation1 + $0x10] sm:$0xff pattern:$0x73625140]  ;;  %v9596_v32 = vld.sshfl [vmem:[#allocation1 + $0x18] sm:$0xff pattern:$0x73625140]  ;;  %v597_v60 = vsel %vm585_vm0, %v557_v2, %v5934_v26  ;;  %v6321_v29 = vor.u32 %v8349_v44, %v6318_v47  ;;  %v6121_v10 = vor.u32 %v8299_v7, %v6118_v61 }
  0x82   : > { %1272 = vmatmul.bf16.vlgmr.msra.gmra.mxu2 %v9594_v0  ;;  %1286 = vmatmul.bf16.vlgmr.msra.gmra.mxu3 %v9596_v32  ;;  %1515 = vst [vmem:[#allocation1] ss:$4 sm:$0xff] %v9523_v20  ;;  %v5935_v48 = vrot.slane %v548_v57, 7  ;;  %v5936_v49 = vrot.slane %v550_v19, 7  ;;  %v5937_v53 = vrot.slane %v552_v63, 7  ;;  %v6009_v20 = vor.u32 %v9580_v46, %v9582_v50 }
  0x83   : > { %1517 = vst [vmem:[#allocation1 + $0x1] ss:$4 sm:$0xff] %v9531_v34  ;;  %1312 = vmatpush.bf16.msrb.mxu1 %v6269_v4  ;;  %1326 = vmatpush.bf16.msrb.mxu2 %v5953_v13  ;;  %v6182_v9 = vld [vmem:[#allocation8 + $0x1e8] sm:$0xf0]  ;;  %v8331_v4 = vld [vmem:[#allocation8 + $0x264] sm:$0xf] }
  0x84   : > { %1519 = vst [vmem:[#allocation1 + $0x2] ss:$4 sm:$0xff] %v9542_v38  ;;  %1340 = vmatpush.bf16.msrb.mxu3 %v6017_v30  ;;  %v607_v8 = vsel %vm585_vm0, %v559_v24, %v5935_v48  ;;  %v9616_v27 = vsel %vm585_vm0, %v561_v36, %v5936_v49  ;;  %v9619_v3 = vsel %vm585_vm0, %v563_v25, %v5937_v53  ;;  %v6246_v13 = vld [vmem:[#allocation8 + $0x268] sm:$0xf0]  ;;  %v8347_v30 = vld [vmem:[#allocation8 + $0x2e4] sm:$0xf] }
  0x85   : > { %737 = vst [vmem:[#allocation1 + $0x20] ss:$4 sm:$0xff] %v597_v60  ;;  %1299 = vmatpush.bf16.msrb.mxu0 %v6197_v1  ;;  %v6310_v5 = vld [vmem:[#allocation8 + $0x2e8] sm:$0xf0]  ;;  %v6185_v14 = vor.u32 %v8315_v62, %v6182_v9  ;;  %v6249_v31 = vor.u32 %v8331_v4, %v6246_v13  ;;  %v8297_v41 = vld [vmem:[#allocation8 + $0x154] sm:$0xf] }
  0x86   : > { %739 = vst [vmem:[#allocation1 + $0x21] ss:$4 sm:$0xff] %v607_v8  ;;  %v6313_v40 = vor.u32 %v8347_v30, %v6310_v5  ;;  %v6110_v11 = vld [vmem:[#allocation8 + $0x158] sm:$0xf0]  ;;  %v8313_v12 = vld [vmem:[#allocation8 + $0x1d4] sm:$0xf] }
  0x87   : > { %1313 = vmatpush.bf16.msrb.mxu1 %v6261_v21  ;;  %1327 = vmatpush.bf16.msrb.mxu2 %v5945_v54  ;;  %741 = vst [vmem:[#allocation1 + $0x22] ss:$4 sm:$0xff] %v9616_v27  ;;  %v6174_v15 = vld [vmem:[#allocation8 + $0x1d8] sm:$0xf0]  ;;  %v8329_v42 = vld [vmem:[#allocation8 + $0x254] sm:$0xf]  ;;  %v6113_v51 = vor.u32 %v8297_v41, %v6110_v11 }
  0x88   : > { %1341 = vmatpush.bf16.msrb.mxu3 %v6009_v20  ;;  %743 = vst [vmem:[#allocation1 + $0x23] ss:$4 sm:$0xff] %v9619_v3  ;;  %v6238_v43 = vld [vmem:[#allocation8 + $0x258] sm:$0xf0]  ;;  %v8345_v45 = vld [vmem:[#allocation8 + $0x2d4] sm:$0xf]  ;;  %v6177_v35 = vor.u32 %v8313_v12, %v6174_v15 }
  0x89   : > { %1348 = vmatpush.bf16.msra.mxu0 %v6129_v6  ;;  %v6302_v33 = vld [vmem:[#allocation8 + $0x2d8] sm:$0xf0]  ;;  %v8295_v46 = vld [vmem:[#allocation8 + $0x144] sm:$0xf]  ;;  %v6102_v50 = vld [vmem:[#allocation8 + $0x148] sm:$0xf0]  ;;  %v6241_v57 = vor.u32 %v8329_v42, %v6238_v43 }
  0x8a   : > { %v8311_v52 = vld [vmem:[#allocation8 + $0x1c4] sm:$0xf]  ;;  %v6166_v56 = vld [vmem:[#allocation8 + $0x1c8] sm:$0xf0]  ;;  %v6305_v17 = vor.u32 %v8345_v45, %v6302_v33  ;;  %v8293_v1 = vld [vmem:[#allocation8 + $0x134] sm:$0xf]  ;;  %v6105_v21 = vor.u32 %v8295_v46, %v6102_v50 }
  0x8b   : > { %1362 = vmatpush.bf16.msra.mxu1 %v6193_v55  ;;  %1376 = vmatpush.bf16.msra.mxu2 %v6257_v28  ;;  %v8327_v37 = vld [vmem:[#allocation8 + $0x244] sm:$0xf]  ;;  %v6230_v18 = vld [vmem:[#allocation8 + $0x248] sm:$0xf0]  ;;  %v6169_v22 = vor.u32 %v8311_v52, %v6166_v56  ;;  %v6094_v23 = vld [vmem:[#allocation8 + $0x138] sm:$0xf0] }
  0x8c   : > { %1390 = vmatpush.bf16.msra.mxu3 %v6321_v29  ;;  %v8343_v39 = vld [vmem:[#allocation8 + $0x2c4] sm:$0xf]  ;;  %v6294_v19 = vld [vmem:[#allocation8 + $0x2c8] sm:$0xf0]  ;;  %v8309_v44 = vld [vmem:[#allocation8 + $0x1b4] sm:$0xf]  ;;  %v6233_v47 = vor.u32 %v8327_v37, %v6230_v18  ;;  %v6097_v49 = vor.u32 %v8293_v1, %v6094_v23 }
  0x8d   : > { %1349 = vmatpush.bf16.msra.mxu0 %v6121_v10  ;;  %v6297_v2 = vor.u32 %v8343_v39, %v6294_v19  ;;  %v6158_v24 = vld [vmem:[#allocation8 + $0x1b8] sm:$0xf0]  ;;  %v8325_v36 = vld [vmem:[#allocation8 + $0x234] sm:$0xf]  ;;  %v8291_v54 = vld [vmem:[#allocation8 + $0x124] sm:$0xf] }
  0x8e   : > { %v6222_v25 = vld [vmem:[#allocation8 + $0x238] sm:$0xf0]  ;;  %v8341_v26 = vld [vmem:[#allocation8 + $0x2b4] sm:$0xf]  ;;  %v6161_v53 = vor.u32 %v8309_v44, %v6158_v24  ;;  %v6086_v20 = vld [vmem:[#allocation8 + $0x128] sm:$0xf0] }
  0x8f   : > { %1363 = vmatpush.bf16.msra.mxu1 %v6185_v14  ;;  %1377 = vmatpush.bf16.msra.mxu2 %v6249_v31  ;;  %v9623_v59 = vld.sshfl [vmem:[#allocation1 + $0x20] sm:$0xff pattern:$0x73625140]  ;;  %v9625_v63 = vld.sshfl [vmem:[#allocation1 + $0x28] sm:$0xff pattern:$0x73625140]  ;;  %v6225_v6 = vor.u32 %v8325_v36, %v6222_v25  ;;  %v6089_v9 = vor.u32 %v8291_v54, %v6086_v20 }
  0x90   : > { %1391 = vmatpush.bf16.msra.mxu3 %v6313_v40  ;;  %1523 = vst [vmem:[#allocation1 + $0x20] ss:$4 sm:$0xff] %v607_v8  ;;  %v6286_v48 = vld [vmem:[#allocation8 + $0x2b8] sm:$0xf0]  ;;  %v8307_v55 = vld [vmem:[#allocation8 + $0x1a4] sm:$0xf] }
  0x91   : > { %1300 = vmatmul.bf16.vlgmr.msrb.gmra.mxu0 %v9623_v59  ;;  %1314 = vmatmul.bf16.vlgmr.msrb.gmra.mxu1 %v9625_v63  ;;  %1525 = vst [vmem:[#allocation1 + $0x21] ss:$4 sm:$0xff] %v9616_v27  ;;  %v6289_v7 = vor.u32 %v8341_v26, %v6286_v48  ;;  %v6150_v60 = vld [vmem:[#allocation8 + $0x1a8] sm:$0xf0]  ;;  %v8323_v8 = vld [vmem:[#allocation8 + $0x224] sm:$0xf] }
  0x92   : > { %1350 = vmatpush.bf16.msra.mxu0 %v6113_v51  ;;  %1527 = vst [vmem:[#allocation1 + $0x22] ss:$4 sm:$0xff] %v9619_v3  ;;  %1328 = vmatmul.bf16.vlgmr.msrb.gmra.mxu2 %v9588_v58  ;;  %v6214_v61 = vld [vmem:[#allocation8 + $0x228] sm:$0xf0]  ;;  %v8339_v58 = vld [vmem:[#allocation8 + $0x2a4] sm:$0xf] }
  0x93   : > { %1364 = vmatpush.bf16.msra.mxu1 %v6177_v35  ;;  %1378 = vmatpush.bf16.msra.mxu2 %v6241_v57  ;;  %v6278_v62 = vld [vmem:[#allocation8 + $0x2a8] sm:$0xf0]  ;;  %v8289_v28 = vld [vmem:[#allocation8 + $0x114] sm:$0xf]  ;;  %v6078_v29 = vld [vmem:[#allocation8 + $0x118] sm:$0xf0]  ;;  %v6217_v4 = vor.u32 %v8323_v8, %v6214_v61 }
  0x94   : > { %1392 = vmatpush.bf16.msra.mxu3 %v6305_v17  ;;  %v6281_v13 = vor.u32 %v8339_v58, %v6278_v62  ;;  %v8305_v30 = vld [vmem:[#allocation8 + $0x194] sm:$0xf]  ;;  %v6142_v5 = vld [vmem:[#allocation8 + $0x198] sm:$0xf0]  ;;  %v8287_v41 = vld [vmem:[#allocation8 + $0x104] sm:$0xf]  ;;  %v6081_v11 = vor.u32 %v8289_v28, %v6078_v29 }
  0x95   : > { %1342 = vmatmul.bf16.vlgmr.msrb.gmra.mxu3 %v9590_v16  ;;  %v6153_v16 = vor.u32 %v8307_v55, %v6150_v60  ;;  %v8321_v10 = vld [vmem:[#allocation8 + $0x214] sm:$0xf]  ;;  %v6206_v14 = vld [vmem:[#allocation8 + $0x218] sm:$0xf0]  ;;  %v6145_v12 = vor.u32 %v8305_v30, %v6142_v5  ;;  %v6070_v15 = vld [vmem:[#allocation8 + $0x108] sm:$0xf0] }
  0x96   : > { %1351 = vmatpush.bf16.msra.mxu0 %v6105_v21  ;;  %v8337_v31 = vld [vmem:[#allocation8 + $0x294] sm:$0xf]  ;;  %v6270_v40 = vld [vmem:[#allocation8 + $0x298] sm:$0xf0]  ;;  %v8303_v42 = vld [vmem:[#allocation8 + $0x184] sm:$0xf]  ;;  %v6209_v45 = vor.u32 %v8321_v10, %v6206_v14  ;;  %v6073_v18 = vor.u32 %v8287_v41, %v6070_v15 }
  0x97   : > { %1365 = vmatpush.bf16.msra.mxu1 %v6169_v22  ;;  %1379 = vmatpush.bf16.msra.mxu2 %v6233_v47  ;;  %v6134_v43 = vld [vmem:[#allocation8 + $0x188] sm:$0xf0]  ;;  %v6273_v33 = vor.u32 %v8337_v31, %v6270_v40  ;;  %v8319_v46 = vld [vmem:[#allocation8 + $0x204] sm:$0xf]  ;;  %v6381_v52 = vld [vmem:[#allocation8 + $0x370] sm:$0xf] }
  0x98   : > { %1393 = vmatpush.bf16.msra.mxu3 %v6297_v2  ;;  %v6198_v50 = vld [vmem:[#allocation8 + $0x208] sm:$0xf0]  ;;  %v8335_v51 = vld [vmem:[#allocation8 + $0x284] sm:$0xf]  ;;  %v8366_v56 = vld [vmem:[#allocation8 + $0x374] sm:$0xf0]  ;;  %v6137_v39 = vor.u32 %v8303_v42, %v6134_v43 }
  0x99   : > { %v6262_v35 = vld [vmem:[#allocation8 + $0x288] sm:$0xf0]  ;;  %v6445_v37 = vld [vmem:[#allocation8 + $0x3f0] sm:$0xf]  ;;  %v8382_v57 = vld [vmem:[#allocation8 + $0x3f4] sm:$0xf0]  ;;  %v6201_v22 = vor.u32 %v8319_v46, %v6198_v50  ;;  %v6382_v44 = vor.u32 %v8366_v56, %v6381_v52 }
  0x9a   : > { %1352 = vmatpush.bf16.msra.mxu0 %v6097_v49  ;;  %v6509_v17 = vld [vmem:[#allocation8 + $0x470] sm:$0xf]  ;;  %v8398_v19 = vld [vmem:[#allocation8 + $0x474] sm:$0xf0]  ;;  %v6265_v23 = vor.u32 %v8335_v51, %v6262_v35  ;;  %v6446_v47 = vor.u32 %v8382_v57, %v6445_v37  ;;  %v6373_v2 = vld [vmem:[#allocation8 + $0x360] sm:$0xf] }
  0x9b   : > { %1366 = vmatpush.bf16.msra.mxu1 %v6161_v53  ;;  %1380 = vmatpush.bf16.msra.mxu2 %v6225_v6  ;;  %v6573_v1 = vld [vmem:[#allocation8 + $0x4f0] sm:$0xf]  ;;  %v8414_v21 = vld [vmem:[#allocation8 + $0x4f4] sm:$0xf0]  ;;  %v8364_v24 = vld [vmem:[#allocation8 + $0x364] sm:$0xf0]  ;;  %v6510_v36 = vor.u32 %v8398_v19, %v6509_v17 }
  0x9c   : > { %1394 = vmatpush.bf16.msra.mxu3 %v6289_v7  ;;  %v6574_v25 = vor.u32 %v8414_v21, %v6573_v1  ;;  %v6437_v26 = vld [vmem:[#allocation8 + $0x3e0] sm:$0xf]  ;;  %v8380_v48 = vld [vmem:[#allocation8 + $0x3e4] sm:$0xf0]  ;;  %v6374_v6 = vor.u32 %v8364_v24, %v6373_v2  ;;  %v6365_v55 = vld [vmem:[#allocation8 + $0x350] sm:$0xf] }
  0x9d   : > { %v6501_v49 = vld [vmem:[#allocation8 + $0x460] sm:$0xf]  ;;  %v8396_v53 = vld [vmem:[#allocation8 + $0x464] sm:$0xf0]  ;;  %v6438_v7 = vor.u32 %v8380_v48, %v6437_v26  ;;  %v8362_v60 = vld [vmem:[#allocation8 + $0x354] sm:$0xf0] }
  0x9e   : > { %1353 = vmatpush.bf16.msra.mxu0 %v6089_v9  ;;  %v6565_v54 = vld [vmem:[#allocation8 + $0x4e0] sm:$0xf]  ;;  %v8412_v20 = vld [vmem:[#allocation8 + $0x4e4] sm:$0xf0]  ;;  %v6502_v8 = vor.u32 %v8396_v53, %v6501_v49  ;;  %v6429_v58 = vld [vmem:[#allocation8 + $0x3d0] sm:$0xf] }
  0x9f   : > { %1367 = vmatpush.bf16.msra.mxu1 %v6153_v16  ;;  %1381 = vmatpush.bf16.msra.mxu2 %v6217_v4  ;;  %v6566_v61 = vor.u32 %v8412_v20, %v6565_v54  ;;  %v8378_v62 = vld [vmem:[#allocation8 + $0x3d4] sm:$0xf0]  ;;  %v6493_v9 = vld [vmem:[#allocation8 + $0x450] sm:$0xf]  ;;  %v6366_v4 = vor.u32 %v8362_v60, %v6365_v55  ;;  %v6357_v30 = vld [vmem:[#allocation8 + $0x340] sm:$0xf] }
  0xa0   : > { %1395 = vmatpush.bf16.msra.mxu3 %v6281_v13  ;;  %v8394_v16 = vld [vmem:[#allocation8 + $0x454] sm:$0xf0]  ;;  %v6557_v28 = vld [vmem:[#allocation8 + $0x4d0] sm:$0xf]  ;;  %v6430_v13 = vor.u32 %v8378_v62, %v6429_v58  ;;  %v8360_v5 = vld [vmem:[#allocation8 + $0x344] sm:$0xf0] }
  0xa1   : > { %v8410_v29 = vld [vmem:[#allocation8 + $0x4d4] sm:$0xf0]  ;;  %v6494_v10 = vor.u32 %v8394_v16, %v6493_v9  ;;  %v8376_v31 = vld [vmem:[#allocation8 + $0x3c4] sm:$0xf0]  ;;  %v6549_v41 = vld [vmem:[#allocation8 + $0x4c0] sm:$0xf] }
  0xa2   : > { %1354 = vmatpush.bf16.msra.mxu0 %v6081_v11  ;;  %v6558_v14 = vor.u32 %v8410_v29, %v6557_v28  ;;  %v8392_v40 = vld [vmem:[#allocation8 + $0x444] sm:$0xf0]  ;;  %v8358_v15 = vld [vmem:[#allocation8 + $0x334] sm:$0xf0]  ;;  %v6477_v46 = vld [vmem:[#allocation8 + $0x430] sm:$0xf] }
  0xa3   : > { %1368 = vmatpush.bf16.msra.mxu1 %v6145_v12  ;;  %1382 = vmatpush.bf16.msra.mxu2 %v6209_v45  ;;  %v8408_v11 = vld [vmem:[#allocation8 + $0x4c4] sm:$0xf0]  ;;  %v6349_v12 = vld [vmem:[#allocation8 + $0x330] sm:$0xf]  ;;  %v8390_v50 = vld [vmem:[#allocation8 + $0x434] sm:$0xf0] }
  0xa4   : > { %1396 = vmatpush.bf16.msra.mxu3 %v6273_v33  ;;  %v6550_v43 = vor.u32 %v8408_v11, %v6549_v41  ;;  %v6413_v45 = vld [vmem:[#allocation8 + $0x3b0] sm:$0xf]  ;;  %v8374_v33 = vld [vmem:[#allocation8 + $0x3b4] sm:$0xf0]  ;;  %v6341_v52 = vld [vmem:[#allocation8 + $0x320] sm:$0xf]  ;;  %v6350_v37 = vor.u32 %v8358_v15, %v6349_v12  ;;  %v6478_v19 = vor.u32 %v8390_v50, %v6477_v46 }
  0xa5   : > { %v6541_v51 = vld [vmem:[#allocation8 + $0x4b0] sm:$0xf]  ;;  %v8406_v35 = vld [vmem:[#allocation8 + $0x4b4] sm:$0xf0]  ;;  %v8356_v56 = vld [vmem:[#allocation8 + $0x324] sm:$0xf0]  ;;  %v6414_v57 = vor.u32 %v8374_v33, %v6413_v45 }
  0xa6   : > { %1355 = vmatpush.bf16.msra.mxu0 %v6073_v18  ;;  %v6405_v17 = vld [vmem:[#allocation8 + $0x3a0] sm:$0xf]  ;;  %v6542_v1 = vor.u32 %v8406_v35, %v6541_v51  ;;  %v8372_v21 = vld [vmem:[#allocation8 + $0x3a4] sm:$0xf0]  ;;  %v6342_v26 = vor.u32 %v8356_v56, %v6341_v52  ;;  %v8354_v48 = vld [vmem:[#allocation8 + $0x314] sm:$0xf0] }
  0xa7   : > { %1369 = vmatpush.bf16.msra.mxu1 %v6137_v39  ;;  %1383 = vmatpush.bf16.msra.mxu2 %v6201_v22  ;;  %v369_v18 = vld [vmem:[%s9335_s13 + $0x20] sm:$0x33]  ;;  %v8404_v24 = vld [vmem:[#allocation8 + $0x4a4] sm:$0xf0]  ;;  %v8370_v53 = vld [vmem:[#allocation8 + $0x394] sm:$0xf0] }
  0xa8   : > { %1397 = vmatpush.bf16.msra.mxu3 %v6265_v23  ;;  %v375_v39 = vld [vmem:[%s9335_s13 + $0x20] sm:$0x77]  ;;  %v8388_v23 = vld [vmem:[#allocation8 + $0x424] sm:$0xf0]  ;;  %v397_v54 = vunpack.c.l.b16 %v369_v18  ;;  %v8386_v55 = vld [vmem:[#allocation8 + $0x414] sm:$0xf0] }
  0xa9   : > { %1356 = vmatmul.bf16.vlgmr.msra.gmra.mxu0 %v9594_v0  ;;  %v6421_v0 = vld [vmem:[#allocation8 + $0x3c0] sm:$0xf]  ;;  %v6397_v49 = vld [vmem:[#allocation8 + $0x390] sm:$0xf]  ;;  %v8402_v16 = vld [vmem:[#allocation8 + $0x494] sm:$0xf0] }
  0xaa   : > { %2022 = vmatpush.bf16.msrb.mxu0 %v6382_v44  ;;  %1384 = vmatmul.bf16.vlgmr.msra.gmra.mxu2 %v9623_v59  ;;  %v6485_v59 = vld [vmem:[#allocation8 + $0x440] sm:$0xf]  ;;  %v398_v44 = vunpack.c.h.b16 %v369_v18  ;;  %v6525_v9 = vld [vmem:[#allocation8 + $0x490] sm:$0xf]  ;;  %v409_v41 = vpack.c.b16 %v397_v54, %v397_v54  ;;  %v8400_v50 = vld [vmem:[#allocation8 + $0x484] sm:$0xf0] }
  0xab   : > { %2036 = vmatpush.bf16.msrb.mxu1 %v6446_v47  ;;  %2050 = vmatpush.bf16.msrb.mxu2 %v6510_v36  ;;  %v6486_v42 = vor.u32 %v8392_v40, %v6485_v59  ;;  %v6469_v22 = vld [vmem:[#allocation8 + $0x420] sm:$0xf]  ;;  %v427_v47 = vunpack.c.l.b16 %v375_v39  ;;  %v6333_v36 = vld [vmem:[#allocation8 + $0x310] sm:$0xf]  ;;  %v8368_v40 = vld [vmem:[#allocation8 + $0x384] sm:$0xf0]  ;;  %v6526_v46 = vor.u32 %v8402_v16, %v6525_v9 }
  0xac   : > { %2064 = vmatpush.bf16.msrb.mxu3 %v6574_v25  ;;  %1370 = vmatmul.bf16.vlgmr.msra.gmra.mxu1 %v9596_v32  ;;  %v6358_v32 = vor.u32 %v8360_v5, %v6357_v30  ;;  %v6533_v2 = vld [vmem:[#allocation8 + $0x4a0] sm:$0xf]  ;;  %v428_v25 = vunpack.c.h.b16 %v375_v39  ;;  %v410_v60 = vpack.c.b16 %v398_v44, %v398_v44  ;;  %v6470_v58 = vor.u32 %v8388_v23, %v6469_v22  ;;  %v6637_v51 = vld [vmem:[#allocation8 + $0x570] sm:$0xf]  ;;  %v8430_v35 = vld [vmem:[#allocation8 + $0x574] sm:$0xf0] }
  0xad   : > { %1398 = vmatmul.bf16.vlgmr.msra.gmra.mxu3 %v9625_v63  ;;  %v6422_v63 = vor.u32 %v8376_v31, %v6421_v0  ;;  %v439_v20 = vpack.c.b16 %v427_v47, %v427_v47  ;;  %v6534_v62 = vor.u32 %v8404_v24, %v6533_v2  ;;  %v6334_v0 = vor.u32 %v8354_v48, %v6333_v36  ;;  %v6389_v59 = vld [vmem:[#allocation8 + $0x380] sm:$0xf]  ;;  %v6701_v56 = vld [vmem:[#allocation8 + $0x5f0] sm:$0xf]  ;;  %v6447_v22 = vld [vmem:[#allocation8 + $0x3f8] sm:$0xf0] }
  0xae   : > { %2023 = vmatpush.bf16.msrb.mxu0 %v6374_v6  ;;  %v6406_v6 = vor.u32 %v8372_v21, %v6405_v17  ;;  %v6398_v31 = vor.u32 %v8370_v53, %v6397_v49  ;;  %v6517_v12 = vld [vmem:[#allocation8 + $0x480] sm:$0xf]  ;;  %v6390_v39 = vor.u32 %v8368_v40, %v6389_v59  ;;  %v8428_v49 = vld [vmem:[#allocation8 + $0x564] sm:$0xf0]  ;;  %vm3001_vm3 = vcmask 1040384  }
  0xaf   : > { %2037 = vmatpush.bf16.msrb.mxu1 %v6438_v7  ;;  %2051 = vmatpush.bf16.msrb.mxu2 %v6502_v8  ;;  %v6461_v7 = vld [vmem:[#allocation8 + $0x410] sm:$0xf]  ;;  %v440_v8 = vpack.c.b16 %v428_v25, %v428_v25  ;;  %v500_v28 = vshrl.u32 %v439_v20, 16  ;;  %v502_v29 = vshll.u32 %v439_v20, 16  ;;  %v6518_v36 = vor.u32 %v8400_v50, %v6517_v12  ;;  %v6629_v48 = vld [vmem:[#allocation8 + $0x560] sm:$0xf] }
  0xb0   : > { %2065 = vmatpush.bf16.msrb.mxu3 %v6566_v61  ;;  %v381_v61 = vld [vmem:[%s9335_s13 + $0x20] sm:$0x66]  ;;  %v6462_v33 = vor.u32 %v8386_v55, %v6461_v7  ;;  %v6638_v25 = vor.u32 %v8430_v35, %v6637_v51  ;;  %v8444_v7 = vld [vmem:[#allocation8 + $0x5e4] sm:$0xf0]  ;;  %v6630_v9 = vor.u32 %v8428_v49, %v6629_v48  ;;  %vm3002_vm4 = vsmask.f32 256 }
  0xb1   : > { %v507_v30 = vshrl.u32 %v440_v8, 16  ;;  %v509_v5 = vshll.u32 %v440_v8, 16  ;;  %v504_v11 = vrot.slane %v502_v29, 1  ;;  %v6693_v53 = vld [vmem:[#allocation8 + $0x5e0] sm:$0xf]  ;;  %vm3004_vm5 = vcmask 1044484   ;;  %vm3003_vm7 = vmand %vm3001_vm3, %vm3002_vm4 }
  0xb2   : > { %2024 = vmatpush.bf16.msrb.mxu0 %v6366_v4  ;;  %v6325_v4 = vld [vmem:[#allocation8 + $0x300] sm:$0xf]  ;;  %v8363_v55 = vld [vmem:[#allocation8 + $0x364] sm:$0xf]  ;;  %v6694_v16 = vor.u32 %v8444_v7, %v6693_v53  ;;  %v8426_v29 = vld [vmem:[#allocation8 + $0x554] sm:$0xf0] }
  0xb3   : > { %2038 = vmatpush.bf16.msrb.mxu1 %v6430_v13  ;;  %2052 = vmatpush.bf16.msrb.mxu2 %v6494_v10  ;;  %v8352_v13 = vld [vmem:[#allocation8 + $0x304] sm:$0xf0]  ;;  %v541_v10 = vunpack.c.l.b16 %v381_v61  ;;  %v511_v15 = vrot.slane %v509_v5, 1  ;;  %v505_v52 = vor.u32 %v504_v11, %v500_v28  ;;  %v6621_v28 = vld [vmem:[#allocation8 + $0x550] sm:$0xf]  ;;  %vm3026_vm8 = vcmask 1042434  }
  0xb4   : > { %2066 = vmatpush.bf16.msrb.mxu3 %v6558_v14  ;;  %v542_v14 = vunpack.c.h.b16 %v381_v61  ;;  %v6326_v18 = vor.u32 %v8352_v13, %v6325_v4  ;;  %v8379_v61 = vld [vmem:[#allocation8 + $0x3e4] sm:$0xf]  ;;  %v6685_v4 = vld [vmem:[#allocation8 + $0x5d0] sm:$0xf]  ;;  %v8442_v5 = vld [vmem:[#allocation8 + $0x5d4] sm:$0xf0] }
  0xb5   : > { %v512_v17 = vor.u32 %v511_v15, %v507_v30  ;;  %v1405_v21 = vrot.slane %v505_v52, 4  ;;  %v6613_v59 = vld [vmem:[#allocation8 + $0x540] sm:$0xf]  ;;  %v8424_v40 = vld [vmem:[#allocation8 + $0x544] sm:$0xf0]  ;;  %vm3029_vm10 = vcmask 1046534  }
  0xb6   : > { %2025 = vmatpush.bf16.msrb.mxu0 %v6358_v32  ;;  %v6453_v32 = vld [vmem:[#allocation8 + $0x400] sm:$0xf]  ;;  %v554_v45 = vpack.c.b16 %v542_v14, %v542_v14  ;;  %v6367_v14 = vld [vmem:[#allocation8 + $0x358] sm:$0xf0]  ;;  %v8440_v11 = vld [vmem:[#allocation8 + $0x5c4] sm:$0xf0] }
  0xb7   : > { %2039 = vmatpush.bf16.msrb.mxu1 %v6422_v63  ;;  %2053 = vmatpush.bf16.msrb.mxu2 %v6486_v42  ;;  %v8384_v63 = vld [vmem:[#allocation8 + $0x404] sm:$0xf0]  ;;  %v1404_v42 = vrot.slane %v410_v60, 6  ;;  %v1406_v23 = vrot.slane %v512_v17, 2  ;;  %v6375_v60 = vld [vmem:[#allocation8 + $0x368] sm:$0xf0]  ;;  %v6614_v17 = vor.u32 %v8424_v40, %v6613_v59 }
  0xb8   : > { %2067 = vmatpush.bf16.msrb.mxu3 %v6550_v43  ;;  %v553_v43 = vpack.c.b16 %v541_v10, %v541_v10  ;;  %v6322_v2 = vrot.slane %v554_v45, 7  ;;  %v6454_v24 = vor.u32 %v8384_v63, %v6453_v32  ;;  %v6378_v13 = vor.u32 %v8363_v55, %v6375_v60  ;;  %v8361_v10 = vld [vmem:[#allocation8 + $0x354] sm:$0xf]  ;;  %v8359_v12 = vld [vmem:[#allocation8 + $0x344] sm:$0xf] }
  0xb9   : > { %v1410_v44 = vsel %vm585_vm0, %v409_v41, %v1404_v42  ;;  %v1413_v54 = vsel %vm589_vm1, %v1405_v21, %v1406_v23  ;;  %v6677_v41 = vld [vmem:[#allocation8 + $0x5c0] sm:$0xf]  ;;  %v6622_v32 = vor.u32 %v8426_v29, %v6621_v28  ;;  %v6686_v63 = vor.u32 %v8442_v5, %v6685_v4  ;;  %v6359_v15 = vld [vmem:[#allocation8 + $0x348] sm:$0xf0]  ;;  %v8375_v42 = vld [vmem:[#allocation8 + $0x3c4] sm:$0xf] }
  0xba   : > { %2026 = vmatpush.bf16.msrb.mxu0 %v6350_v37  ;;  %v8446_v37 = vld [vmem:[#allocation8 + $0x5f4] sm:$0xf0]  ;;  %v565_v47 = vrot.slane %v553_v43, 1  ;;  %v9643_v8 = vsel %vm593_vm2, %v1410_v44, %v1413_v54  ;;  %v6423_v43 = vld [vmem:[#allocation8 + $0x3c8] sm:$0xf0]  ;;  %v6370_v45 = vor.u32 %v8361_v10, %v6367_v14  ;;  %v6362_v21 = vor.u32 %v8359_v12, %v6359_v15 }
  0xbb   : > { %2040 = vmatpush.bf16.msrb.mxu1 %v6414_v57  ;;  %2054 = vmatpush.bf16.msrb.mxu2 %v6478_v19  ;;  %v8365_v57 = vld [vmem:[#allocation8 + $0x374] sm:$0xf]  ;;  %v6383_v19 = vld [vmem:[#allocation8 + $0x378] sm:$0xf0]  ;;  %1521 = vst [vmem:[#allocation1 + $0x3] ss:$4 sm:$0xff] %v9643_v8 }
  0xbc   : > { %2068 = vmatpush.bf16.msrb.mxu3 %v6542_v1  ;;  %v8381_v1 = vld [vmem:[#allocation8 + $0x3f4] sm:$0xf]  ;;  %v6386_v20 = vor.u32 %v8365_v57, %v6383_v19  ;;  %v6605_v52 = vld [vmem:[#allocation8 + $0x530] sm:$0xf]  ;;  %v8438_v57 = vld [vmem:[#allocation8 + $0x5b4] sm:$0xf0] }
  0xbd   : > { %v6351_v19 = vld [vmem:[#allocation8 + $0x338] sm:$0xf0]  ;;  %v8373_v44 = vld [vmem:[#allocation8 + $0x3b4] sm:$0xf]  ;;  %v8436_v48 = vld [vmem:[#allocation8 + $0x5a4] sm:$0xf0] }
  0xbe   : > { %2027 = vmatpush.bf16.msrb.mxu0 %v6342_v26  ;;  %v6702_v26 = vor.u32 %v8446_v37, %v6701_v56  ;;  %v8422_v56 = vld [vmem:[#allocation8 + $0x534] sm:$0xf0]  ;;  %v6669_v37 = vld [vmem:[#allocation8 + $0x5b0] sm:$0xf]  ;;  %v8355_v49 = vld [vmem:[#allocation8 + $0x324] sm:$0xf] }
  0xbf   : > { %2041 = vmatpush.bf16.msrb.mxu1 %v6406_v6  ;;  %2055 = vmatpush.bf16.msrb.mxu2 %v6470_v58  ;;  %v6450_v6 = vor.u32 %v8381_v1, %v6447_v22  ;;  %v6439_v58 = vld [vmem:[#allocation8 + $0x3e8] sm:$0xf0]  ;;  %v6426_v22 = vor.u32 %v8375_v42, %v6423_v43  ;;  %v8371_v54 = vld [vmem:[#allocation8 + $0x3a4] sm:$0xf]  ;;  %v8418_v7 = vld [vmem:[#allocation8 + $0x514] sm:$0xf0] }
  0xc0   : > { %2069 = vmatpush.bf16.msrb.mxu3 %v6534_v62  ;;  %v9647_v62 = vsel %vm585_vm0, %v565_v47, %v6322_v2  ;;  %v6442_v30 = vor.u32 %v8379_v61, %v6439_v58  ;;  %v6606_v47 = vor.u32 %v8422_v56, %v6605_v52  ;;  %v6597_v2 = vld [vmem:[#allocation8 + $0x520] sm:$0xf]  ;;  %v6343_v53 = vld [vmem:[#allocation8 + $0x328] sm:$0xf0]  ;;  %v8434_v61 = vld [vmem:[#allocation8 + $0x594] sm:$0xf0] }
  0xc1   : > { %1529 = vst [vmem:[#allocation1 + $0x23] ss:$4 sm:$0xff] %v9647_v62  ;;  %v6346_v55 = vor.u32 %v8355_v49, %v6343_v53  ;;  %v8353_v58 = vld [vmem:[#allocation8 + $0x314] sm:$0xf]  ;;  %v6581_v28 = vld [vmem:[#allocation8 + $0x500] sm:$0xf] }
  0xc2   : > { %2028 = vmatpush.bf16.msrb.mxu0 %v6334_v0  ;;  %v8377_v0 = vld [vmem:[#allocation8 + $0x3d4] sm:$0xf]  ;;  %v9656_v51 = vld.sshfl [vmem:[#allocation1 + $0x10] sm:$0xff pattern:$0x73625140] }
  0xc3   : > { %2042 = vmatpush.bf16.msrb.mxu1 %v6398_v31  ;;  %2056 = vmatpush.bf16.msrb.mxu2 %v6462_v33  ;;  %v6431_v31 = vld [vmem:[#allocation8 + $0x3d8] sm:$0xf0]  ;;  %v9652_v50 = vld.sshfl [vmem:[#allocation1 + $0x8] sm:$0xff pattern:$0x73625140] }
  0xc4   : > { %2070 = vmatpush.bf16.msrb.mxu3 %v6526_v46  ;;  %v6434_v33 = vor.u32 %v8377_v0, %v6431_v31  ;;  %v9650_v46 = vld.sshfl [vmem:[#allocation1] sm:$0xff pattern:$0x73625140]  ;;  %v9658_v35 = vld.sshfl [vmem:[#allocation1 + $0x18] sm:$0xff pattern:$0x73625140] }
  0xc5   : > { %2305 = vst [vmem:[#allocation1] ss:$4 sm:$0xff] %v9531_v34  ;;  %v6415_v34 = vld [vmem:[#allocation8 + $0x3b8] sm:$0xf0]  ;;  %v8432_v5 = vld [vmem:[#allocation8 + $0x584] sm:$0xf0] }
  0xc6   : > { %2029 = vmatpush.bf16.msrb.mxu0 %v6326_v18  ;;  %v6678_v18 = vor.u32 %v8440_v11, %v6677_v41  ;;  %2307 = vst [vmem:[#allocation1 + $0x1] ss:$4 sm:$0xff] %v9542_v38  ;;  %v6670_v38 = vor.u32 %v8438_v57, %v6669_v37  ;;  %v8351_v0 = vld [vmem:[#allocation8 + $0x304] sm:$0xf]  ;;  %v6327_v31 = vld [vmem:[#allocation8 + $0x308] sm:$0xf0] }
  0xc7   : > { %2043 = vmatpush.bf16.msrb.mxu1 %v6390_v39  ;;  %2057 = vmatpush.bf16.msrb.mxu2 %v6454_v24  ;;  %v8357_v39 = vld [vmem:[#allocation8 + $0x334] sm:$0xf]  ;;  %2309 = vst [vmem:[#allocation1 + $0x2] ss:$4 sm:$0xff] %v9643_v8  ;;  %v8420_v24 = vld [vmem:[#allocation8 + $0x524] sm:$0xf0]  ;;  %v6330_v52 = vor.u32 %v8351_v0, %v6327_v31 }
  0xc8   : > { %2071 = vmatpush.bf16.msrb.mxu3 %v6518_v36  ;;  %v9664_v1 = vld.sshfl [vmem:[#allocation1 + $0x20] sm:$0xff pattern:$0x73625140]  ;;  %v9667_v23 = vld.sshfl [vmem:[#allocation1 + $0x28] sm:$0xff pattern:$0x73625140]  ;;  %v6354_v36 = vor.u32 %v8357_v39, %v6351_v19 }
  0xc9   : > { %2030 = vmatmul.bf16.vlgmr.msrb.gmra.mxu0 %v9650_v46  ;;  %2313 = vst [vmem:[#allocation1 + $0x20] ss:$4 sm:$0xff] %v9616_v27  ;;  %v6407_v27 = vld [vmem:[#allocation8 + $0x3a8] sm:$0xf0]  ;;  %v6653_v8 = vld [vmem:[#allocation8 + $0x590] sm:$0xf] }
  0xca   : > { %2078 = vmatpush.bf16.msra.mxu0 %v6638_v25  ;;  %2044 = vmatmul.bf16.vlgmr.msrb.gmra.mxu1 %v9652_v50  ;;  %2315 = vst [vmem:[#allocation1 + $0x21] ss:$4 sm:$0xff] %v9619_v3  ;;  %v6418_v25 = vor.u32 %v8373_v44, %v6415_v34  ;;  %v6598_v3 = vor.u32 %v8420_v24, %v6597_v2  ;;  %v8367_v59 = vld [vmem:[#allocation8 + $0x384] sm:$0xf]  ;;  %v6391_v40 = vld [vmem:[#allocation8 + $0x388] sm:$0xf0] }
  0xcb   : > { %2092 = vmatpush.bf16.msra.mxu1 %v6702_v26  ;;  %2106 = vmatpush.bf16.msra.mxu2 %v6386_v20  ;;  %2317 = vst [vmem:[#allocation1 + $0x22] ss:$4 sm:$0xff] %v9647_v62  ;;  %v6661_v26 = vld [vmem:[#allocation8 + $0x5a0] sm:$0xf]  ;;  %v6410_v60 = vor.u32 %v8371_v54, %v6407_v27  ;;  %v6335_v62 = vld [vmem:[#allocation8 + $0x318] sm:$0xf0]  ;;  %v6654_v4 = vor.u32 %v8434_v61, %v6653_v8 }
  0xcc   : > { %2120 = vmatpush.bf16.msra.mxu3 %v6450_v6  ;;  %2058 = vmatmul.bf16.vlgmr.msrb.gmra.mxu2 %v9656_v51  ;;  %v6662_v20 = vor.u32 %v8436_v48, %v6661_v26  ;;  %v6589_v6 = vld [vmem:[#allocation8 + $0x510] sm:$0xf]  ;;  %v6338_v10 = vor.u32 %v8353_v58, %v6335_v62  ;;  %v8397_v41 = vld [vmem:[#allocation8 + $0x474] sm:$0xf]  ;;  %v6511_v11 = vld [vmem:[#allocation8 + $0x478] sm:$0xf0]  ;;  %v6394_v56 = vor.u32 %v8367_v59, %v6391_v40 }
  0xcd   : > { %2072 = vmatmul.bf16.vlgmr.msrb.gmra.mxu3 %v9658_v35  ;;  %v6590_v29 = vor.u32 %v8418_v7, %v6589_v6  ;;  %v8429_v12 = vld [vmem:[#allocation8 + $0x574] sm:$0xf]  ;;  %v6639_v43 = vld [vmem:[#allocation8 + $0x578] sm:$0xf0]  ;;  %v6514_v37 = vor.u32 %v8397_v41, %v6511_v11  ;;  %v8427_v44 = vld [vmem:[#allocation8 + $0x564] sm:$0xf] }
  0xce   : > { %2079 = vmatpush.bf16.msra.mxu0 %v6630_v9  ;;  %v8369_v9 = vld [vmem:[#allocation8 + $0x394] sm:$0xf]  ;;  %v6642_v39 = vor.u32 %v8429_v12, %v6639_v43  ;;  %v6631_v34 = vld [vmem:[#allocation8 + $0x568] sm:$0xf0]  ;;  %v6559_v53 = vld [vmem:[#allocation8 + $0x4d8] sm:$0xf0] }
  0xcf   : > { %2093 = vmatpush.bf16.msra.mxu1 %v6694_v16  ;;  %2107 = vmatpush.bf16.msra.mxu2 %v6378_v13  ;;  %v6399_v16 = vld [vmem:[#allocation8 + $0x398] sm:$0xf0]  ;;  %v8416_v13 = vld [vmem:[#allocation8 + $0x504] sm:$0xf0]  ;;  %v6634_v26 = vor.u32 %v8427_v44, %v6631_v34  ;;  %v8409_v49 = vld [vmem:[#allocation8 + $0x4d4] sm:$0xf] }
  0xd0   : > { %2121 = vmatpush.bf16.msra.mxu3 %v6442_v30  ;;  %v6645_v30 = vld [vmem:[#allocation8 + $0x580] sm:$0xf]  ;;  %v6402_v14 = vor.u32 %v8369_v9, %v6399_v16  ;;  %v6582_v15 = vor.u32 %v8416_v13, %v6581_v28  ;;  %v8425_v54 = vld [vmem:[#allocation8 + $0x554] sm:$0xf]  ;;  %v6623_v27 = vld [vmem:[#allocation8 + $0x558] sm:$0xf0]  ;;  %v6562_v7 = vor.u32 %v8409_v49, %v6559_v53 }
  0xd1   : > { %v6646_v42 = vor.u32 %v8432_v5, %v6645_v30  ;;  %v6626_v8 = vor.u32 %v8425_v54, %v6623_v27  ;;  %v8407_v58 = vld [vmem:[#allocation8 + $0x4c4] sm:$0xf]  ;;  %v6551_v62 = vld [vmem:[#allocation8 + $0x4c8] sm:$0xf0]  ;;  %v6479_v13 = vld [vmem:[#allocation8 + $0x438] sm:$0xf0] }
  0xd2   : > { %2080 = vmatpush.bf16.msra.mxu0 %v6622_v32  ;;  %v8413_v32 = vld [vmem:[#allocation8 + $0x4f4] sm:$0xf]  ;;  %v8423_v9 = vld [vmem:[#allocation8 + $0x544] sm:$0xf]  ;;  %v6615_v16 = vld [vmem:[#allocation8 + $0x548] sm:$0xf0] }
  0xd3   : > { %2094 = vmatpush.bf16.msra.mxu1 %v6686_v63  ;;  %2108 = vmatpush.bf16.msra.mxu2 %v6370_v45  ;;  %v6575_v63 = vld [vmem:[#allocation8 + $0x4f8] sm:$0xf0]  ;;  %v8445_v45 = vld [vmem:[#allocation8 + $0x5f4] sm:$0xf]  ;;  %v8439_v28 = vld [vmem:[#allocation8 + $0x5c4] sm:$0xf]  ;;  %v6618_v30 = vor.u32 %v8423_v9, %v6615_v16 }
  0xd4   : > { %2122 = vmatpush.bf16.msra.mxu3 %v6434_v33  ;;  %v6703_v33 = vld [vmem:[#allocation8 + $0x5f8] sm:$0xf0]  ;;  %v6578_v57 = vor.u32 %v8413_v32, %v6575_v63  ;;  %v8421_v0 = vld [vmem:[#allocation8 + $0x534] sm:$0xf]  ;;  %v8387_v32 = vld [vmem:[#allocation8 + $0x424] sm:$0xf] }
  0xd5   : > { %v6706_v19 = vor.u32 %v8445_v45, %v6703_v33  ;;  %v6607_v31 = vld [vmem:[#allocation8 + $0x538] sm:$0xf0]  ;;  %v8437_v59 = vld [vmem:[#allocation8 + $0x5b4] sm:$0xf]  ;;  %v6471_v63 = vld [vmem:[#allocation8 + $0x428] sm:$0xf0] }
  0xd6   : > { %2081 = vmatpush.bf16.msra.mxu0 %v6614_v17  ;;  %v8395_v17 = vld [vmem:[#allocation8 + $0x464] sm:$0xf]  ;;  %v6671_v40 = vld [vmem:[#allocation8 + $0x5b8] sm:$0xf0]  ;;  %v6610_v12 = vor.u32 %v8421_v0, %v6607_v31  ;;  %v6535_v43 = vld [vmem:[#allocation8 + $0x4a8] sm:$0xf0] }
  0xd7   : > { %2095 = vmatpush.bf16.msra.mxu1 %v6678_v18  ;;  %2109 = vmatpush.bf16.msra.mxu2 %v6362_v21  ;;  %v6503_v18 = vld [vmem:[#allocation8 + $0x468] sm:$0xf0]  ;;  %v8411_v21 = vld [vmem:[#allocation8 + $0x4e4] sm:$0xf]  ;;  %v6527_v44 = vld [vmem:[#allocation8 + $0x498] sm:$0xf0] }
  0xd8   : > { %2123 = vmatpush.bf16.msra.mxu3 %v6426_v22  ;;  %v6567_v22 = vld [vmem:[#allocation8 + $0x4e8] sm:$0xf0]  ;;  %v6506_v2 = vor.u32 %v8395_v17, %v6503_v18  ;;  %v8419_v45 = vld [vmem:[#allocation8 + $0x524] sm:$0xf]  ;;  %v9676_v17 = vld [vmem:[#allocation10] sm:$0x3] }
  0xd9   : > { %v6570_v24 = vor.u32 %v8411_v21, %v6567_v22  ;;  %v6599_v33 = vld [vmem:[#allocation8 + $0x528] sm:$0xf0]  ;;  %v8385_v18 = vld [vmem:[#allocation8 + $0x414] sm:$0xf]  ;;  %v8399_v49 = vld [vmem:[#allocation8 + $0x484] sm:$0xf] }
  0xda   : > { %2082 = vmatpush.bf16.msra.mxu0 %v6606_v47  ;;  %v8443_v47 = vld [vmem:[#allocation8 + $0x5e4] sm:$0xf]  ;;  %v8401_v22 = vld [vmem:[#allocation8 + $0x494] sm:$0xf]  ;;  %v6519_v53 = vld [vmem:[#allocation8 + $0x488] sm:$0xf0] }
  0xdb   : > { %2096 = vmatpush.bf16.msra.mxu1 %v6670_v38  ;;  %2110 = vmatpush.bf16.msra.mxu2 %v6354_v36  ;;  %v6695_v38 = vld [vmem:[#allocation8 + $0x5e8] sm:$0xf0]  ;;  %v8393_v36 = vld [vmem:[#allocation8 + $0x454] sm:$0xf]  ;;  %v8415_v54 = vld [vmem:[#allocation8 + $0x504] sm:$0xf]  ;;  %v6522_v16 = vor.u32 %v8399_v49, %v6519_v53 }
  0xdc   : > { %2124 = vmatpush.bf16.msra.mxu3 %v6418_v25  ;;  %v6495_v25 = vld [vmem:[#allocation8 + $0x458] sm:$0xf0]  ;;  %v6698_v48 = vor.u32 %v8443_v47, %v6695_v38  ;;  %v8417_v34 = vld [vmem:[#allocation8 + $0x514] sm:$0xf]  ;;  %v6758_v0 = vld [vmem:[#allocation8 + $0x660] sm:$0xf] }
  0xdd   : > { %v6498_v6 = vor.u32 %v8393_v36, %v6495_v25  ;;  %v6591_v47 = vld [vmem:[#allocation8 + $0x518] sm:$0xf0]  ;;  %v8433_v38 = vld [vmem:[#allocation8 + $0x594] sm:$0xf]  ;;  %v8383_v36 = vld [vmem:[#allocation8 + $0x404] sm:$0xf] }
  0xde   : > { %2083 = vmatpush.bf16.msra.mxu0 %v6598_v3  ;;  %v8441_v3 = vld [vmem:[#allocation8 + $0x5d4] sm:$0xf]  ;;  %v6455_v25 = vld [vmem:[#allocation8 + $0x408] sm:$0xf0]  ;;  %v6594_v27 = vor.u32 %v8417_v34, %v6591_v47  ;;  %v8460_v31 = vld [vmem:[#allocation8 + $0x664] sm:$0xf0] }
  0xdf   : > { %2097 = vmatpush.bf16.msra.mxu1 %v6662_v20  ;;  %2111 = vmatpush.bf16.msra.mxu2 %v6346_v55  ;;  %v6687_v20 = vld [vmem:[#allocation8 + $0x5d8] sm:$0xf0]  ;;  %v8391_v55 = vld [vmem:[#allocation8 + $0x444] sm:$0xf]  ;;  %v6458_v9 = vor.u32 %v8383_v36, %v6455_v25  ;;  %v8490_v34 = vld [vmem:[#allocation8 + $0x754] sm:$0xf0] }
  0xe0   : > { %2125 = vmatpush.bf16.msra.mxu3 %v6410_v60  ;;  %v6487_v60 = vld [vmem:[#allocation8 + $0x448] sm:$0xf0]  ;;  %v6690_v61 = vor.u32 %v8441_v3, %v6687_v20  ;;  %v6942_v47 = vld [vmem:[#allocation8 + $0x7d0] sm:$0xf]  ;;  %v6742_v25 = vld [vmem:[#allocation8 + $0x640] sm:$0xf] }
  0xe1   : > { %v6583_v20 = vld [vmem:[#allocation8 + $0x508] sm:$0xf0]  ;;  %vm3005_vm6 = vsmask.f32 4352  ;;  %vm3027_vm9 = vsmask.f32 7946 }
  0xe2   : > { %2084 = vmatpush.bf16.msra.mxu0 %v6590_v29  ;;  %v6679_v29 = vld [vmem:[#allocation8 + $0x5c8] sm:$0xf0]  ;;  %vm3006_vm11 = vmand %vm3004_vm5, %vm3005_vm6  ;;  %vm3030_vm12 = vsmask.f32 7962 }
  0xe3   : > { %2098 = vmatpush.bf16.msra.mxu1 %v6654_v4  ;;  %2112 = vmatpush.bf16.msra.mxu2 %v6338_v10  ;;  %v8389_v4 = vld [vmem:[#allocation8 + $0x434] sm:$0xf]  ;;  %v6682_v5 = vor.u32 %v8439_v28, %v6679_v29  ;;  %v8494_v28 = vld [vmem:[#allocation8 + $0x774] sm:$0xf0]  ;;  %v6958_v29 = vld [vmem:[#allocation8 + $0x7f0] sm:$0xf] }
  0xe4   : > { %2126 = vmatpush.bf16.msra.mxu3 %v6402_v14  ;;  %v8405_v10 = vld [vmem:[#allocation8 + $0x4b4] sm:$0xf]  ;;  %v6543_v14 = vld [vmem:[#allocation8 + $0x4b8] sm:$0xf0]  ;;  %v6482_v41 = vor.u32 %v8389_v4, %v6479_v13  ;;  %vm9812_vm13 = vmor %vm3006_vm11, %vm3003_vm7  ;;  %vm3123_vm7 = vcmask 1042432   ;;  %vm3126_vm11 = vcmask 1046532  }
  0xe5   : > { %v6546_v11 = vor.u32 %v8405_v10, %v6543_v14  ;;  %vm3028_vm14 = vmand %vm3026_vm8, %vm3027_vm9  ;;  %vm3124_vm8 = vsmask.f32 2306 }
  0xe6   : > { %2085 = vmatpush.bf16.msra.mxu0 %v6582_v15  ;;  %v6674_v15 = vor.u32 %v8437_v59, %v6671_v40  ;;  %vm3031_vm15 = vmand %vm3029_vm10, %vm3030_vm12  ;;  %vm3127_vm10 = vsmask.f32 6418 }
  0xe7   : > { %2099 = vmatpush.bf16.msra.mxu1 %v6646_v42  ;;  %2113 = vmatpush.bf16.msra.mxu2 %v6330_v52  ;;  %v8403_v42 = vld [vmem:[#allocation8 + $0x4a4] sm:$0xf]  ;;  %vm9830_vm3 = vmor %vm3031_vm15, %vm3028_vm14 }
  0xe8   : > { %2127 = vmatpush.bf16.msra.mxu3 %v6394_v56  ;;  %v8435_v52 = vld [vmem:[#allocation8 + $0x5a4] sm:$0xf]  ;;  %v6663_v56 = vld [vmem:[#allocation8 + $0x5a8] sm:$0xf0]  ;;  %vm9901_vm12 = vmand %vm3123_vm7, %vm3124_vm8 }
  0xe9   : > { %2086 = vmatmul.bf16.vlgmr.msra.gmra.mxu0 %v9664_v1  ;;  %v6666_v21 = vor.u32 %v8435_v52, %v6663_v56  ;;  %v6759_v56 = vor.u32 %v8460_v31, %v6758_v0  ;;  %v8470_v0 = vld [vmem:[#allocation8 + $0x6b4] sm:$0xf0]  ;;  %v6862_v31 = vld [vmem:[#allocation8 + $0x730] sm:$0xf] }
  0xea   : > { %2134 = vmatpush.bf16.msrb.mxu0 %v6514_v37  ;;  %2100 = vmatmul.bf16.vlgmr.msra.gmra.mxu1 %v9667_v23  ;;  %v6474_v37 = vor.u32 %v8387_v32, %v6471_v63  ;;  %v8476_v32 = vld [vmem:[#allocation8 + $0x6e4] sm:$0xf0]  ;;  %v6886_v63 = vld [vmem:[#allocation8 + $0x760] sm:$0xf] }
  0xeb   : > { %2148 = vmatpush.bf16.msrb.mxu1 %v6578_v57  ;;  %2162 = vmatpush.bf16.msrb.mxu2 %v6642_v39  ;;  %v6538_v57 = vor.u32 %v8403_v42, %v6535_v43  ;;  %v6463_v39 = vld [vmem:[#allocation8 + $0x418] sm:$0xf0]  ;;  %v8508_v42 = vld [vmem:[#allocation8 + $0x7e4] sm:$0xf0] }
  0xec   : > { %2176 = vmatpush.bf16.msrb.mxu3 %v6706_v19  ;;  %2114 = vmatmul.bf16.vlgmr.msra.gmra.mxu2 %v9650_v46  ;;  %v6490_v46 = vor.u32 %v8391_v55, %v6487_v60  ;;  %v6602_v19 = vor.u32 %v8419_v45, %v6599_v33  ;;  %v6766_v55 = vld [vmem:[#allocation8 + $0x670] sm:$0xf]  ;;  %v8462_v60 = vld [vmem:[#allocation8 + $0x674] sm:$0xf0] }
  0xed   : > { %2128 = vmatmul.bf16.vlgmr.msra.gmra.mxu3 %v9652_v50  ;;  %v6554_v50 = vor.u32 %v8407_v58, %v6551_v62  ;;  %v8478_v58 = vld [vmem:[#allocation8 + $0x6f4] sm:$0xf0]  ;;  %v6894_v62 = vld [vmem:[#allocation8 + $0x770] sm:$0xf]  ;;  %v6767_v10 = vor.u32 %v8462_v60, %v6766_v55  ;;  %v6870_v55 = vld [vmem:[#allocation8 + $0x740] sm:$0xf] }
  0xee   : > { %2135 = vmatpush.bf16.msrb.mxu0 %v6506_v2  ;;  %v6655_v2 = vld [vmem:[#allocation8 + $0x598] sm:$0xf0]  ;;  %v6895_v40 = vor.u32 %v8494_v28, %v6894_v62  ;;  %v8488_v60 = vld [vmem:[#allocation8 + $0x744] sm:$0xf0]  ;;  %v6734_v28 = vld [vmem:[#allocation8 + $0x630] sm:$0xf] }
  0xef   : > { %2149 = vmatpush.bf16.msrb.mxu1 %v6570_v24  ;;  %2163 = vmatpush.bf16.msrb.mxu2 %v6634_v26  ;;  %v725_v24 = vperm.slane %v9676_v17, 0  ;;  %v6466_v26 = vor.u32 %v8385_v18, %v6463_v39  ;;  %v6658_v3 = vor.u32 %v8433_v38, %v6655_v2  ;;  %v9686_v45 = vld [vmem:[%s9335_s13 + $0x28] sm:$0x33] }
  0xf0   : > { %2177 = vmatpush.bf16.msrb.mxu3 %v6698_v48  ;;  %v6530_v48 = vor.u32 %v8401_v22, %v6527_v44  ;;  %v8458_v18 = vld [vmem:[#allocation8 + $0x654] sm:$0xf0]  ;;  %v6878_v44 = vld [vmem:[#allocation8 + $0x750] sm:$0xf]  ;;  %v400_v2 = vunpack.c.h.b16 %v9686_v45  ;;  %v399_v62 = vunpack.c.l.b16 %v9686_v45  ;;  %v8452_v45 = vld [vmem:[#allocation8 + $0x624] sm:$0xf0] }
  0xf1   : > { %v8474_v22 = vld [vmem:[#allocation8 + $0x6d4] sm:$0xf0] }
  0xf2   : > { %2136 = vmatpush.bf16.msrb.mxu0 %v6498_v6  ;;  %v8431_v6 = vld [vmem:[#allocation8 + $0x584] sm:$0xf]  ;;  %v8506_v38 = vld [vmem:[#allocation8 + $0x7d4] sm:$0xf0] }
  0xf3   : > { %2150 = vmatpush.bf16.msrb.mxu1 %v6562_v7  ;;  %2164 = vmatpush.bf16.msrb.mxu2 %v6626_v8  ;;  %v6647_v7 = vld [vmem:[#allocation8 + $0x588] sm:$0xf0] }
  0xf4   : > { %2178 = vmatpush.bf16.msrb.mxu3 %v6690_v61  ;;  %v9680_v8 = vld [vmem:[%s9335_s13 + $0x28] sm:$0x77]  ;;  %v6830_v61 = vld [vmem:[#allocation8 + $0x6f0] sm:$0xf]  ;;  %v6650_v4 = vor.u32 %v8431_v6, %v6647_v7 }
  0xf5   : > { %v429_v13 = vunpack.c.l.b16 %v9680_v8  ;;  %v6831_v14 = vor.u32 %v8478_v58, %v6830_v61  ;;  %v430_v33 = vunpack.c.h.b16 %v9680_v8  ;;  %v8472_v7 = vld [vmem:[#allocation8 + $0x6c4] sm:$0xf0]  ;;  %v6934_v61 = vld [vmem:[#allocation8 + $0x7c0] sm:$0xf] }
  0xf6   : > { %2137 = vmatpush.bf16.msrb.mxu0 %v6490_v46  ;;  %v8510_v46 = vld [vmem:[#allocation8 + $0x7f4] sm:$0xf0]  ;;  %v8504_v58 = vld [vmem:[#allocation8 + $0x7c4] sm:$0xf0] }
  0xf7   : > { %2151 = vmatpush.bf16.msrb.mxu1 %v6554_v50  ;;  %2165 = vmatpush.bf16.msrb.mxu2 %v6618_v30  ;;  %v6586_v50 = vor.u32 %v8415_v54, %v6583_v20  ;;  %v441_v52 = vpack.c.b16 %v429_v13, %v429_v13  ;;  %v6798_v13 = vld [vmem:[#allocation8 + $0x6b0] sm:$0xf] }
  0xf8   : > { %2179 = vmatpush.bf16.msrb.mxu3 %v6682_v5 }
  0xf9   : > { %v514_v20 = vshrl.u32 %v441_v52, 16 }
  0xfa   : > { %2138 = vmatpush.bf16.msrb.mxu0 %v6482_v41  ;;  %v6959_v41 = vor.u32 %v8510_v46, %v6958_v29 }
  0xfb   : > { %2152 = vmatpush.bf16.msrb.mxu1 %v6546_v11  ;;  %2166 = vmatpush.bf16.msrb.mxu2 %v6610_v12  ;;  %v6822_v11 = vld [vmem:[#allocation8 + $0x6e0] sm:$0xf]  ;;  %v8492_v12 = vld [vmem:[#allocation8 + $0x764] sm:$0xf0] }
  0xfc   : > { %2180 = vmatpush.bf16.msrb.mxu3 %v6674_v15  ;;  %v6950_v15 = vld [vmem:[#allocation8 + $0x7e0] sm:$0xf]  ;;  %v6887_v39 = vor.u32 %v8492_v12, %v6886_v63 }
  0xfd   : > { %v6726_v12 = vld [vmem:[#allocation8 + $0x620] sm:$0xf] }
  0xfe   : > { %2139 = vmatpush.bf16.msrb.mxu0 %v6474_v37  ;;  %v1245_v30 = vpop.f32.mrf.mxu0  ;;  %v1259_v5 = vpop.f32.mrf.mxu1  ;;  %v6823_v37 = vor.u32 %v8476_v32, %v6822_v11  ;;  %v411_v11 = vpack.c.b16 %v399_v62, %v399_v62  ;;  %v726_v62 = vperm.slane %v9676_v17, 1 }
  0xff   : > { %2153 = vmatpush.bf16.msrb.mxu1 %v6538_v57  ;;  %2167 = vmatpush.bf16.msrb.mxu2 %v6602_v19  ;;  %v1246_v59 = vadd.f32 %v1245_v30, %v725_v24  ;;  %v6750_v57 = vld [vmem:[#allocation8 + $0x650] sm:$0xf]  ;;  %v6951_v19 = vor.u32 %v8508_v42, %v6950_v15 }
 0x100   : > { %2181 = vmatpush.bf16.msrb.mxu3 %v6666_v21  ;;  %v6814_v21 = vld [vmem:[#allocation8 + $0x6d0] sm:$0xf]  ;;  %v6751_v53 = vor.u32 %v8458_v18, %v6750_v57 }
 0x101   : > { %v1260_v43 = vadd.f32 %v1259_v5, %v1246_v59  ;;  %v6815_v54 = vor.u32 %v8474_v22, %v6814_v21  ;;  %v8486_v59 = vld [vmem:[#allocation8 + $0x734] sm:$0xf0]  ;;  %v6854_v21 = vld [vmem:[#allocation8 + $0x720] sm:$0xf]  ;;  %v8484_v22 = vld [vmem:[#allocation8 + $0x724] sm:$0xf0] }
 0x102   : > { %2140 = vmatpush.bf16.msrb.mxu0 %v6466_v26  ;;  %v442_v26 = vpack.c.b16 %v430_v33, %v430_v33  ;;  %v6790_v33 = vld [vmem:[#allocation8 + $0x6a0] sm:$0xf]  ;;  %v6863_v18 = vor.u32 %v8486_v59, %v6862_v31  ;;  %v8496_v31 = vld [vmem:[#allocation8 + $0x784] sm:$0xf0] }
 0x103   : > { %2154 = vmatpush.bf16.msrb.mxu1 %v6530_v48  ;;  %2168 = vmatpush.bf16.msrb.mxu2 %v6594_v27  ;;  %v516_v48 = vshll.u32 %v441_v52, 16  ;;  %v8456_v27 = vld [vmem:[#allocation8 + $0x644] sm:$0xf0] }
 0x104   : > { %2182 = vmatpush.bf16.msrb.mxu3 %v6658_v3  ;;  %v6806_v3 = vld [vmem:[#allocation8 + $0x6c0] sm:$0xf]  ;;  %v523_v29 = vshll.u32 %v442_v26, 16  ;;  %v6743_v46 = vor.u32 %v8456_v27, %v6742_v25  ;;  %v521_v5 = vshrl.u32 %v442_v26, 16  ;;  %v6727_v26 = vor.u32 %v8452_v45, %v6726_v12  ;;  %v6782_v27 = vld [vmem:[#allocation8 + $0x690] sm:$0xf] }
 0x105   : > { %v1273_v36 = vpop.f32.mrf.mxu2  ;;  %v1287_v6 = vpop.f32.mrf.mxu3  ;;  %v8461_v12 = vld [vmem:[#allocation8 + $0x674] sm:$0xf] }
 0x106   : > { %2141 = vmatpush.bf16.msrb.mxu0 %v6458_v9  ;;  %v9694_v49 = vpop.f32.mrf.mxu0  ;;  %v412_v9 = vpack.c.b16 %v400_v2, %v400_v2  ;;  %v525_v32 = vrot.slane %v523_v29, 1 }
 0x107   : > { %2155 = vmatpush.bf16.msrb.mxu1 %v6522_v16  ;;  %2169 = vmatpush.bf16.msrb.mxu2 %v6586_v50  ;;  %v518_v16 = vrot.slane %v516_v48, 1  ;;  %v6807_v50 = vor.u32 %v8472_v7, %v6806_v3  ;;  %v6718_v48 = vld [vmem:[#allocation8 + $0x610] sm:$0xf]  ;;  %v8466_v3 = vld [vmem:[#allocation8 + $0x694] sm:$0xf0] }
 0x108   : > { %2183 = vmatpush.bf16.msrb.mxu3 %v6650_v4  ;;  %v8454_v4 = vld [vmem:[#allocation8 + $0x634] sm:$0xf0]  ;;  %v2194_v63 = vrot.slane %v412_v9, 6  ;;  %v526_v52 = vor.u32 %v525_v32, %v521_v5  ;;  %v6710_v9 = vld [vmem:[#allocation8 + $0x600] sm:$0xf] }
 0x109   : > { %2142 = vmatmul.bf16.vlgmr.msrb.gmra.mxu0 %v9656_v51  ;;  %v9696_v51 = vpop.f32.mrf.mxu1  ;;  %v519_v30 = vor.u32 %v518_v16, %v514_v20  ;;  %v6735_v42 = vor.u32 %v8454_v4, %v6734_v28  ;;  %v8448_v16 = vld [vmem:[#allocation8 + $0x604] sm:$0xf0]  ;;  %v6774_v4 = vld [vmem:[#allocation8 + $0x680] sm:$0xf] }
 0x10a   : > { %2812 = vmatpush.bf16.msra.mxu0 %v6767_v10  ;;  %2170 = vmatmul.bf16.vlgmr.msrb.gmra.mxu2 %v9664_v1  ;;  %v1274_v1 = vadd.f32 %v1273_v36, %v1260_v43  ;;  %v6871_v10 = vor.u32 %v8488_v60, %v6870_v55  ;;  %v6799_v43 = vor.u32 %v8470_v0, %v6798_v13  ;;  %v6846_v55 = vld [vmem:[#allocation8 + $0x710] sm:$0xf]  ;;  %v8482_v60 = vld [vmem:[#allocation8 + $0x714] sm:$0xf0]  ;;  %v8464_v13 = vld [vmem:[#allocation8 + $0x684] sm:$0xf0] }
 0x10b   : > { %2826 = vmatpush.bf16.msra.mxu1 %v6831_v14  ;;  %2840 = vmatpush.bf16.msra.mxu2 %v6895_v40  ;;  %v6935_v14 = vor.u32 %v8504_v58, %v6934_v61  ;;  %v6926_v40 = vld [vmem:[#allocation8 + $0x7b0] sm:$0xf]  ;;  %v2200_v2 = vsel %vm585_vm0, %v411_v11, %v2194_v63  ;;  %v8498_v58 = vld [vmem:[#allocation8 + $0x794] sm:$0xf0]  ;;  %v6847_v5 = vor.u32 %v8482_v60, %v6846_v55  ;;  %v6902_v0 = vld [vmem:[#allocation8 + $0x780] sm:$0xf] }
 0x10c   : > { %2854 = vmatpush.bf16.msra.mxu3 %v6959_v41  ;;  %2156 = vmatmul.bf16.vlgmr.msrb.gmra.mxu1 %v9658_v35  ;;  %v6879_v35 = vor.u32 %v8490_v34, %v6878_v44  ;;  %v1288_v8 = vadd.f32 %v1287_v6, %v1274_v1  ;;  %v8502_v41 = vld [vmem:[#allocation8 + $0x7b4] sm:$0xf0]  ;;  %v6918_v34 = vld [vmem:[#allocation8 + $0x7a0] sm:$0xf]  ;;  %v6855_v6 = vor.u32 %v8484_v22, %v6854_v21  ;;  %v7086_v11 = vld [vmem:[#allocation8 + $0x8f0] sm:$0xf] }
 0x10d   : > { %2184 = vmatmul.bf16.vlgmr.msrb.gmra.mxu3 %v9667_v23  ;;  %v6943_v23 = vor.u32 %v8506_v38, %v6942_v47  ;;  %v9699_v57 = vpop.f32.mrf.mxu2  ;;  %v8500_v47 = vld [vmem:[#allocation8 + $0x7a4] sm:$0xf0]  ;;  %v2196_v38 = vrot.slane %v526_v52, 2  ;;  %v9704_v25 = vpop.f32.mrf.mxu3  ;;  %v8542_v63 = vld [vmem:[#allocation8 + $0x8f4] sm:$0xf0]  ;;  %v6711_v45 = vor.u32 %v8448_v16, %v6710_v9 }
 0x10e   : > { %2813 = vmatpush.bf16.msra.mxu0 %v6759_v56  ;;  %v1301_v15 = vpop.f32.mrf.mxu0  ;;  %v2195_v56 = vrot.slane %v519_v30, 4  ;;  %v382_v1 = vld [vmem:[%s9335_s13 + $0x28] sm:$0x66]  ;;  %v6919_v7 = vor.u32 %v8500_v47, %v6918_v34  ;;  %v6838_v30 = vld [vmem:[#allocation8 + $0x700] sm:$0xf] }
 0x10f   : > { %2827 = vmatpush.bf16.msra.mxu1 %v6823_v37  ;;  %2841 = vmatpush.bf16.msra.mxu2 %v6887_v39  ;;  %v1302_v37 = vadd.f32 %v1301_v15, %v1288_v8  ;;  %v6927_v39 = vor.u32 %v8502_v41, %v6926_v40  ;;  %v6910_v8 = vld [vmem:[#allocation8 + $0x790] sm:$0xf]  ;;  %v8526_v41 = vld [vmem:[#allocation8 + $0x874] sm:$0xf0]  ;;  %v6768_v52 = vld [vmem:[#allocation8 + $0x678] sm:$0xf0] }
 0x110   : > { %2855 = vmatpush.bf16.msra.mxu3 %v6951_v19  ;;  %v8468_v19 = vld [vmem:[#allocation8 + $0x6a4] sm:$0xf0]  ;;  %v2203_v20 = vsel %vm589_vm1, %v2195_v56, %v2196_v38  ;;  %v7022_v40 = vld [vmem:[#allocation8 + $0x870] sm:$0xf]  ;;  %v8477_v56 = vld [vmem:[#allocation8 + $0x6f4] sm:$0xf] }
 0x111   : > { %v1315_v44 = vpop.f32.mrf.mxu1  ;;  %v2204_v61 = vsel %vm593_vm2, %v2200_v2, %v2203_v20  ;;  %v7014_v21 = vld [vmem:[#allocation8 + $0x860] sm:$0xf]  ;;  %v7023_v22 = vor.u32 %v8526_v41, %v7022_v40  ;;  %v8524_v34 = vld [vmem:[#allocation8 + $0x864] sm:$0xf0]  ;;  %v6771_v2 = vor.u32 %v8461_v12, %v6768_v52  ;;  %v7070_v16 = vld [vmem:[#allocation8 + $0x8d0] sm:$0xf] }
 0x112   : > { %2814 = vmatpush.bf16.msra.mxu0 %v6751_v53  ;;  %v9702_v36 = vadd.f32 %v1315_v44, %v1302_v37  ;;  %v6791_v53 = vor.u32 %v8468_v19, %v6790_v33  ;;  %2311 = vst [vmem:[#allocation1 + $0x3] ss:$4 sm:$0xff] %v2204_v61  ;;  %v6775_v33 = vor.u32 %v8464_v13, %v6774_v4  ;;  %v6832_v37 = vld [vmem:[#allocation8 + $0x6f8] sm:$0xf0]  ;;  %v7078_v47 = vld [vmem:[#allocation8 + $0x8e0] sm:$0xf] }
 0x113   : > { %2828 = vmatpush.bf16.msra.mxu1 %v6815_v54  ;;  %2842 = vmatpush.bf16.msra.mxu2 %v6879_v35  ;;  %v8450_v54 = vld [vmem:[#allocation8 + $0x614] sm:$0xf0]  ;;  %v543_v35 = vunpack.c.l.b16 %v382_v1  ;;  %v6903_v19 = vor.u32 %v8496_v31, %v6902_v0  ;;  %v7087_v44 = vor.u32 %v8542_v63, %v7086_v11  ;;  %v8540_v38 = vld [vmem:[#allocation8 + $0x8e4] sm:$0xf0]  ;;  %v7015_v55 = vor.u32 %v8524_v34, %v7014_v21  ;;  %v6816_v4 = vld [vmem:[#allocation8 + $0x6d8] sm:$0xf0] }
 0x114   : > { %2856 = vmatpush.bf16.msra.mxu3 %v6943_v23  ;;  %v544_v23 = vunpack.c.h.b16 %v382_v1  ;;  %v6760_v1 = vld [vmem:[#allocation8 + $0x668] sm:$0xf0]  ;;  %v7079_v60 = vor.u32 %v8540_v38, %v7078_v47  ;;  %v7062_v40 = vld [vmem:[#allocation8 + $0x8c0] sm:$0xf]  ;;  %v8536_v41 = vld [vmem:[#allocation8 + $0x8c4] sm:$0xf0] }
 0x115   : > { %v555_v28 = vpack.c.b16 %v543_v35, %v543_v35  ;;  %v1329_v59 = vpop.f32.mrf.mxu2  ;;  %v7006_v35 = vld [vmem:[#allocation8 + $0x850] sm:$0xf]  ;;  %v8455_v11 = vld [vmem:[#allocation8 + $0x644] sm:$0xf]  ;;  %v6808_v12 = vld [vmem:[#allocation8 + $0x6c8] sm:$0xf0] }
 0x116   : > { %2815 = vmatpush.bf16.msra.mxu0 %v6743_v46  ;;  %v556_v29 = vpack.c.b16 %v544_v23, %v544_v23  ;;  %v6719_v46 = vor.u32 %v8450_v54, %v6718_v48  ;;  %v1330_v32 = vadd.f32 %v1329_v59, %v726_v62  ;;  %v8459_v48 = vld [vmem:[#allocation8 + $0x664] sm:$0xf]  ;;  %v9717_v20 = vpop.f32.mrf.mxu0  ;;  %v8522_v23 = vld [vmem:[#allocation8 + $0x854] sm:$0xf0]  ;;  %v6736_v34 = vld [vmem:[#allocation8 + $0x638] sm:$0xf0] }
 0x117   : > { %2829 = vmatpush.bf16.msra.mxu1 %v6807_v50  ;;  %2843 = vmatpush.bf16.msra.mxu2 %v6871_v10  ;;  %v6783_v50 = vor.u32 %v8466_v3, %v6782_v27  ;;  %v6911_v10 = vor.u32 %v8498_v58, %v6910_v8  ;;  %v6824_v27 = vld [vmem:[#allocation8 + $0x6e8] sm:$0xf0]  ;;  %v6763_v58 = vor.u32 %v8459_v48, %v6760_v1  ;;  %v8471_v63 = vld [vmem:[#allocation8 + $0x6c4] sm:$0xf]  ;;  %v8518_v52 = vld [vmem:[#allocation8 + $0x834] sm:$0xf0] }
 0x118   : > { %2857 = vmatpush.bf16.msra.mxu3 %v6935_v14  ;;  %v8480_v14 = vld [vmem:[#allocation8 + $0x704] sm:$0xf0]  ;;  %v1343_v15 = vpop.f32.mrf.mxu3  ;;  %v8534_v21 = vld [vmem:[#allocation8 + $0x8b4] sm:$0xf0]  ;;  %v8469_v47 = vld [vmem:[#allocation8 + $0x6b4] sm:$0xf] }
 0x119   : > { %v9715_v3 = vld.sshfl [vmem:[#allocation1] sm:$0xff pattern:$0x73625140]  ;;  %v9723_v8 = vld.sshfl [vmem:[#allocation1 + $0x18] sm:$0xff pattern:$0x73625140]  ;;  %v9725_v61 = vpop.f32.mrf.mxu1 }
 0x11a   : > { %2816 = vmatpush.bf16.msra.mxu0 %v6735_v42  ;;  %v567_v42 = vrot.slane %v555_v28, 1  ;;  %v8538_v28 = vld [vmem:[#allocation8 + $0x8d4] sm:$0xf0]  ;;  %v6800_v38 = vld [vmem:[#allocation8 + $0x6b8] sm:$0xf0] }
 0x11b   : > { %2830 = vmatpush.bf16.msra.mxu1 %v6799_v43  ;;  %2844 = vmatpush.bf16.msra.mxu2 %v6863_v18  ;;  %v6707_v43 = vrot.slane %v556_v29, 7  ;;  %v9712_v18 = vadd.f32 %v1343_v15, %v1330_v32  ;;  %v8457_v29 = vld [vmem:[#allocation8 + $0x654] sm:$0xf]  ;;  %v6744_v32 = vld [vmem:[#allocation8 + $0x648] sm:$0xf0] }
 0x11c   : > { %2858 = vmatpush.bf16.msra.mxu3 %v6927_v39  ;;  %v6839_v39 = vor.u32 %v8480_v14, %v6838_v30  ;;  %v7007_v30 = vor.u32 %v8522_v23, %v7006_v35  ;;  %v8520_v14 = vld [vmem:[#allocation8 + $0x844] sm:$0xf0]  ;;  %v8451_v23 = vld [vmem:[#allocation8 + $0x624] sm:$0xf] }
 0x11d   : > { %v2207_v54 = vsel %vm585_vm0, %v567_v42, %v6707_v43  ;;  %v9729_v13 = vpop.f32.mrf.mxu2  ;;  %v8516_v48 = vld [vmem:[#allocation8 + $0x824] sm:$0xf0] }
 0x11e   : > { %2817 = vmatpush.bf16.msra.mxu0 %v6727_v26  ;;  %v6835_v26 = vor.u32 %v8477_v56, %v6832_v37  ;;  %2319 = vst [vmem:[#allocation1 + $0x23] ss:$4 sm:$0xff] %v2207_v54  ;;  %v6747_v56 = vor.u32 %v8455_v11, %v6744_v32  ;;  %v6811_v37 = vor.u32 %v8471_v63, %v6808_v12  ;;  %v8532_v35 = vld [vmem:[#allocation8 + $0x8a4] sm:$0xf0]  ;;  %v6966_v11 = vld [vmem:[#allocation8 + $0x800] sm:$0xf] }
 0x11f   : > { %2831 = vmatpush.bf16.msra.mxu1 %v6791_v53  ;;  %2845 = vmatpush.bf16.msra.mxu2 %v6855_v6  ;;  %v8475_v53 = vld [vmem:[#allocation8 + $0x6e4] sm:$0xf]  ;;  %v9719_v6 = vld.sshfl [vmem:[#allocation1 + $0x8] sm:$0xff pattern:$0x73625140] }
 0x120   : > { %2859 = vmatpush.bf16.msra.mxu3 %v6919_v7  ;;  %v9721_v7 = vld.sshfl [vmem:[#allocation1 + $0x10] sm:$0xff pattern:$0x73625140]  ;;  %v6827_v9 = vor.u32 %v8475_v53, %v6824_v27  ;;  %v9733_v59 = vpop.f32.mrf.mxu3  ;;  %v6803_v53 = vor.u32 %v8469_v47, %v6800_v38  ;;  %v7046_v27 = vld [vmem:[#allocation8 + $0x8a0] sm:$0xf] }
 0x121   : > { %v8512_v12 = vld [vmem:[#allocation8 + $0x804] sm:$0xf0]  ;;  %v7024_v38 = vld [vmem:[#allocation8 + $0x878] sm:$0xf0] }
 0x122   : > { %2818 = vmatpush.bf16.msra.mxu0 %v6719_v46  ;;  %v6752_v46 = vld [vmem:[#allocation8 + $0x658] sm:$0xf0] }
 0x123   : > { %2832 = vmatpush.bf16.msra.mxu1 %v6783_v50  ;;  %2846 = vmatpush.bf16.msra.mxu2 %v6847_v5  ;;  %v8473_v50 = vld [vmem:[#allocation8 + $0x6d4] sm:$0xf]  ;;  %v7071_v5 = vor.u32 %v8538_v28, %v7070_v16  ;;  %v6755_v0 = vor.u32 %v8457_v29, %v6752_v46  ;;  %v7047_v46 = vor.u32 %v8532_v35, %v7046_v27  ;;  %v6888_v27 = vld [vmem:[#allocation8 + $0x768] sm:$0xf0] }
 0x124   : > { %2860 = vmatpush.bf16.msra.mxu3 %v6911_v10  ;;  %v6998_v10 = vld [vmem:[#allocation8 + $0x840] sm:$0xf]  ;;  %v6819_v31 = vor.u32 %v8473_v50, %v6816_v4  ;;  %v6974_v50 = vld [vmem:[#allocation8 + $0x810] sm:$0xf]  ;;  %v8514_v4 = vld [vmem:[#allocation8 + $0x814] sm:$0xf0] }
 0x125   : > { %v6999_v43 = vor.u32 %v8520_v14, %v6998_v10  ;;  %v7038_v10 = vld [vmem:[#allocation8 + $0x890] sm:$0xf]  ;;  %v8530_v14 = vld [vmem:[#allocation8 + $0x894] sm:$0xf0]  ;;  %v6975_v32 = vor.u32 %v8514_v4, %v6974_v50 }
 0x126   : > { %2819 = vmatpush.bf16.msra.mxu0 %v6711_v45  ;;  %v1357_v15 = vpop.f32.mrf.mxu0  ;;  %v7063_v45 = vor.u32 %v8536_v41, %v7062_v40  ;;  %v8465_v40 = vld [vmem:[#allocation8 + $0x694] sm:$0xf]  ;;  %v6784_v41 = vld [vmem:[#allocation8 + $0x698] sm:$0xf0]  ;;  %v7039_v63 = vor.u32 %v8530_v14, %v7038_v10 }
 0x127   : > { %2833 = vmatpush.bf16.msra.mxu1 %v6775_v33  ;;  %2847 = vmatpush.bf16.msra.mxu2 %v6839_v39  ;;  %v1358_v42 = vadd.f32 %v1357_v15, %v9712_v18  ;;  %v6990_v33 = vld [vmem:[#allocation8 + $0x830] sm:$0xf]  ;;  %v7030_v15 = vld [vmem:[#allocation8 + $0x880] sm:$0xf]  ;;  %v6880_v10 = vld [vmem:[#allocation8 + $0x758] sm:$0xf0] }
 0x128   : > { %2861 = vmatpush.bf16.msra.mxu3 %v6903_v19  ;;  %v7054_v19 = vld [vmem:[#allocation8 + $0x8b0] sm:$0xf] }
 0x129   : > { %2820 = vmatmul.bf16.vlgmr.msra.gmra.mxu0 %v9715_v3  ;;  %v1371_v39 = vpop.f32.mrf.mxu1  ;;  %v7055_v18 = vor.u32 %v8534_v21, %v7054_v19  ;;  %v6896_v19 = vld [vmem:[#allocation8 + $0x778] sm:$0xf0]  ;;  %v8509_v21 = vld [vmem:[#allocation8 + $0x7f4] sm:$0xf] }
 0x12a   : > { %2868 = vmatpush.bf16.msrb.mxu0 %v7023_v22  ;;  %2834 = vmatmul.bf16.vlgmr.msra.gmra.mxu1 %v9719_v6  ;;  %v8453_v22 = vld [vmem:[#allocation8 + $0x634] sm:$0xf] }
 0x12b   : > { %2882 = vmatpush.bf16.msrb.mxu1 %v7087_v44  ;;  %2896 = vmatpush.bf16.msrb.mxu2 %v6771_v2  ;;  %v1372_v44 = vadd.f32 %v1371_v39, %v1358_v42  ;;  %v6991_v2 = vor.u32 %v8518_v52, %v6990_v33  ;;  %v6739_v1 = vor.u32 %v8453_v22, %v6736_v34  ;;  %v8528_v42 = vld [vmem:[#allocation8 + $0x884] sm:$0xf0]  ;;  %v8447_v33 = vld [vmem:[#allocation8 + $0x604] sm:$0xf]  ;;  %v6712_v52 = vld [vmem:[#allocation8 + $0x608] sm:$0xf0] }
 0x12c   : > { %2910 = vmatpush.bf16.msrb.mxu3 %v6835_v26  ;;  %2848 = vmatmul.bf16.vlgmr.msra.gmra.mxu2 %v9721_v7  ;;  %v6982_v26 = vld [vmem:[#allocation8 + $0x820] sm:$0xf]  ;;  %v8493_v39 = vld [vmem:[#allocation8 + $0x774] sm:$0xf]  ;;  %v6960_v22 = vld [vmem:[#allocation8 + $0x7f8] sm:$0xf0]  ;;  %v6967_v34 = vor.u32 %v8512_v12, %v6966_v11  ;;  %v7031_v47 = vor.u32 %v8528_v42, %v7030_v15 }
 0x12d   : > { %2862 = vmatmul.bf16.vlgmr.msra.gmra.mxu3 %v9723_v8  ;;  %v1385_v54 = vpop.f32.mrf.mxu2  ;;  %v6983_v29 = vor.u32 %v8516_v48, %v6982_v26  ;;  %v6715_v26 = vor.u32 %v8447_v33, %v6712_v52  ;;  %v9740_v50 = vld.sshfl [vmem:[#allocation1 + $0x28] sm:$0xff pattern:$0x73625140]  ;;  %v7008_v11 = vld [vmem:[#allocation8 + $0x858] sm:$0xf0] }
 0x12e   : > { %2869 = vmatpush.bf16.msrb.mxu0 %v7015_v55  ;;  %v1386_v55 = vadd.f32 %v1385_v54, %v1372_v44  ;;  %v8525_v44 = vld [vmem:[#allocation8 + $0x874] sm:$0xf]  ;;  %v8491_v54 = vld [vmem:[#allocation8 + $0x764] sm:$0xf]  ;;  %v9744_v12 = vpop.f32.mrf.mxu0  ;;  %v6872_v33 = vld [vmem:[#allocation8 + $0x748] sm:$0xf0] }
 0x12f   : > { %2883 = vmatpush.bf16.msrb.mxu1 %v7079_v60  ;;  %2897 = vmatpush.bf16.msrb.mxu2 %v6763_v58  ;;  %v6728_v60 = vld [vmem:[#allocation8 + $0x628] sm:$0xf0]  ;;  %v8467_v58 = vld [vmem:[#allocation8 + $0x6a4] sm:$0xf]  ;;  %v7027_v35 = vor.u32 %v8525_v44, %v7024_v38  ;;  %v6891_v4 = vor.u32 %v8491_v54, %v6888_v27  ;;  %v8533_v54 = vld [vmem:[#allocation8 + $0x8b4] sm:$0xf] }
 0x130   : > { %2911 = vmatpush.bf16.msrb.mxu3 %v6827_v9  ;;  %v6792_v9 = vld [vmem:[#allocation8 + $0x6a8] sm:$0xf0]  ;;  %v1399_v16 = vpop.f32.mrf.mxu3  ;;  %v7056_v27 = vld [vmem:[#allocation8 + $0x8b8] sm:$0xf0] }
 0x131   : > { %v9736_v28 = vadd.f32 %v1399_v16, %v1386_v55  ;;  %v8507_v55 = vld [vmem:[#allocation8 + $0x7e4] sm:$0xf]  ;;  %v9746_v15 = vpop.f32.mrf.mxu1  ;;  %v7064_v44 = vld [vmem:[#allocation8 + $0x8c8] sm:$0xf0] }
 0x132   : > { %2870 = vmatpush.bf16.msrb.mxu0 %v7007_v30  ;;  %v6731_v30 = vor.u32 %v8451_v23, %v6728_v60  ;;  %v6952_v60 = vld [vmem:[#allocation8 + $0x7e8] sm:$0xf0]  ;;  %v8539_v16 = vld [vmem:[#allocation8 + $0x8e4] sm:$0xf] }
 0x133   : > { %2884 = vmatpush.bf16.msrb.mxu1 %v7071_v5  ;;  %2898 = vmatpush.bf16.msrb.mxu2 %v6755_v0  ;;  %v6795_v5 = vor.u32 %v8467_v58, %v6792_v9  ;;  %v8449_v0 = vld [vmem:[#allocation8 + $0x614] sm:$0xf]  ;;  %v8523_v58 = vld [vmem:[#allocation8 + $0x864] sm:$0xf]  ;;  %v7016_v9 = vld [vmem:[#allocation8 + $0x868] sm:$0xf0] }
 0x134   : > { %2912 = vmatpush.bf16.msrb.mxu3 %v6819_v31  ;;  %v6720_v31 = vld [vmem:[#allocation8 + $0x618] sm:$0xf0]  ;;  %v7019_v14 = vor.u32 %v8523_v58, %v7016_v9  ;;  %v8483_v9 = vld [vmem:[#allocation8 + $0x724] sm:$0xf] }
 0x136   : > { %2871 = vmatpush.bf16.msrb.mxu0 %v6999_v43  ;;  %v6723_v43 = vor.u32 %v8449_v0, %v6720_v31  ;;  %v8505_v31 = vld [vmem:[#allocation8 + $0x7d4] sm:$0xf] }
 0x137   : > { %2885 = vmatpush.bf16.msrb.mxu1 %v7063_v45  ;;  %2899 = vmatpush.bf16.msrb.mxu2 %v6747_v56  ;;  %v6787_v45 = vor.u32 %v8465_v40, %v6784_v41  ;;  %v8463_v56 = vld [vmem:[#allocation8 + $0x684] sm:$0xf]  ;;  %v6944_v40 = vld [vmem:[#allocation8 + $0x7d8] sm:$0xf0]  ;;  %v8521_v41 = vld [vmem:[#allocation8 + $0x854] sm:$0xf] }
 0x138   : > { %2913 = vmatpush.bf16.msrb.mxu3 %v6811_v37  ;;  %v6776_v37 = vld [vmem:[#allocation8 + $0x688] sm:$0xf0]  ;;  %v7011_v52 = vor.u32 %v8521_v41, %v7008_v11 }
 0x139   : > { %v6779_v48 = vor.u32 %v8463_v56, %v6776_v37  ;;  %v8503_v37 = vld [vmem:[#allocation8 + $0x7c4] sm:$0xf] }
 0x13a   : > { %2872 = vmatpush.bf16.msrb.mxu0 %v6991_v2  ;;  %v8541_v2 = vld [vmem:[#allocation8 + $0x8f4] sm:$0xf] }
 0x13b   : > { %2886 = vmatpush.bf16.msrb.mxu1 %v7055_v18  ;;  %2900 = vmatpush.bf16.msrb.mxu2 %v6739_v1  ;;  %v7088_v18 = vld [vmem:[#allocation8 + $0x8f8] sm:$0xf0]  ;;  %v6899_v1 = vor.u32 %v8493_v39, %v6896_v19  ;;  %v6936_v39 = vld [vmem:[#allocation8 + $0x7c8] sm:$0xf0]  ;;  %v8519_v19 = vld [vmem:[#allocation8 + $0x844] sm:$0xf] }
 0x13c   : > { %2914 = vmatpush.bf16.msrb.mxu3 %v6803_v53  ;;  %v6963_v53 = vor.u32 %v8509_v21, %v6960_v22  ;;  %v7091_v23 = vor.u32 %v8541_v2, %v7088_v18  ;;  %v7000_v21 = vld [vmem:[#allocation8 + $0x848] sm:$0xf0]  ;;  %v8535_v22 = vld [vmem:[#allocation8 + $0x8c4] sm:$0xf]  ;;  %v8501_v18 = vld [vmem:[#allocation8 + $0x7b4] sm:$0xf] }
 0x13d   : > { %v7003_v38 = vor.u32 %v8519_v19, %v7000_v21  ;;  %v7067_v2 = vor.u32 %v8535_v22, %v7064_v44 }
 0x13e   : > { %2873 = vmatpush.bf16.msrb.mxu0 %v6983_v29  ;;  %v7080_v29 = vld [vmem:[#allocation8 + $0x8e8] sm:$0xf0] }
 0x13f   : > { %2887 = vmatpush.bf16.msrb.mxu1 %v7047_v46  ;;  %2901 = vmatpush.bf16.msrb.mxu2 %v6731_v30  ;;  %v9738_v46 = vld.sshfl [vmem:[#allocation1 + $0x20] sm:$0xff pattern:$0x73625140]  ;;  %v6955_v30 = vor.u32 %v8507_v55, %v6952_v60  ;;  %v7083_v0 = vor.u32 %v8539_v16, %v7080_v29  ;;  %v9752_v55 = vpop.f32.mrf.mxu3 }
 0x140   : > { %2915 = vmatpush.bf16.msrb.mxu3 %v6795_v5  ;;  %v8489_v5 = vld [vmem:[#allocation8 + $0x754] sm:$0xf]  ;;  %v6856_v16 = vld [vmem:[#allocation8 + $0x728] sm:$0xf0] }
 0x141   : > { %v6883_v42 = vor.u32 %v8489_v5, %v6880_v10  ;;  %v8499_v5 = vld [vmem:[#allocation8 + $0x7a4] sm:$0xf]  ;;  %v6920_v10 = vld [vmem:[#allocation8 + $0x7a8] sm:$0xf0]  ;;  %v6859_v41 = vor.u32 %v8483_v9, %v6856_v16 }
 0x142   : > { %2874 = vmatpush.bf16.msrb.mxu0 %v6975_v32  ;;  %v8537_v32 = vld [vmem:[#allocation8 + $0x8d4] sm:$0xf]  ;;  %v6923_v11 = vor.u32 %v8499_v5, %v6920_v10 }
 0x143   : > { %2888 = vmatpush.bf16.msrb.mxu1 %v7039_v63  ;;  %2902 = vmatpush.bf16.msrb.mxu2 %v6723_v43  ;;  %v7072_v63 = vld [vmem:[#allocation8 + $0x8d8] sm:$0xf0]  ;;  %v6947_v43 = vor.u32 %v8505_v31, %v6944_v40  ;;  %v8531_v31 = vld [vmem:[#allocation8 + $0x8a4] sm:$0xf]  ;;  %v7048_v40 = vld [vmem:[#allocation8 + $0x8a8] sm:$0xf0] }
 0x144   : > { %2916 = vmatpush.bf16.msrb.mxu3 %v6787_v45  ;;  %v8487_v45 = vld [vmem:[#allocation8 + $0x744] sm:$0xf]  ;;  %v7075_v56 = vor.u32 %v8537_v32, %v7072_v63  ;;  %v8481_v32 = vld [vmem:[#allocation8 + $0x714] sm:$0xf]  ;;  %v6848_v63 = vld [vmem:[#allocation8 + $0x718] sm:$0xf0] }
 0x145   : > { %v6851_v22 = vor.u32 %v8481_v32, %v6848_v63 }
 0x146   : > { %2875 = vmatpush.bf16.msrb.mxu0 %v6967_v34  ;;  %v8485_v34 = vld [vmem:[#allocation8 + $0x734] sm:$0xf] }
 0x147   : > { %2889 = vmatpush.bf16.msrb.mxu1 %v7031_v47  ;;  %2903 = vmatpush.bf16.msrb.mxu2 %v6715_v26  ;;  %v6864_v47 = vld [vmem:[#allocation8 + $0x738] sm:$0xf0] }
 0x148   : > { %2917 = vmatpush.bf16.msrb.mxu3 %v6779_v48  ;;  %v6928_v26 = vld [vmem:[#allocation8 + $0x7b8] sm:$0xf0]  ;;  %v8517_v48 = vld [vmem:[#allocation8 + $0x834] sm:$0xf]  ;;  %v6867_v60 = vor.u32 %v8485_v34, %v6864_v47 }
 0x149   : > { %2876 = vmatmul.bf16.vlgmr.msrb.gmra.mxu0 %v9738_v46  ;;  %v6931_v58 = vor.u32 %v8501_v18, %v6928_v26  ;;  %v6904_v18 = vld [vmem:[#allocation8 + $0x788] sm:$0xf0]  ;;  %v8511_v26 = vld [vmem:[#allocation8 + $0x804] sm:$0xf] }
 0x14a   : > { %2924 = vmatpush.bf16.msra.mxu0 %v6899_v1  ;;  %2890 = vmatmul.bf16.vlgmr.msrb.gmra.mxu1 %v9740_v50  ;;  %v9750_v1 = vpop.f32.mrf.mxu2 }
 0x14b   : > { %2938 = vmatpush.bf16.msra.mxu1 %v6963_v53  ;;  %2952 = vmatpush.bf16.msra.mxu2 %v7027_v35  ;;  %v6992_v53 = vld [vmem:[#allocation8 + $0x838] sm:$0xf0]  ;;  %v2031_v35 = vpop.f32.mrf.mxu0 }
 0x14c   : > { %2966 = vmatpush.bf16.msra.mxu3 %v7091_v23  ;;  %2904 = vmatmul.bf16.vlgmr.msrb.gmra.mxu2 %v9715_v3  ;;  %v6875_v3 = vor.u32 %v8487_v45, %v6872_v33  ;;  %v2045_v23 = vpop.f32.mrf.mxu1  ;;  %v8497_v45 = vld [vmem:[#allocation8 + $0x794] sm:$0xf]  ;;  %v6912_v33 = vld [vmem:[#allocation8 + $0x798] sm:$0xf0] }
 0x14d   : > { %2918 = vmatmul.bf16.vlgmr.msrb.gmra.mxu3 %v9719_v6  ;;  %v6939_v6 = vor.u32 %v8503_v37, %v6936_v39  ;;  %v2046_v29 = vadd.f32 %v2045_v23, %v2031_v35  ;;  %v8529_v37 = vld [vmem:[#allocation8 + $0x894] sm:$0xf]  ;;  %v7040_v39 = vld [vmem:[#allocation8 + $0x898] sm:$0xf0]  ;;  %v6915_v44 = vor.u32 %v8497_v45, %v6912_v33 }
 0x14e   : > { %2925 = vmatpush.bf16.msra.mxu0 %v6891_v4  ;;  %v6995_v4 = vor.u32 %v8517_v48, %v6992_v53  ;;  %v6968_v53 = vld [vmem:[#allocation8 + $0x808] sm:$0xf0] }
 0x14f   : > { %2939 = vmatpush.bf16.msra.mxu1 %v6955_v30  ;;  %2953 = vmatpush.bf16.msra.mxu2 %v7019_v14  ;;  %v7059_v30 = vor.u32 %v8533_v54, %v7056_v27  ;;  %v8515_v14 = vld [vmem:[#allocation8 + $0x824] sm:$0xf]  ;;  %v7032_v27 = vld [vmem:[#allocation8 + $0x888] sm:$0xf0] }
 0x150   : > { %2967 = vmatpush.bf16.msra.mxu3 %v7083_v0  ;;  %v6984_v0 = vld [vmem:[#allocation8 + $0x828] sm:$0xf0]  ;;  %v2073_v34 = vpop.f32.mrf.mxu3  ;;  %v8527_v54 = vld [vmem:[#allocation8 + $0x884] sm:$0xf] }
 0x152   : > { %2926 = vmatpush.bf16.msra.mxu0 %v6883_v42  ;;  %v6987_v42 = vor.u32 %v8515_v14, %v6984_v0  ;;  %v2059_v19 = vpop.f32.mrf.mxu2 }
 0x153   : > { %2940 = vmatpush.bf16.msra.mxu1 %v6947_v43  ;;  %2954 = vmatpush.bf16.msra.mxu2 %v7011_v52  ;;  %v7051_v43 = vor.u32 %v8531_v31, %v7048_v40  ;;  %v8513_v52 = vld [vmem:[#allocation8 + $0x814] sm:$0xf]  ;;  %v2060_v21 = vadd.f32 %v2059_v19, %v2046_v29  ;;  %v2033_v9 = vpop.f32.mrf.mxu0 }
 0x154   : > { %2968 = vmatpush.bf16.msra.mxu3 %v7075_v56  ;;  %v6976_v56 = vld [vmem:[#allocation8 + $0x818] sm:$0xf0]  ;;  %v2047_v16 = vpop.f32.mrf.mxu1 }
 0x155   : > { %v6979_v47 = vor.u32 %v8513_v52, %v6976_v56  ;;  %v2074_v48 = vadd.f32 %v2073_v34, %v2060_v21  ;;  %v8558_v34 = vld [vmem:[#allocation11 + $0x74] sm:$0xf0] }
 0x156   : > { %2927 = vmatpush.bf16.msra.mxu0 %v6875_v3  ;;  %v8479_v3 = vld [vmem:[#allocation8 + $0x704] sm:$0xf] }
 0x157   : > { %2941 = vmatpush.bf16.msra.mxu1 %v6939_v6  ;;  %2955 = vmatpush.bf16.msra.mxu2 %v7003_v38  ;;  %v6840_v6 = vld [vmem:[#allocation8 + $0x708] sm:$0xf0]  ;;  %v7043_v38 = vor.u32 %v8529_v37, %v7040_v39 }
 0x158   : > { %2969 = vmatpush.bf16.msra.mxu3 %v7067_v2  ;;  %v8495_v2 = vld [vmem:[#allocation8 + $0x784] sm:$0xf]  ;;  %v6843_v35 = vor.u32 %v8479_v3, %v6840_v6  ;;  %v9761_v14 = vpop.f32.mrf.mxu3  ;;  %v7154_v6 = vld [vmem:[#allocation11 + $0x70] sm:$0xf] }
 0x159   : > { %v6907_v23 = vor.u32 %v8495_v2, %v6904_v18  ;;  %v8574_v2 = vld [vmem:[#allocation11 + $0xf4] sm:$0xf0]  ;;  %v7282_v18 = vld [vmem:[#allocation11 + $0x170] sm:$0xf] }
 0x15a   : > { %2928 = vmatpush.bf16.msra.mxu0 %v6867_v60  ;;  %v6971_v60 = vor.u32 %v8511_v26, %v6968_v53  ;;  %v2061_v0 = vpop.f32.mrf.mxu2  ;;  %v8590_v26 = vld [vmem:[#allocation11 + $0x174] sm:$0xf0] }
 0x15b   : > { %2942 = vmatpush.bf16.msra.mxu1 %v6931_v58  ;;  %2956 = vmatpush.bf16.msra.mxu2 %v6995_v4  ;;  %v7035_v58 = vor.u32 %v8527_v54, %v7032_v27  ;;  %v7283_v54 = vor.u32 %v8590_v26, %v7282_v18  ;;  %v7346_v27 = vld [vmem:[#allocation11 + $0x1f0] sm:$0xf] }
 0x15c   : > { %2970 = vmatpush.bf16.msra.mxu3 %v7059_v30  ;;  %v7138_v26 = vld [vmem:[#allocation11 + $0x50] sm:$0xf] }
 0x15e   : > { %2929 = vmatpush.bf16.msra.mxu0 %v6859_v41 }
 0x15f   : > { %2943 = vmatpush.bf16.msra.mxu1 %v6923_v11  ;;  %2957 = vmatpush.bf16.msra.mxu2 %v6987_v42 }
 0x160   : > { %2971 = vmatpush.bf16.msra.mxu3 %v7051_v43 }
 0x162   : > { %2930 = vmatpush.bf16.msra.mxu0 %v6851_v22 }
 0x163   : > { %2944 = vmatpush.bf16.msra.mxu1 %v6915_v44  ;;  %2958 = vmatpush.bf16.msra.mxu2 %v6979_v47  ;;  %v1248_v44 = vadd.f32 %v9694_v49, %v725_v24  ;;  %v7218_v47 = vld [vmem:[#allocation11 + $0xf0] sm:$0xf]  ;;  %v2048_v24 = vadd.f32 %v2047_v16, %v2033_v9  ;;  %v8604_v9 = vld [vmem:[#allocation11 + $0x1e4] sm:$0xf0] }
 0x164   : > { %2972 = vmatpush.bf16.msra.mxu3 %v7043_v38  ;;  %v7155_v38 = vor.u32 %v8558_v34, %v7154_v6  ;;  %v7219_v53 = vor.u32 %v8574_v2, %v7218_v47  ;;  %v8572_v6 = vld [vmem:[#allocation11 + $0xe4] sm:$0xf0]  ;;  %v7274_v34 = vld [vmem:[#allocation11 + $0x160] sm:$0xf] }
 0x165   : > { %v8588_v47 = vld [vmem:[#allocation11 + $0x164] sm:$0xf0] }
 0x166   : > { %2931 = vmatpush.bf16.msra.mxu0 %v6843_v35  ;;  %v2087_v29 = vpop.f32.mrf.mxu0  ;;  %v8606_v35 = vld [vmem:[#allocation11 + $0x1f4] sm:$0xf0] }
 0x167   : > { %2945 = vmatpush.bf16.msra.mxu1 %v6907_v23  ;;  %2959 = vmatpush.bf16.msra.mxu2 %v6971_v60  ;;  %v2101_v4 = vpop.f32.mrf.mxu1  ;;  %v2088_v30 = vadd.f32 %v2087_v29, %v2074_v48  ;;  %v1262_v23 = vadd.f32 %v9696_v51, %v1248_v44  ;;  %v7347_v60 = vor.u32 %v8606_v35, %v7346_v27  ;;  %v7146_v29 = vld [vmem:[#allocation11 + $0x60] sm:$0xf]  ;;  %v3036_v35 = vld [vmem:[#allocation2 + $0x28] sm:$0x44] }
 0x168   : > { %2973 = vmatpush.bf16.msra.mxu3 %v7035_v58  ;;  %v7275_v44 = vor.u32 %v8588_v47, %v7274_v34 }
 0x169   : > { %2932 = vmatmul.bf16.vlgmr.msra.gmra.mxu0 %v9721_v7  ;;  %v2102_v5 = vadd.f32 %v2101_v4, %v2088_v30  ;;  %v8556_v4 = vld [vmem:[#allocation11 + $0x64] sm:$0xf0]  ;;  %v7210_v30 = vld [vmem:[#allocation11 + $0xe0] sm:$0xf]  ;;  %v1276_v16 = vadd.f32 %v9699_v57, %v1262_v23  ;;  %v7202_v57 = vld [vmem:[#allocation11 + $0xd0] sm:$0xf] }
 0x16a   : > { %2946 = vmatmul.bf16.vlgmr.msra.gmra.mxu1 %v9723_v8  ;;  %2960 = vmatmul.bf16.vlgmr.msra.gmra.mxu2 %v9738_v46  ;;  %v7211_v51 = vor.u32 %v8572_v6, %v7210_v30  ;;  %v8586_v30 = vld [vmem:[#allocation11 + $0x154] sm:$0xf0] }
 0x16b   : > { %2974 = vmatmul.bf16.vlgmr.msra.gmra.mxu3 %v9740_v50  ;;  %v9759_v10 = vadd.f32 %v2102_v5, %v9702_v36  ;;  %4011 = vmatpush.bf16.msrb.mxu0 %v7155_v38  ;;  %v7147_v5 = vor.u32 %v8556_v4, %v7146_v29  ;;  %v7338_v38 = vld [vmem:[#allocation11 + $0x1e0] sm:$0xf] }
 0x16c   : > { %4025 = vmatpush.bf16.msrb.mxu1 %v7219_v53  ;;  %4039 = vmatpush.bf16.msrb.mxu2 %v7283_v54  ;;  %v8554_v53 = vld [vmem:[#allocation11 + $0x54] sm:$0xf0] }
 0x16d   : > { %4053 = vmatpush.bf16.msrb.mxu3 %v7347_v60  ;;  %v7139_v23 = vor.u32 %v8554_v53, %v7138_v26  ;;  %v8568_v26 = vld [vmem:[#allocation11 + $0xc4] sm:$0xf0] }
 0x16e   : > { %v9763_v41 = vpop.f32.mrf.mxu0 }
 0x16f   : > { %v2115_v40 = vpop.f32.mrf.mxu2  ;;  %v9765_v7 = vpop.f32.mrf.mxu1  ;;  %4012 = vmatpush.bf16.msrb.mxu0 %v7147_v5 }
 0x170   : > { %v2129_v31 = vpop.f32.mrf.mxu3  ;;  %4026 = vmatpush.bf16.msrb.mxu1 %v7211_v51  ;;  %4040 = vmatpush.bf16.msrb.mxu2 %v7275_v44 }
 0x171   : > { %v2130_v49 = vadd.f32 %v2129_v31, %v2115_v40  ;;  %v7339_v31 = vor.u32 %v8604_v9, %v7338_v38  ;;  %v2062_v40 = vadd.f32 %v2061_v0, %v2048_v24  ;;  %v1290_v0 = vadd.f32 %v9704_v25, %v1276_v16  ;;  %v7266_v24 = vld [vmem:[#allocation11 + $0x150] sm:$0xf]  ;;  %v7130_v9 = vld [vmem:[#allocation11 + $0x40] sm:$0xf]  ;;  %v8552_v16 = vld [vmem:[#allocation11 + $0x44] sm:$0xf0] }
 0x172   : > { %v3014_v25 = vld [vmem:[#allocation2] sm:$0x11]  ;;  %v3037_v38 = vsel %vm9830_vm3, 0, %v3036_v35  ;;  %v9159_v35 = vmov 0  }
 0x173   : > { %4054 = vmatpush.bf16.msrb.mxu3 %v7339_v31  ;;  %4013 = vmatpush.bf16.msrb.mxu0 %v7139_v23  ;;  %v1304_v5 = vadd.f32 %v9717_v20, %v1290_v0  ;;  %3038 = vst [vmem:[#allocation2 + $0x28] sm:$0x44] %v3037_v38  ;;  %v3042_v23 = vld [vmem:[#allocation2 + $0x10] sm:$0x44]  ;;  %v8550_v38 = vld [vmem:[#allocation11 + $0x34] sm:$0xf0] }
 0x174   : > { %2998 = vst [vmem:[#allocation2 + $0x20] sm:$0xff] %v9159_v35 }
 0x175   : > { %3000 = vst [vmem:[#allocation2 + $0x8] sm:$0xff] %v9159_v35 }
 0x177   : > { %v9769_v46 = vpop.f32.mrf.mxu2 }
 0x178   : > { %v9767_v8 = vpop.f32.mrf.mxu3 }
 0x179   : > { %v2132_v31 = vadd.f32 %v9767_v8, %v9769_v46 }
 0x186   : > { %v2143_v50 = vpop.f32.mrf.mxu0 }
 0x189   : > { %v9771_v11 = vpop.f32.mrf.mxu1 }
 0x18d   : > { %v9775_v36 = vpop.f32.mrf.mxu2 }
 0x18e   : > { %v9777_v63 = vpop.f32.mrf.mxu0 }
 0x190   : > { %v9773_v32 = vpop.f32.mrf.mxu3 }
 0x191   : > { %v9779_v42 = vpop.f32.mrf.mxu1 }
 0x195   : > { %v9783_v33 = vpop.f32.mrf.mxu2 }
 0x198   : > { %v9781_v43 = vpop.f32.mrf.mxu3 }
 0x1a6   : > { %v2821_v45 = vpop.f32.mrf.mxu0 }
 0x1a7   : > { %v2835_v52 = vpop.f32.mrf.mxu1 }
 0x1a8   : > { %v2836_v58 = vadd.f32 %v2835_v52, %v2821_v45  ;;  %v2144_v45 = vadd.f32 %v2143_v50, %v2130_v49  ;;  %v1332_v50 = vadd.f32 %v9729_v13, %v726_v62  ;;  %v2076_v49 = vadd.f32 %v9761_v14, %v2062_v40  ;;  %v3039_v62 = vld [vmem:[#allocation2] sm:$0x44] }
 0x1a9   : > { %v3015_v14 = vsel %vm9812_vm13, 0, %v3014_v25  ;;  %v3040_v20 = vsel %vm9830_vm3, 0, %v3039_v62  ;;  %v1318_v25 = vadd.f32 %v9725_v61, %v1304_v5 }
 0x1aa   : > { %v1346_v6 = vadd.f32 %v9733_v59, %v1332_v50  ;;  %3016 = vst [vmem:[#allocation2] sm:$0x11] %v3015_v14  ;;  %v2090_v47 = vadd.f32 %v9763_v41, %v2076_v49  ;;  %v7131_v41 = vor.u32 %v8552_v16, %v7130_v9  ;;  %v2146_v50 = vadd.f32 %v9777_v63, %v2132_v31 }
 0x1ab   : > { %3041 = vst [vmem:[#allocation2] sm:$0x44] %v3040_v20  ;;  %v7186_v20 = vld [vmem:[#allocation11 + $0xb0] sm:$0xf] }
 0x1ac   : > { %v1360_v8 = vadd.f32 %v9744_v12, %v1346_v6  ;;  %4014 = vmatpush.bf16.msrb.mxu0 %v7131_v41  ;;  %v2104_v12 = vadd.f32 %v9765_v7, %v2090_v47  ;;  %v8584_v7 = vld [vmem:[#allocation11 + $0x144] sm:$0xf0] }
 0x1ae   : > { %v2823_v39 = vpop.f32.mrf.mxu0  ;;  %v2192_v6 = vadd.f32 %v2104_v12, %v1318_v25  ;;  %v7178_v12 = vld [vmem:[#allocation11 + $0xa0] sm:$0xf]  ;;  %v8580_v25 = vld [vmem:[#allocation11 + $0x124] sm:$0xf0] }
 0x1af   : > { %v2849_v37 = vpop.f32.mrf.mxu2  ;;  %v2837_v19 = vpop.f32.mrf.mxu1 }
 0x1b0   : > { %v9785_v56 = vpop.f32.mrf.mxu3  ;;  %v2850_v52 = vadd.f32 %v2849_v37, %v2836_v58  ;;  %v2838_v27 = vadd.f32 %v2837_v19, %v2823_v39  ;;  %v3011_v37 = vld [vmem:[#allocation2 + $0x28] sm:$0x11]  ;;  %v2158_v58 = vadd.f32 %v9771_v11, %v2144_v45  ;;  %v7267_v11 = vor.u32 %v8586_v30, %v7266_v24  ;;  %v3045_v24 = vld [vmem:[#allocation2 + $0x18] sm:$0x44] }
 0x1b1   : > { %v8570_v19 = vld [vmem:[#allocation11 + $0xd4] sm:$0xf0]  ;;  %v3012_v17 = vsel %vm9812_vm13, 0, %v3011_v37  ;;  %v3046_v49 = vsel %vm9830_vm3, 0, %v3045_v24  ;;  %v8600_v30 = vld [vmem:[#allocation11 + $0x1c4] sm:$0xf0] }
 0x1b2   : > { %v7203_v13 = vor.u32 %v8570_v19, %v7202_v57  ;;  %v2864_v29 = vadd.f32 %v9785_v56, %v2850_v52  ;;  %3013 = vst [vmem:[#allocation2 + $0x28] sm:$0x11] %v3012_v17  ;;  %v7330_v56 = vld [vmem:[#allocation11 + $0x1d0] sm:$0xf]  ;;  %4041 = vmatpush.bf16.msrb.mxu2 %v7267_v11  ;;  %v7194_v52 = vld [vmem:[#allocation11 + $0xc0] sm:$0xf]  ;;  %v2172_v53 = vadd.f32 %v9775_v36, %v2158_v58 }
 0x1b3   : > { %v7195_v0 = vor.u32 %v8568_v26, %v7194_v52  ;;  %v3043_v19 = vsel %vm9830_vm3, 0, %v3042_v23  ;;  %v7258_v17 = vld [vmem:[#allocation11 + $0x140] sm:$0xf]  ;;  %v1374_v58 = vadd.f32 %v9746_v15, %v1360_v8  ;;  %3047 = vst [vmem:[#allocation2 + $0x18] sm:$0x44] %v3046_v49 }
 0x1b4   : > { %4027 = vmatpush.bf16.msrb.mxu1 %v7203_v13  ;;  %v2186_v63 = vadd.f32 %v9773_v32, %v2172_v53  ;;  %v7322_v13 = vld [vmem:[#allocation11 + $0x1c0] sm:$0xf]  ;;  %3044 = vst [vmem:[#allocation2 + $0x10] sm:$0x44] %v3043_v19  ;;  %v7259_v14 = vor.u32 %v8584_v7, %v7258_v17  ;;  %v3048_v52 = vld [vmem:[#allocation2 + $0x8] sm:$0x44] }
 0x1b5   : > { %v7323_v5 = vor.u32 %v8600_v30, %v7322_v13  ;;  %v1388_v26 = vadd.f32 %v9750_v1, %v1374_v58  ;;  %v8582_v8 = vld [vmem:[#allocation11 + $0x134] sm:$0xf0]  ;;  %v8548_v23 = vld [vmem:[#allocation11 + $0x24] sm:$0xf0]  ;;  %v7242_v17 = vld [vmem:[#allocation11 + $0x120] sm:$0xf] }
 0x1b6   : > { %v2191_v47 = vadd.f32 %v2186_v63, %v9736_v28  ;;  %4042 = vmatpush.bf16.msrb.mxu2 %v7259_v14  ;;  %v8598_v1 = vld [vmem:[#allocation11 + $0x1b4] sm:$0xf0]  ;;  %v8564_v19 = vld [vmem:[#allocation11 + $0xa4] sm:$0xf0]  ;;  %v7243_v58 = vor.u32 %v8580_v25, %v7242_v17  ;;  %v7156_v25 = vld [vmem:[#allocation11 + $0x78] sm:$0xf0] }
 0x1b7   : > { %v9789_v22 = vpop.f32.mrf.mxu2  ;;  %v1402_v35 = vadd.f32 %v9752_v55, %v1388_v26  ;;  %v7179_v49 = vor.u32 %v8564_v19, %v7178_v12  ;;  %v7306_v55 = vld [vmem:[#allocation11 + $0x1a0] sm:$0xf]  ;;  %v8546_v30 = vld [vmem:[#allocation11 + $0x14] sm:$0xf0]  ;;  %v8557_v19 = vld [vmem:[#allocation11 + $0x74] sm:$0xf] }
 0x1b8   : > { %v9787_v21 = vpop.f32.mrf.mxu3  ;;  %v2852_v4 = vadd.f32 %v9789_v22, %v2838_v27  ;;  %v8602_v22 = vld [vmem:[#allocation11 + $0x1d4] sm:$0xf0]  ;;  %4028 = vmatpush.bf16.msrb.mxu1 %v7195_v0  ;;  %v7290_v26 = vld [vmem:[#allocation11 + $0x180] sm:$0xf] }
 0x1b9   : > { %v7331_v59 = vor.u32 %v8602_v22, %v7330_v56  ;;  %v7122_v22 = vld [vmem:[#allocation11 + $0x30] sm:$0xf]  ;;  %v3130_v12 = vld [vmem:[#allocation2 + $0x28] sm:$0x77] }
 0x1ba   : > { %v2866_v57 = vadd.f32 %v9787_v21, %v2852_v4  ;;  %v7123_v31 = vor.u32 %v8550_v38, %v7122_v22  ;;  %v7298_v38 = vld [vmem:[#allocation11 + $0x190] sm:$0xf] }
 0x1bb   : > { %4055 = vmatpush.bf16.msrb.mxu3 %v7331_v59  ;;  %v8566_v59 = vld [vmem:[#allocation11 + $0xb4] sm:$0xf0] }
 0x1bc   : > { %4015 = vmatpush.bf16.msrb.mxu0 %v7123_v31 }
 0x1bf   : > { %4056 = vmatpush.bf16.msrb.mxu3 %v7323_v5 }
 0x1c6   : > { %v9794_v3 = vpop.f32.mrf.mxu0 }
 0x1c7   : > { %v9796_v48 = vpop.f32.mrf.mxu1  ;;  %v2878_v27 = vadd.f32 %v9794_v3, %v2864_v29  ;;  %v2160_v29 = vadd.f32 %v9779_v42, %v2146_v50  ;;  %v7314_v50 = vld [vmem:[#allocation11 + $0x1b0] sm:$0xf] }
 0x1c9   : > { %v2174_v15 = vadd.f32 %v9783_v33, %v2160_v29  ;;  %v8596_v29 = vld [vmem:[#allocation11 + $0x1a4] sm:$0xf0] }
 0x1ca   : > { %v7307_v14 = vor.u32 %v8596_v29, %v7306_v55 }
 0x1ce   : > { %v9804_v54 = vpop.f32.mrf.mxu0 }
 0x1cf   : > { %v9799_v2 = vpop.f32.mrf.mxu2  ;;  %v9810_v60 = vpop.f32.mrf.mxu1  ;;  %v2880_v37 = vadd.f32 %v9804_v54, %v2866_v57  ;;  %v2892_v54 = vadd.f32 %v9796_v48, %v2878_v27  ;;  %v3049_v57 = vsel %vm9830_vm3, 0, %v3048_v52  ;;  %v8576_v52 = vld [vmem:[#allocation11 + $0x104] sm:$0xf0] }
 0x1d0   : > { %v9801_v18 = vpop.f32.mrf.mxu3  ;;  %3050 = vst [vmem:[#allocation2 + $0x8] sm:$0x44] %v3049_v57  ;;  %v8592_v57 = vld [vmem:[#allocation11 + $0x184] sm:$0xf0] }
 0x1d1   : > { %v2920_v40 = vadd.f32 %v9801_v18, %v9799_v2  ;;  %v3017_v2 = vld [vmem:[#allocation2 + $0x10] sm:$0x11]  ;;  %v3020_v18 = vld [vmem:[#allocation2 + $0x18] sm:$0x11]  ;;  %v2894_v4 = vadd.f32 %v9810_v60, %v2880_v37  ;;  %v2980_v42 = vadd.f32 %v2892_v54, %v9759_v10  ;;  %v9870_v60 = vstv %s9845_s9  ;;  %v3023_v10 = vld [vmem:[#allocation2 + $0x8] sm:$0x11] }
 0x1d2   : > { %v3018_v3 = vsel %vm9812_vm13, 0, %v3017_v2  ;;  %v3021_v21 = vsel %vm9812_vm13, 0, %v3020_v18  ;;  %v3024_v27 = vsel %vm9812_vm13, 0, %v3023_v10  ;;  %v7226_v10 = vld [vmem:[#allocation11 + $0x100] sm:$0xf] }
 0x1d3   : > { %3019 = vst [vmem:[#allocation2 + $0x10] sm:$0x11] %v3018_v3  ;;  %v9872_v41 = vadd.f32 %v2894_v4, %v2192_v6  ;;  %v2990_v2 = vmul.f32 %v9870_v60, %v2980_v42  ;;  %vm2984_vm5 = vcmp.ge.f32.partialorder %v2980_v42, 0.0  ;;  %v7106_v4 = vld [vmem:[#allocation11 + $0x10] sm:$0xf] }
 0x1d4   : > { %3022 = vst [vmem:[#allocation2 + $0x18] sm:$0x11] %v3021_v21  ;;  %v7170_v6 = vld [vmem:[#allocation11 + $0x90] sm:$0xf]  ;;  %v7107_v5 = vor.u32 %v8546_v30, %v7106_v4 }
 0x1d5   : > { %3025 = vst [vmem:[#allocation2 + $0x8] sm:$0x11] %v3024_v27  ;;  %vm2986_vm6 = vcmp.ge.f32.partialorder %v9872_v41, 0.0  ;;  %v2994_v7 = vsel %vm2984_vm5, %v2980_v42, %v2990_v2  ;;  %v8578_v42 = vld [vmem:[#allocation11 + $0x114] sm:$0xf0]  ;;  %v7227_v27 = vor.u32 %v8576_v52, %v7226_v10 }
 0x1d6   : > { %v8571_v10 = vld [vmem:[#allocation11 + $0xe4] sm:$0xf]  ;;  %v7212_v52 = vld [vmem:[#allocation11 + $0xe8] sm:$0xf0] }
 0x1d7   : > { %v2907_v51 = vpop.f32.mrf.mxu2 }
 0x1d8   : > { %v2921_v44 = vpop.f32.mrf.mxu3 }
 0x1d9   : > { %v2922_v11 = vadd.f32 %v2921_v44, %v2907_v51  ;;  %v3008_v51 = vld [vmem:[#allocation2 + $0x20] sm:$0x11]  ;;  %v3033_v44 = vld [vmem:[#allocation2 + $0x20] sm:$0x44] }
 0x1da   : > { %v3009_v28 = vsel %vm9812_vm13, 0, %v3008_v51  ;;  %v3034_v33 = vsel %vm9830_vm3, 0, %v3033_v44  ;;  %v7098_v51 = vld [vmem:[#allocation11] sm:$0xf]  ;;  %v8544_v44 = vld [vmem:[#allocation11 + $0x4] sm:$0xf0]  ;;  %vm3128_vm13 = vmand %vm3126_vm11, %vm3127_vm10 }
 0x1db   : > { %3010 = vst [vmem:[#allocation2 + $0x20] sm:$0x11] %v3009_v28  ;;  %v8560_v28 = vld [vmem:[#allocation11 + $0x84] sm:$0xf0]  ;;  %vm9909_vm14 = vmor %vm3128_vm13, %vm9901_vm12 }
 0x1dc   : > { %3035 = vst [vmem:[#allocation2 + $0x20] sm:$0x44] %v3034_v33 }
 0x1e6   : > { %v2933_v45 = vpop.f32.mrf.mxu0 }
 0x1e7   : > { %v2934_v46 = vadd.f32 %v2933_v45, %v2920_v40  ;;  %v2947_v36 = vpop.f32.mrf.mxu1  ;;  %v7187_v40 = vor.u32 %v8566_v59, %v7186_v20  ;;  %v7250_v45 = vld [vmem:[#allocation11 + $0x130] sm:$0xf]  ;;  %v8594_v20 = vld [vmem:[#allocation11 + $0x194] sm:$0xf0] }
 0x1e8   : > { %v7251_v0 = vor.u32 %v8582_v8, %v7250_v45  ;;  %v7162_v45 = vld [vmem:[#allocation11 + $0x80] sm:$0xf]  ;;  %v7410_v8 = vld [vmem:[#allocation11 + $0x270] sm:$0xf] }
 0x1e9   : > { %v2948_v62 = vadd.f32 %v2947_v36, %v2934_v46  ;;  %4029 = vmatpush.bf16.msrb.mxu1 %v7187_v40  ;;  %v2188_v46 = vadd.f32 %v9781_v43, %v2174_v15  ;;  %v7315_v36 = vor.u32 %v8598_v1, %v7314_v50  ;;  %v7114_v43 = vld [vmem:[#allocation11 + $0x20] sm:$0xf]  ;;  %v2992_v15 = vmul.f32 %v9870_v60, %v9872_v41 }
 0x1ea   : > { %4043 = vmatpush.bf16.msrb.mxu2 %v7251_v0  ;;  %v7115_v54 = vor.u32 %v8548_v23, %v7114_v43  ;;  %v7099_v40 = vor.u32 %v8544_v44, %v7098_v51  ;;  %v7291_v1 = vor.u32 %v8592_v57, %v7290_v26  ;;  %v8638_v23 = vld [vmem:[#allocation11 + $0x2f4] sm:$0xf0]  ;;  %v3136_v51 = vld [vmem:[#allocation2 + $0x10] sm:$0x77]  ;;  %v7148_v44 = vld [vmem:[#allocation11 + $0x68] sm:$0xf0] }
 0x1eb   : > { %4057 = vmatpush.bf16.msrb.mxu3 %v7315_v36  ;;  %v7474_v36 = vld [vmem:[#allocation11 + $0x2f0] sm:$0xf] }
 0x1ec   : > { %4016 = vmatpush.bf16.msrb.mxu0 %v7115_v54  ;;  %v7475_v17 = vor.u32 %v8638_v23, %v7474_v36  ;;  %v7394_v26 = vld [vmem:[#allocation11 + $0x250] sm:$0xf] }
 0x1ed   : > { %v2961_v32 = vpop.f32.mrf.mxu2  ;;  %4030 = vmatpush.bf16.msrb.mxu1 %v7179_v49  ;;  %v7196_v49 = vld [vmem:[#allocation11 + $0xc8] sm:$0xf0] }
 0x1ee   : > { %v2975_v48 = vpop.f32.mrf.mxu3  ;;  %v2962_v56 = vadd.f32 %v2961_v32, %v2948_v62  ;;  %v2935_v61 = vpop.f32.mrf.mxu0  ;;  %v2193_v62 = vadd.f32 %v2188_v46, %v1402_v35  ;;  %4044 = vmatpush.bf16.msrb.mxu2 %v7243_v58  ;;  %v8622_v46 = vld [vmem:[#allocation11 + $0x274] sm:$0xf0]  ;;  %v7220_v58 = vld [vmem:[#allocation11 + $0xf8] sm:$0xf0] }
 0x1ef   : > { %v2936_v16 = vadd.f32 %v2935_v61, %v2922_v11  ;;  %v2949_v18 = vpop.f32.mrf.mxu1  ;;  %v8562_v11 = vld [vmem:[#allocation11 + $0x94] sm:$0xf0]  ;;  %4058 = vmatpush.bf16.msrb.mxu3 %v7307_v14  ;;  %v7411_v35 = vor.u32 %v8622_v46, %v7410_v8  ;;  %v8620_v14 = vld [vmem:[#allocation11 + $0x264] sm:$0xf0]  ;;  %v7215_v8 = vor.u32 %v8571_v10, %v7212_v52  ;;  %v7458_v46 = vld [vmem:[#allocation11 + $0x2d0] sm:$0xf] }
 0x1f0   : > { %v2976_v9 = vadd.f32 %v2975_v48, %v2962_v56  ;;  %v7171_v22 = vor.u32 %v8562_v11, %v7170_v6  ;;  %4017 = vmatpush.bf16.msrb.mxu0 %v7107_v5 }
 0x1f1   : > { %v2950_v39 = vadd.f32 %v2949_v18, %v2936_v16  ;;  %v7299_v16 = vor.u32 %v8594_v20, %v7298_v38 }
 0x1f2   : > { %v2981_v53 = vadd.f32 %v2976_v9, %v2191_v47  ;;  %v7234_v47 = vld [vmem:[#allocation11 + $0x110] sm:$0xf]  ;;  %4031 = vmatpush.bf16.msrb.mxu1 %v7171_v22  ;;  %v7466_v22 = vld [vmem:[#allocation11 + $0x2e0] sm:$0xf] }
 0x1f3   : > { %v7235_v9 = vor.u32 %v8578_v42, %v7234_v47  ;;  %4059 = vmatpush.bf16.msrb.mxu3 %v7299_v16  ;;  %v8636_v47 = vld [vmem:[#allocation11 + $0x2e4] sm:$0xf0]  ;;  %v8555_v16 = vld [vmem:[#allocation11 + $0x64] sm:$0xf] }
 0x1f4   : > { %vm2985_vm4 = vcmp.ge.f32.partialorder %v2981_v53, 0.0  ;;  %v2991_v37 = vmul.f32 %v9870_v60, %v2981_v53  ;;  %4018 = vmatpush.bf16.msrb.mxu0 %v7099_v40  ;;  %v7467_v38 = vor.u32 %v8636_v47, %v7466_v22 }
 0x1f5   : > { %v2963_v34 = vpop.f32.mrf.mxu2  ;;  %4045 = vmatpush.bf16.msrb.mxu2 %v7235_v9 }
 0x1f6   : > { %v2995_v3 = vsel %vm2985_vm4, %v2981_v53, %v2991_v37  ;;  %v2964_v21 = vadd.f32 %v2963_v34, %v2950_v39  ;;  %v2977_v63 = vpop.f32.mrf.mxu3  ;;  %v7163_v53 = vor.u32 %v8560_v28, %v7162_v45  ;;  %v7151_v28 = vor.u32 %v8555_v16, %v7148_v44 }
 0x1f7   : > { %v3055_v24 = vrot.slane %v2995_v3, 4  ;;  %4060 = vmatpush.bf16.msrb.mxu3 %v7291_v1  ;;  %v7140_v1 = vld [vmem:[#allocation11 + $0x58] sm:$0xf0] }
 0x1f8   : > { %v2978_v13 = vadd.f32 %v2977_v63, %v2964_v21  ;;  %4032 = vmatpush.bf16.msrb.mxu1 %v7163_v53  ;;  %4067 = vmatpush.bf16.msra.mxu0 %v7411_v35  ;;  %v8616_v35 = vld [vmem:[#allocation11 + $0x244] sm:$0xf0] }
 0x1f9   : > { %v3057_v32 = vsel %vm593_vm2, %v2994_v7, %v3055_v24  ;;  %v3058_v48 = vsel %vm593_vm2, %v3055_v24, %v2994_v7  ;;  %4046 = vmatpush.bf16.msrb.mxu2 %v7227_v27  ;;  %v7159_v7 = vor.u32 %v8557_v19, %v7156_v25 }
 0x1fa   : > { %v3059_v56 = vrot.slane %v3058_v48, 4  ;;  %3063 = vst [vmem:[#allocation1] ss:$2 sm:$0xff] %v3057_v32  ;;  %v2983_v61 = vadd.f32 %v2978_v13, %v2193_v62  ;;  %v3133_v62 = vld [vmem:[#allocation2] sm:$0x77] }
 0x1fb   : > { %v8573_v13 = vld [vmem:[#allocation11 + $0xf4] sm:$0xf]  ;;  %v7402_v48 = vld [vmem:[#allocation11 + $0x260] sm:$0xf] }
 0x1fc   : > { %3067 = vst [vmem:[#allocation1 + $0x10] ss:$2 sm:$0xff] %v3059_v56  ;;  %vm2987_vm9 = vcmp.ge.f32.partialorder %v2983_v61, 0.0  ;;  %v2993_v59 = vmul.f32 %v9870_v60, %v2983_v61  ;;  %v2996_v60 = vsel %vm2986_vm6, %v9872_v41, %v2992_v15  ;;  %4081 = vmatpush.bf16.msra.mxu1 %v7475_v17  ;;  %v7223_v32 = vor.u32 %v8573_v13, %v7220_v58  ;;  %v8632_v17 = vld [vmem:[#allocation11 + $0x2c4] sm:$0xf0] }
 0x1fd   : > { %4095 = vmatpush.bf16.msra.mxu2 %v7159_v7  ;;  %v7403_v11 = vor.u32 %v8620_v14, %v7402_v48  ;;  %v8551_v13 = vld [vmem:[#allocation11 + $0x44] sm:$0xf]  ;;  %v7132_v58 = vld [vmem:[#allocation11 + $0x48] sm:$0xf0] }
 0x1fe   : > { %v2997_v31 = vsel %vm2987_vm9, %v2983_v61, %v2993_v59  ;;  %4109 = vmatpush.bf16.msra.mxu3 %v7223_v32  ;;  %v7378_v32 = vld [vmem:[#allocation11 + $0x230] sm:$0xf] }
 0x1ff   : > { %v3056_v33 = vrot.slane %v2997_v31, 4  ;;  %4068 = vmatpush.bf16.msra.mxu0 %v7403_v11  ;;  %v8614_v11 = vld [vmem:[#allocation11 + $0x234] sm:$0xf0] }
 0x200   : > { %4082 = vmatpush.bf16.msra.mxu1 %v7467_v38  ;;  %v7379_v22 = vor.u32 %v8614_v11, %v7378_v32  ;;  %v8565_v38 = vld [vmem:[#allocation11 + $0xb4] sm:$0xf]  ;;  %v7354_v11 = vld [vmem:[#allocation11 + $0x200] sm:$0xf] }
 0x201   : > { %v3064_v2 = vld.sshfl [vmem:[#allocation1] sm:$0xff pattern:$0x75316420]  ;;  %v3065_v18 = vld.sshfl [vmem:[#allocation1 + $0x8] sm:$0xff pattern:$0x75316420]  ;;  %v3060_v0 = vsel %vm593_vm2, %v2996_v60, %v3056_v33  ;;  %v3061_v50 = vsel %vm593_vm2, %v3056_v33, %v2996_v60  ;;  %4096 = vmatpush.bf16.msra.mxu2 %v7151_v28 }
 0x202   : > { %v3086_v37 = vpack.c.bf16 %v3065_v18, %v3064_v2  ;;  %v3062_v39 = vrot.slane %v3061_v50, 4  ;;  %3071 = vst [vmem:[#allocation1 + $0x20] ss:$2 sm:$0xff] %v3060_v0  ;;  %v3139_v33 = vld [vmem:[#allocation2 + $0x18] sm:$0x77]  ;;  %4110 = vmatpush.bf16.msra.mxu3 %v7215_v8 }
 0x203   : > { %v3068_v34 = vld.sshfl [vmem:[#allocation1 + $0x10] sm:$0xff pattern:$0x75316420]  ;;  %v3069_v43 = vld.sshfl [vmem:[#allocation1 + $0x18] sm:$0xff pattern:$0x75316420] }
 0x204   : > { %v3091_v3 = vshrl.u32 %v3086_v37, 16  ;;  %3075 = vst [vmem:[#allocation1 + $0x30] ss:$2 sm:$0xff] %v3062_v39  ;;  %v3087_v21 = vpack.c.bf16 %v3069_v43, %v3068_v34  ;;  %v3094_v63 = vshll.u32 %v3086_v37, 16  ;;  %v8618_v60 = vld [vmem:[#allocation11 + $0x254] sm:$0xf0] }
 0x205   : > { %v8634_v2 = vld [vmem:[#allocation11 + $0x2d4] sm:$0xf0]  ;;  %v7395_v18 = vor.u32 %v8618_v60, %v7394_v26  ;;  %v8553_v50 = vld [vmem:[#allocation11 + $0x54] sm:$0xf]  ;;  %v7204_v34 = vld [vmem:[#allocation11 + $0xd8] sm:$0xf0] }
 0x206   : > { %v3093_v24 = vrot.slane %v3091_v3, 7  ;;  %v3098_v54 = vshrl.u32 %v3087_v21, 16  ;;  %v3101_v4 = vshll.u32 %v3087_v21, 16  ;;  %v7459_v0 = vor.u32 %v8634_v2, %v7458_v46  ;;  %v8569_v37 = vld [vmem:[#allocation11 + $0xd4] sm:$0xf] }
 0x207   : > { %v7143_v36 = vor.u32 %v8553_v50, %v7140_v1  ;;  %v7386_v43 = vld [vmem:[#allocation11 + $0x240] sm:$0xf]  ;;  %4069 = vmatpush.bf16.msra.mxu0 %v7395_v18  ;;  %v7207_v21 = vor.u32 %v8569_v37, %v7204_v34  ;;  %v8612_v60 = vld [vmem:[#allocation11 + $0x224] sm:$0xf0]  ;;  %v7116_v50 = vld [vmem:[#allocation11 + $0x28] sm:$0xf0] }
 0x208   : > { %v3096_v55 = vor.u32 %v3094_v63, %v3093_v24  ;;  %v3100_v29 = vrot.slane %v3098_v54, 7  ;;  %4083 = vmatpush.bf16.msra.mxu1 %v7459_v0  ;;  %v7387_v23 = vor.u32 %v8616_v35, %v7386_v43  ;;  %v7370_v28 = vld [vmem:[#allocation11 + $0x220] sm:$0xf]  ;;  %v8628_v46 = vld [vmem:[#allocation11 + $0x2a4] sm:$0xf0] }
 0x209   : > { %v3072_v30 = vld.sshfl [vmem:[#allocation1 + $0x20] sm:$0xff pattern:$0x75316420]  ;;  %v3073_v6 = vld.sshfl [vmem:[#allocation1 + $0x28] sm:$0xff pattern:$0x75316420]  ;;  %4097 = vmatpush.bf16.msra.mxu2 %v7143_v36  ;;  %4111 = vmatpush.bf16.msra.mxu3 %v7207_v21 }
 0x20a   : > { %v3088_v56 = vpack.c.bf16 %v3073_v6, %v3072_v30  ;;  %v3103_v61 = vor.u32 %v3101_v4, %v3100_v29  ;;  %v3131_v5 = vsel %vm9909_vm14, %v3096_v55, %v3130_v12  ;;  %v7450_v12 = vld [vmem:[#allocation11 + $0x2c0] sm:$0xf]  ;;  %v7135_v29 = vor.u32 %v8551_v13, %v7132_v58  ;;  %v8567_v4 = vld [vmem:[#allocation11 + $0xc4] sm:$0xf]  ;;  %v7362_v36 = vld [vmem:[#allocation11 + $0x210] sm:$0xf] }
 0x20b   : > { %v3076_v15 = vld.sshfl [vmem:[#allocation1 + $0x30] sm:$0xff pattern:$0x75316420]  ;;  %v3077_v42 = vld.sshfl [vmem:[#allocation1 + $0x38] sm:$0xff pattern:$0x75316420]  ;;  %v7451_v55 = vor.u32 %v8632_v17, %v7450_v12  ;;  %4070 = vmatpush.bf16.msra.mxu0 %v7387_v23 }
 0x20c   : > { %v3089_v20 = vpack.c.bf16 %v3077_v42, %v3076_v15  ;;  %v3105_v59 = vshrl.u32 %v3088_v56, 16  ;;  %3132 = vst [vmem:[#allocation2 + $0x28] sm:$0x77] %v3131_v5  ;;  %v3134_v9 = vsel %vm9909_vm14, %v3103_v61, %v3133_v62  ;;  %v3108_v40 = vshll.u32 %v3088_v56, 16  ;;  %v7442_v56 = vld [vmem:[#allocation11 + $0x2b0] sm:$0xf] }
 0x20d   : > { %3135 = vst [vmem:[#allocation2] sm:$0x77] %v3134_v9  ;;  %v8630_v61 = vld [vmem:[#allocation11 + $0x2b4] sm:$0xf0]  ;;  %4084 = vmatpush.bf16.msra.mxu1 %v7451_v55  ;;  %4098 = vmatpush.bf16.msra.mxu2 %v7135_v29  ;;  %v7199_v5 = vor.u32 %v8567_v4, %v7196_v49  ;;  %v8549_v15 = vld [vmem:[#allocation11 + $0x34] sm:$0xf] }
 0x20e   : > { %v3107_v31 = vrot.slane %v3105_v59, 7  ;;  %v3112_v45 = vshrl.u32 %v3089_v20, 16  ;;  %v3115_v57 = vshll.u32 %v3089_v20, 16  ;;  %v7443_v47 = vor.u32 %v8630_v61, %v7442_v56  ;;  %v7124_v42 = vld [vmem:[#allocation11 + $0x38] sm:$0xf0] }
 0x20f   : > { %4112 = vmatpush.bf16.msra.mxu3 %v7199_v5  ;;  %4071 = vmatpush.bf16.msra.mxu0 %v7379_v22  ;;  %v7434_v8 = vld [vmem:[#allocation11 + $0x2a0] sm:$0xf]  ;;  %v8547_v0 = vld [vmem:[#allocation11 + $0x24] sm:$0xf]  ;;  %v8610_v34 = vld [vmem:[#allocation11 + $0x214] sm:$0xf0] }
 0x210   : > { %v3110_v53 = vor.u32 %v3108_v40, %v3107_v31  ;;  %v3114_v27 = vrot.slane %v3112_v45, 7  ;;  %v7127_v40 = vor.u32 %v8549_v15, %v7124_v42  ;;  %v8563_v1 = vld [vmem:[#allocation11 + $0xa4] sm:$0xf]  ;;  %v7426_v23 = vld [vmem:[#allocation11 + $0x290] sm:$0xf]  ;;  %v7435_v17 = vor.u32 %v8628_v46, %v7434_v8 }
 0x211   : > { %4085 = vmatpush.bf16.msra.mxu1 %v7443_v47  ;;  %v8626_v12 = vld [vmem:[#allocation11 + $0x294] sm:$0xf0]  ;;  %v7172_v4 = vld [vmem:[#allocation11 + $0x98] sm:$0xf0]  ;;  %v8608_v56 = vld [vmem:[#allocation11 + $0x204] sm:$0xf0] }
 0x212   : > { %v3117_v39 = vor.u32 %v3115_v57, %v3114_v27  ;;  %v3137_v41 = vsel %vm9909_vm14, %v3110_v53, %v3136_v51  ;;  %v7188_v51 = vld [vmem:[#allocation11 + $0xb8] sm:$0xf0]  ;;  %4099 = vmatpush.bf16.msra.mxu2 %v7127_v40  ;;  %v7371_v57 = vor.u32 %v8612_v60, %v7370_v28  ;;  %v7418_v15 = vld [vmem:[#allocation11 + $0x280] sm:$0xf]  ;;  %v8624_v42 = vld [vmem:[#allocation11 + $0x284] sm:$0xf0] }
 0x213   : > { %3138 = vst [vmem:[#allocation2 + $0x10] sm:$0x77] %v3137_v41  ;;  %v9919_v3 = vld [vmem:[#allocation2 + $0x28] sm:$0x77]  ;;  %v7191_v45 = vor.u32 %v8565_v38, %v7188_v51  ;;  %v7180_v41 = vld [vmem:[#allocation11 + $0xa8] sm:$0xf0] }
 0x214   : > { %v3140_v19 = vsel %vm9909_vm14, %v3117_v39, %v3139_v33  ;;  %v9923_v24 = vld [vmem:[#allocation2] sm:$0x33]  ;;  %v3199_v54 = vunpack.c.l.b16 %v9919_v3  ;;  %v3200_v59 = vunpack.c.h.b16 %v9919_v3  ;;  %4072 = vmatpush.bf16.msra.mxu0 %v7371_v57  ;;  %v7183_v32 = vor.u32 %v8563_v1, %v7180_v41 }
 0x215   : > { %v3151_v63 = vld [vmem:[#allocation2] sm:$0x77]  ;;  %3141 = vst [vmem:[#allocation2 + $0x18] sm:$0x77] %v3140_v19  ;;  %v3172_v25 = vunpack.c.h.b16 %v9923_v24  ;;  %v3171_v20 = vunpack.c.l.b16 %v9923_v24  ;;  %4113 = vmatpush.bf16.msra.mxu3 %v7191_v45  ;;  %4086 = vmatpush.bf16.msra.mxu1 %v7435_v17  ;;  %v7419_v45 = vor.u32 %v8624_v42, %v7418_v15 }
 0x216   : > { %v3201_v62 = vunpack.c.l.b16 %v3151_v63  ;;  %v3202_v7 = vunpack.c.h.b16 %v3151_v63  ;;  %v9929_v14 = vpack.c.b16 %v3199_v54, %v3199_v54  ;;  %v9941_v35 = vpack.c.b16 %v3200_v59, %v3200_v59  ;;  %v8545_v19 = vld [vmem:[#allocation11 + $0x14] sm:$0xf]  ;;  %v8543_v59 = vld [vmem:[#allocation11 + $0x4] sm:$0xf]  ;;  %v7164_v28 = vld [vmem:[#allocation11 + $0x88] sm:$0xf0] }
 0x217   : > { %v9927_v48 = vpack.c.b16 %v3172_v25, %v3172_v25  ;;  %v3183_v43 = vpack.c.b16 %v3171_v20, %v3171_v20  ;;  %v7119_v25 = vor.u32 %v8547_v0, %v7116_v50  ;;  %v7355_v20 = vor.u32 %v8608_v56, %v7354_v11 }
 0x218   : > { %v3213_v30 = vpack.c.b16 %v3201_v62, %v3201_v62  ;;  %v3214_v6 = vpack.c.b16 %v3202_v7, %v3202_v7  ;;  %v3236_v53 = vshrl.u32 %v9929_v14, 16  ;;  %v7108_v62 = vld [vmem:[#allocation11 + $0x18] sm:$0xf0]  ;;  %v8561_v7 = vld [vmem:[#allocation11 + $0x94] sm:$0xf] }
 0x219   : > { %v3355_v26 = vrot.slane %v9927_v48, 6  ;;  %4100 = vmatpush.bf16.msra.mxu2 %v7119_v25  ;;  %v7111_v47 = vor.u32 %v8545_v19, %v7108_v62  ;;  %4114 = vmatpush.bf16.msra.mxu3 %v7183_v32  ;;  %v7175_v38 = vor.u32 %v8561_v7, %v7172_v4  ;;  %v3243_v19 = vshrl.u32 %v9941_v35, 16 }
 0x21a   : > { %v3252_v9 = vshll.u32 %v3213_v30, 16  ;;  %v3259_v16 = vshll.u32 %v3214_v6, 16  ;;  %v3250_v44 = vshrl.u32 %v3213_v30, 16  ;;  %v3257_v31 = vshrl.u32 %v3214_v6, 16  ;;  %v9933_v10 = vld [vmem:[#allocation2 + $0x10] sm:$0x77] }
 0x21b   : > { %v3203_v63 = vunpack.c.l.b16 %v9933_v10  ;;  %v7363_v30 = vor.u32 %v8610_v34, %v7362_v36  ;;  %v7427_v6 = vor.u32 %v8626_v12, %v7426_v23  ;;  %v3204_v61 = vunpack.c.h.b16 %v9933_v10  ;;  %v3143_v10 = vld [vmem:[#allocation2 + $0x20] sm:$0x33]  ;;  %v3146_v60 = vld [vmem:[#allocation2 + $0x10] sm:$0x33] }
 0x21c   : > { %v3254_v33 = vrot.slane %v3252_v9, 1  ;;  %v3261_v52 = vrot.slane %v3259_v16, 1  ;;  %v3153_v27 = vld [vmem:[#allocation2 + $0x18] sm:$0x77]  ;;  %v9952_v51 = vsel %vm585_vm0, %v3183_v43, %v3355_v26  ;;  %v3167_v57 = vunpack.c.l.b16 %v3143_v10 }
 0x21d   : > { %v3205_v2 = vunpack.c.l.b16 %v3153_v27  ;;  %v3206_v18 = vunpack.c.h.b16 %v3153_v27  ;;  %v9943_v24 = vld [vmem:[#allocation2 + $0x18] sm:$0x33]  ;;  %4073 = vmatpush.bf16.msra.mxu0 %v7363_v30  ;;  %v7100_v9 = vld [vmem:[#allocation11 + $0x8] sm:$0xf0]  ;;  %v3215_v40 = vpack.c.b16 %v3203_v63, %v3203_v63  ;;  %4087 = vmatpush.bf16.msra.mxu1 %v7427_v6  ;;  %v3168_v8 = vunpack.c.h.b16 %v3143_v10 }
 0x21e   : > { %v9937_v37 = vor.u32 %v3254_v33, %v3250_v44  ;;  %v9939_v39 = vor.u32 %v3261_v52, %v3257_v31  ;;  %v8559_v16 = vld [vmem:[#allocation11 + $0x84] sm:$0xf]  ;;  %v3175_v44 = vunpack.c.l.b16 %v9943_v24  ;;  %v3176_v31 = vunpack.c.h.b16 %v9943_v24  ;;  %v3144_v33 = vld [vmem:[#allocation2 + $0x28] sm:$0x33]  ;;  %4101 = vmatpush.bf16.msra.mxu2 %v7111_v47  ;;  %v3149_v27 = vld [vmem:[#allocation2 + $0x20] sm:$0x77]  ;;  %4115 = vmatpush.bf16.msra.mxu3 %v7175_v38 }
 0x21f   : > { %v3217_v3 = vpack.c.b16 %v3205_v2, %v3205_v2  ;;  %v3218_v21 = vpack.c.b16 %v3206_v18, %v3206_v18  ;;  %v7103_v52 = vor.u32 %v8543_v59, %v7100_v9  ;;  %v3169_v48 = vunpack.c.l.b16 %v3144_v33 }
 0x220   : > { %v3356_v54 = vrot.slane %v9937_v37, 4  ;;  %v3357_v29 = vrot.slane %v9939_v39, 2  ;;  %v3216_v46 = vpack.c.b16 %v3204_v61, %v3204_v61  ;;  %v3170_v18 = vunpack.c.h.b16 %v3144_v33 }
 0x221   : > { %v3278_v13 = vshrl.u32 %v3217_v3, 16  ;;  %v3280_v58 = vshll.u32 %v3217_v3, 16  ;;  %v3287_v55 = vshll.u32 %v3218_v21, 16  ;;  %v3285_v49 = vshrl.u32 %v3218_v21, 16  ;;  %4074 = vmatpush.bf16.msra.mxu0 %v7355_v20  ;;  %4088 = vmatpush.bf16.msra.mxu1 %v7419_v45 }
 0x222   : > { %v7167_v0 = vor.u32 %v8559_v16, %v7164_v28  ;;  %v3173_v50 = vunpack.c.l.b16 %v3146_v60  ;;  %v3174_v1 = vunpack.c.h.b16 %v3146_v60  ;;  %v3388_v37 = vsel %vm589_vm1, %v3356_v54, %v3357_v29  ;;  %4102 = vmatpush.bf16.msra.mxu2 %v7103_v52 }
 0x223   : > { %v3282_v5 = vrot.slane %v3280_v58, 1  ;;  %v3289_v22 = vrot.slane %v3287_v55, 1  ;;  %v3179_v39 = vpack.c.b16 %v3167_v57, %v3167_v57  ;;  %v3180_v41 = vpack.c.b16 %v3168_v8, %v3168_v8 }
 0x224   : > { %v3181_v36 = vpack.c.b16 %v3169_v48, %v3169_v48  ;;  %v3197_v34 = vunpack.c.l.b16 %v3149_v27  ;;  %v3182_v43 = vpack.c.b16 %v3170_v18, %v3170_v18  ;;  %v3186_v3 = vpack.c.b16 %v3174_v1, %v3174_v1  ;;  %4116 = vmatpush.bf16.msra.mxu3 %v7167_v0  ;;  %v9993_v18 = vld [vmem:[#allocation11 + $0x178] sm:$0xf0]  ;;  %v9995_v0 = vld [vmem:[#allocation11 + $0x1f4] sm:$0xf] }
 0x225   : > { %v9956_v26 = vor.u32 %v3282_v5, %v3278_v13  ;;  %v9958_v2 = vor.u32 %v3289_v22, %v3285_v49  ;;  %v3198_v21 = vunpack.c.h.b16 %v3149_v27  ;;  %v3238_v23 = vshll.u32 %v9929_v14, 16 }
 0x226   : > { %v3209_v12 = vpack.c.b16 %v3197_v34, %v3197_v34  ;;  %v3245_v63 = vshll.u32 %v9941_v35, 16  ;;  %v3264_v17 = vshrl.u32 %v3215_v40, 16  ;;  %v3266_v62 = vshll.u32 %v3215_v40, 16  ;;  %v3156_v34 = vld [vmem:[#allocation2 + $0x28] sm:$0x66] }
 0x227   : > { %v3210_v25 = vpack.c.b16 %v3198_v21, %v3198_v21  ;;  %v3240_v54 = vrot.slane %v3238_v23, 1  ;;  %v3271_v7 = vshrl.u32 %v3216_v46, 16  ;;  %v3273_v29 = vshll.u32 %v3216_v46, 16 }
 0x228   : > { %v3222_v13 = vshrl.u32 %v3209_v12, 16  ;;  %v3224_v58 = vshll.u32 %v3209_v12, 16  ;;  %v3247_v55 = vrot.slane %v3245_v63, 1  ;;  %v3268_v30 = vrot.slane %v3266_v62, 1  ;;  %v7412_v62 = vld [vmem:[#allocation11 + $0x278] sm:$0xf0] }
 0x229   : > { %v3229_v4 = vshrl.u32 %v3210_v25, 16  ;;  %v3231_v49 = vshll.u32 %v3210_v25, 16  ;;  %v3241_v32 = vor.u32 %v3240_v54, %v3236_v53  ;;  %v3275_v56 = vrot.slane %v3273_v29, 1 }
 0x22a   : > { %v3226_v6 = vrot.slane %v3224_v58, 1  ;;  %v3248_v11 = vor.u32 %v3247_v55, %v3243_v19  ;;  %v3347_v35 = vrot.slane %v3180_v41, 6  ;;  %v3269_v5 = vor.u32 %v3268_v30, %v3264_v17  ;;  %v8621_v19 = vld [vmem:[#allocation11 + $0x274] sm:$0xf]  ;;  %v8603_v30 = vld [vmem:[#allocation11 + $0x1e4] sm:$0xf] }
 0x22b   : > { %v3233_v61 = vrot.slane %v3231_v49, 1  ;;  %v3351_v22 = vrot.slane %v3182_v43, 6  ;;  %v3352_v47 = vrot.slane %v3241_v32, 4  ;;  %v3276_v42 = vor.u32 %v3275_v56, %v3271_v7  ;;  %v3157_v43 = vld [vmem:[#allocation2] sm:$0x66] }
 0x22c   : > { %v3227_v15 = vor.u32 %v3226_v6, %v3222_v13  ;;  %v3353_v38 = vrot.slane %v3248_v11, 2  ;;  %v3359_v20 = vrot.slane %v3186_v3, 6  ;;  %v3185_v59 = vpack.c.b16 %v3173_v50, %v3173_v50  ;;  %v3158_v3 = vld [vmem:[#allocation2 + $0x10] sm:$0x66]  ;;  %v8637_v7 = vld [vmem:[#allocation11 + $0x2f4] sm:$0xf] }
 0x22d   : > { %v3234_v9 = vor.u32 %v3233_v61, %v3229_v4  ;;  %v3360_v16 = vrot.slane %v3269_v5, 4  ;;  %v3375_v40 = vsel %vm585_vm0, %v3181_v36, %v3351_v22  ;;  %v3361_v53 = vrot.slane %v3276_v42, 2  ;;  %v7476_v13 = vld [vmem:[#allocation11 + $0x2f8] sm:$0xf0]  ;;  %v8587_v49 = vld [vmem:[#allocation11 + $0x164] sm:$0xf] }
 0x22e   : > { %v3348_v14 = vrot.slane %v3227_v15, 4  ;;  %v3378_v45 = vsel %vm589_vm1, %v3352_v47, %v3353_v38  ;;  %v9970_v28 = vsel %vm593_vm2, %v9952_v51, %v3388_v37  ;;  %v9975_v10 = vpack.c.b16 %v3176_v31, %v3176_v31  ;;  %v9987_v31 = vld [vmem:[#allocation11 + $0x174] sm:$0xf]  ;;  %v7276_v32 = vld [vmem:[#allocation11 + $0x168] sm:$0xf0] }
 0x22f   : > { %v3349_v33 = vrot.slane %v3234_v9, 2  ;;  %v3365_v52 = vsel %vm585_vm0, %v3179_v39, %v3347_v35  ;;  %v9979_v60 = vsel %vm593_vm2, %v3375_v40, %v3378_v45  ;;  %3508 = vst [vmem:[#allocation1 + $0x2] ss:$4 sm:$0xff] %v9970_v28  ;;  %v4180_v27 = vrot.slane %v9956_v26, 4  ;;  %v9997_v26 = vld [vmem:[#allocation11 + $0x1f8] sm:$0xf0] }
 0x230   : > { %v4181_v57 = vrot.slane %v9958_v2, 2  ;;  %v3395_v51 = vsel %vm585_vm0, %v3185_v59, %v3359_v20  ;;  %v3398_v8 = vsel %vm589_vm1, %v3360_v16, %v3361_v53  ;;  %3506 = vst [vmem:[#allocation1 + $0x1] ss:$4 sm:$0xff] %v9979_v60  ;;  %v3187_v50 = vpack.c.b16 %v3175_v44, %v3175_v44  ;;  %v3155_v37 = vld [vmem:[#allocation2 + $0x20] sm:$0x66] }
 0x231   : > { %v3368_v48 = vsel %vm589_vm1, %v3348_v14, %v3349_v33  ;;  %v9991_v46 = vsel %vm593_vm2, %v3395_v51, %v3398_v8  ;;  %v4179_v1 = vrot.slane %v9975_v10, 6  ;;  %v7287_v41 = vor.u32 %v9987_v31, %v9993_v18  ;;  %v7340_v6 = vld [vmem:[#allocation11 + $0x1e8] sm:$0xf0]  ;;  %v8619_v5 = vld [vmem:[#allocation11 + $0x264] sm:$0xf] }
 0x232   : > { %v3369_v2 = vsel %vm593_vm2, %v3365_v52, %v3368_v48  ;;  %3510 = vst [vmem:[#allocation1 + $0x3] ss:$4 sm:$0xff] %v9991_v46  ;;  %v4188_v39 = vsel %vm589_vm1, %v4180_v27, %v4181_v57  ;;  %v7351_v36 = vor.u32 %v9995_v0, %v9997_v26  ;;  %v3311_v21 = vunpack.c.l.b16 %v3155_v37  ;;  %v7404_v22 = vld [vmem:[#allocation11 + $0x268] sm:$0xf0]  ;;  %v8635_v47 = vld [vmem:[#allocation11 + $0x2e4] sm:$0xf] }
 0x233   : > { %3504 = vst [vmem:[#allocation1] ss:$4 sm:$0xff] %v3369_v2  ;;  %v3312_v23 = vunpack.c.h.b16 %v3155_v37  ;;  %v3313_v24 = vunpack.c.l.b16 %v3156_v34  ;;  %v3314_v12 = vunpack.c.h.b16 %v3156_v34  ;;  %v3315_v44 = vunpack.c.l.b16 %v3157_v43  ;;  %v7468_v15 = vld [vmem:[#allocation11 + $0x2e8] sm:$0xf0]  ;;  %v8585_v52 = vld [vmem:[#allocation11 + $0x154] sm:$0xf] }
 0x234   : > { %v3316_v63 = vunpack.c.h.b16 %v3157_v43  ;;  %v3317_v17 = vunpack.c.l.b16 %v3158_v3  ;;  %v3318_v25 = vunpack.c.h.b16 %v3158_v3  ;;  %v3323_v54 = vpack.c.b16 %v3311_v21, %v3311_v21  ;;  %v7268_v27 = vld [vmem:[#allocation11 + $0x158] sm:$0xf0]  ;;  %v8601_v18 = vld [vmem:[#allocation11 + $0x1d4] sm:$0xf]  ;;  %v8583_v43 = vld [vmem:[#allocation11 + $0x144] sm:$0xf] }
 0x235   : > { %v3324_v58 = vpack.c.b16 %v3312_v23, %v3312_v23  ;;  %v3325_v55 = vpack.c.b16 %v3313_v24, %v3313_v24  ;;  %v3326_v29 = vpack.c.b16 %v3314_v12, %v3314_v12  ;;  %v3327_v4 = vpack.c.b16 %v3315_v44, %v3315_v44  ;;  %v7332_v0 = vld [vmem:[#allocation11 + $0x1d8] sm:$0xf0]  ;;  %v7260_v3 = vld [vmem:[#allocation11 + $0x148] sm:$0xf0]  ;;  %v8599_v12 = vld [vmem:[#allocation11 + $0x1c4] sm:$0xf] }
 0x236   : > { %v3328_v11 = vpack.c.b16 %v3316_v63, %v3316_v63  ;;  %v3329_v56 = vpack.c.b16 %v3317_v17, %v3317_v17  ;;  %v3330_v35 = vpack.c.b16 %v3318_v25, %v3318_v25  ;;  %v3335_v61 = vrot.slane %v3323_v54, 1  ;;  %v7324_v44 = vld [vmem:[#allocation11 + $0x1c8] sm:$0xf0]  ;;  %v8615_v17 = vld [vmem:[#allocation11 + $0x244] sm:$0xf] }
 0x237   : > { %v3337_v42 = vrot.slane %v3325_v55, 1  ;;  %v3339_v38 = vrot.slane %v3327_v4, 1  ;;  %v7092_v20 = vrot.slane %v3324_v58, 7  ;;  %v7093_v59 = vrot.slane %v3326_v29, 7  ;;  %v7388_v25 = vld [vmem:[#allocation11 + $0x248] sm:$0xf0] }
 0x238   : > { %v7415_v40 = vor.u32 %v8621_v19, %v7412_v62  ;;  %v7479_v14 = vor.u32 %v8637_v7, %v7476_v13  ;;  %v4185_v53 = vsel %vm585_vm0, %v3187_v50, %v4179_v1  ;;  %v3341_v57 = vrot.slane %v3329_v56, 1  ;;  %v8617_v50 = vld [vmem:[#allocation11 + $0x254] sm:$0xf]  ;;  %v7396_v1 = vld [vmem:[#allocation11 + $0x258] sm:$0xf0] }
 0x239   : > { %v10022_v33 = vsel %vm593_vm2, %v4185_v53, %v4188_v39  ;;  %v7094_v51 = vrot.slane %v3328_v11, 7  ;;  %v7095_v8 = vrot.slane %v3330_v35, 7  ;;  %v7279_v31 = vor.u32 %v8587_v49, %v7276_v32  ;;  %v3154_v39 = vld [vmem:[#allocation2 + $0x8] sm:$0x77]  ;;  %v8631_v54 = vld [vmem:[#allocation11 + $0x2c4] sm:$0xf] }
 0x23a   : > { %v10010_v9 = vld.sshfl [vmem:[#allocation1] sm:$0xff pattern:$0x73625140]  ;;  %v10012_v16 = vld.sshfl [vmem:[#allocation1 + $0x8] sm:$0xff pattern:$0x73625140]  ;;  %v7343_v48 = vor.u32 %v8603_v30, %v7340_v6  ;;  %v3372_v26 = vsel %vm585_vm0, %v3335_v61, %v7092_v20  ;;  %v7471_v2 = vor.u32 %v8635_v47, %v7468_v15  ;;  %v10031_v37 = vsel %vm585_vm0, %v3337_v42, %v7093_v59 }
 0x23b   : > { %4019 = vmatmul.bf16.vlgmr.msrb.gmra.mxu0 %v10010_v9  ;;  %4033 = vmatmul.bf16.vlgmr.msrb.gmra.mxu1 %v10012_v16  ;;  %v10017_v45 = vld.sshfl [vmem:[#allocation1 + $0x10] sm:$0xff pattern:$0x73625140]  ;;  %v10019_v10 = vld.sshfl [vmem:[#allocation1 + $0x18] sm:$0xff pattern:$0x73625140]  ;;  %v10035_v34 = vsel %vm585_vm0, %v3339_v38, %v7094_v51  ;;  %v10038_v21 = vsel %vm585_vm0, %v3341_v57, %v7095_v8  ;;  %v7271_v23 = vor.u32 %v8585_v52, %v7268_v27  ;;  %v3207_v7 = vunpack.c.l.b16 %v3154_v39 }
 0x23c   : > { %4047 = vmatmul.bf16.vlgmr.msrb.gmra.mxu2 %v10017_v45  ;;  %4061 = vmatmul.bf16.vlgmr.msrb.gmra.mxu3 %v10019_v10  ;;  %4290 = vst [vmem:[#allocation1] ss:$4 sm:$0xff] %v9979_v60  ;;  %v7407_v60 = vor.u32 %v8619_v5, %v7404_v22  ;;  %v7335_v24 = vor.u32 %v8601_v18, %v7332_v0  ;;  %v7452_v62 = vld [vmem:[#allocation11 + $0x2c8] sm:$0xf0]  ;;  %v3208_v13 = vunpack.c.h.b16 %v3154_v39  ;;  %v8581_v29 = vld [vmem:[#allocation11 + $0x134] sm:$0xf] }
 0x23d   : > { %4292 = vst [vmem:[#allocation1 + $0x1] ss:$4 sm:$0xff] %v9970_v28  ;;  %4123 = vmatpush.bf16.msrb.mxu0 %v7287_v41  ;;  %4137 = vmatpush.bf16.msrb.mxu1 %v7351_v36  ;;  %v8633_v41 = vld [vmem:[#allocation11 + $0x2d4] sm:$0xf]  ;;  %v7460_v36 = vld [vmem:[#allocation11 + $0x2d8] sm:$0xf0]  ;;  %v7399_v19 = vor.u32 %v8617_v50, %v7396_v1  ;;  %v7263_v58 = vor.u32 %v8583_v43, %v7260_v3 }
 0x23e   : > { %4294 = vst [vmem:[#allocation1 + $0x2] ss:$4 sm:$0xff] %v9991_v46  ;;  %4151 = vmatpush.bf16.msrb.mxu2 %v7415_v40  ;;  %4165 = vmatpush.bf16.msrb.mxu3 %v7479_v14  ;;  %v7463_v63 = vor.u32 %v8633_v41, %v7460_v36  ;;  %v7327_v55 = vor.u32 %v8599_v12, %v7324_v44  ;;  %v7252_v4 = vld [vmem:[#allocation11 + $0x138] sm:$0xf0]  ;;  %v8597_v30 = vld [vmem:[#allocation11 + $0x1b4] sm:$0xf] }
 0x23f   : > { %4296 = vst [vmem:[#allocation1 + $0x3] ss:$4 sm:$0xff] %v10022_v33  ;;  %v7391_v49 = vor.u32 %v8615_v17, %v7388_v25  ;;  %v7455_v32 = vor.u32 %v8631_v54, %v7452_v62  ;;  %v7316_v6 = vld [vmem:[#allocation11 + $0x1b8] sm:$0xf0]  ;;  %v8613_v11 = vld [vmem:[#allocation11 + $0x234] sm:$0xf]  ;;  %v10043_v5 = vpack.c.b16 %v3207_v7, %v3207_v7  ;;  %v10045_v22 = vpack.c.b16 %v3208_v13, %v3208_v13 }
 0x240   : > { %3512 = vst [vmem:[#allocation1 + $0x20] ss:$4 sm:$0xff] %v3372_v26  ;;  %v7380_v56 = vld [vmem:[#allocation11 + $0x238] sm:$0xf0]  ;;  %v8629_v35 = vld [vmem:[#allocation11 + $0x2b4] sm:$0xf]  ;;  %v7255_v38 = vor.u32 %v8581_v29, %v7252_v4  ;;  %v7319_v20 = vor.u32 %v8597_v30, %v7316_v6 }
 0x241   : > { %4124 = vmatpush.bf16.msrb.mxu0 %v7279_v31  ;;  %4138 = vmatpush.bf16.msrb.mxu1 %v7343_v48  ;;  %3514 = vst [vmem:[#allocation1 + $0x21] ss:$4 sm:$0xff] %v10031_v37  ;;  %v7444_v61 = vld [vmem:[#allocation11 + $0x2b8] sm:$0xf0]  ;;  %v8579_v47 = vld [vmem:[#allocation11 + $0x124] sm:$0xf]  ;;  %v7383_v27 = vor.u32 %v8613_v11, %v7380_v56 }
 0x242   : > { %4152 = vmatpush.bf16.msrb.mxu2 %v7407_v60  ;;  %4166 = vmatpush.bf16.msrb.mxu3 %v7471_v2  ;;  %3516 = vst [vmem:[#allocation1 + $0x22] ss:$4 sm:$0xff] %v10035_v34  ;;  %v7244_v15 = vld [vmem:[#allocation11 + $0x128] sm:$0xf0]  ;;  %v8595_v42 = vld [vmem:[#allocation11 + $0x1a4] sm:$0xf]  ;;  %v7447_v57 = vor.u32 %v8629_v35, %v7444_v61 }
 0x243   : > { %3518 = vst [vmem:[#allocation1 + $0x23] ss:$4 sm:$0xff] %v10038_v21  ;;  %v7308_v59 = vld [vmem:[#allocation11 + $0x1a8] sm:$0xf0]  ;;  %v8611_v40 = vld [vmem:[#allocation11 + $0x224] sm:$0xf]  ;;  %v7247_v0 = vor.u32 %v8579_v47, %v7244_v15 }
 0x244   : > { %v7372_v14 = vld [vmem:[#allocation11 + $0x228] sm:$0xf0]  ;;  %v8627_v51 = vld [vmem:[#allocation11 + $0x2a4] sm:$0xf]  ;;  %v3294_v31 = vshll.u32 %v10043_v5, 16  ;;  %v3301_v48 = vshll.u32 %v10045_v22, 16  ;;  %v7311_v26 = vor.u32 %v8595_v42, %v7308_v59 }
 0x245   : > { %4125 = vmatpush.bf16.msrb.mxu0 %v7271_v23  ;;  %4139 = vmatpush.bf16.msrb.mxu1 %v7335_v24  ;;  %v7436_v8 = vld [vmem:[#allocation11 + $0x2a8] sm:$0xf0]  ;;  %v10059_v18 = vld [vmem:[#allocation2 + $0x8] sm:$0x33]  ;;  %v7236_v2 = vld [vmem:[#allocation11 + $0x118] sm:$0xf0]  ;;  %v7375_v50 = vor.u32 %v8611_v40, %v7372_v14 }
 0x246   : > { %4153 = vmatpush.bf16.msrb.mxu2 %v7399_v19  ;;  %4167 = vmatpush.bf16.msrb.mxu3 %v7463_v63  ;;  %v8577_v60 = vld [vmem:[#allocation11 + $0x114] sm:$0xf]  ;;  %v7439_v1 = vor.u32 %v8627_v51, %v7436_v8  ;;  %v7300_v39 = vld [vmem:[#allocation11 + $0x198] sm:$0xf0]  ;;  %v3292_v43 = vshrl.u32 %v10043_v5, 16  ;;  %v3296_v3 = vrot.slane %v3294_v31, 1  ;;  %v3178_v54 = vunpack.c.h.b16 %v10059_v18 }
 0x247   : > { %v8609_v41 = vld [vmem:[#allocation11 + $0x214] sm:$0xf]  ;;  %v3299_v23 = vshrl.u32 %v10045_v22, 16  ;;  %v3303_v24 = vrot.slane %v3301_v48, 1  ;;  %v8575_v12 = vld [vmem:[#allocation11 + $0x104] sm:$0xf]  ;;  %v7239_v44 = vor.u32 %v8577_v60, %v7236_v2  ;;  %v3177_v22 = vunpack.c.l.b16 %v10059_v18 }
 0x248   : > { %v8625_v36 = vld [vmem:[#allocation11 + $0x294] sm:$0xf]  ;;  %v7228_v63 = vld [vmem:[#allocation11 + $0x108] sm:$0xf0]  ;;  %v8591_v17 = vld [vmem:[#allocation11 + $0x184] sm:$0xf]  ;;  %v3190_v47 = vpack.c.b16 %v3178_v54, %v3178_v54 }
 0x249   : > { %4126 = vmatpush.bf16.msrb.mxu0 %v7263_v58  ;;  %4140 = vmatpush.bf16.msrb.mxu1 %v7327_v55  ;;  %v7292_v25 = vld [vmem:[#allocation11 + $0x188] sm:$0xf0]  ;;  %v8607_v13 = vld [vmem:[#allocation11 + $0x204] sm:$0xf]  ;;  %v7539_v4 = vld [vmem:[#allocation11 + $0x370] sm:$0xf]  ;;  %v7231_v11 = vor.u32 %v8575_v12, %v7228_v63  ;;  %v3189_v60 = vpack.c.b16 %v3177_v22, %v3177_v22 }
 0x24a   : > { %4154 = vmatpush.bf16.msrb.mxu2 %v7391_v49  ;;  %4168 = vmatpush.bf16.msrb.mxu3 %v7455_v32  ;;  %v10047_v53 = vld.sshfl [vmem:[#allocation1 + $0x20] sm:$0xff pattern:$0x73625140]  ;;  %v10049_v52 = vld.sshfl [vmem:[#allocation1 + $0x28] sm:$0xff pattern:$0x73625140]  ;;  %v7295_v56 = vor.u32 %v8591_v17, %v7292_v25 }
 0x24b   : > { %4075 = vmatmul.bf16.vlgmr.msra.gmra.mxu0 %v10047_v53  ;;  %4089 = vmatmul.bf16.vlgmr.msra.gmra.mxu1 %v10049_v52  ;;  %4298 = vst [vmem:[#allocation1 + $0x20] ss:$4 sm:$0xff] %v10031_v37  ;;  %v8593_v37 = vld [vmem:[#allocation11 + $0x194] sm:$0xf]  ;;  %v7356_v58 = vld [vmem:[#allocation11 + $0x208] sm:$0xf0] }
 0x24c   : > { %4300 = vst [vmem:[#allocation1 + $0x21] ss:$4 sm:$0xff] %v10035_v34  ;;  %4103 = vmatmul.bf16.vlgmr.msra.gmra.mxu2 %v10010_v9  ;;  %4117 = vmatmul.bf16.vlgmr.msra.gmra.mxu3 %v10012_v16  ;;  %v7364_v9 = vld [vmem:[#allocation11 + $0x218] sm:$0xf0]  ;;  %v7303_v19 = vor.u32 %v8593_v37, %v7300_v39  ;;  %v8623_v55 = vld [vmem:[#allocation11 + $0x284] sm:$0xf]  ;;  %v7359_v15 = vor.u32 %v8607_v13, %v7356_v58 }
 0x24d   : > { %4302 = vst [vmem:[#allocation1 + $0x22] ss:$4 sm:$0xff] %v10038_v21  ;;  %4127 = vmatpush.bf16.msrb.mxu0 %v7255_v38  ;;  %4141 = vmatpush.bf16.msrb.mxu1 %v7319_v20  ;;  %v7428_v16 = vld [vmem:[#allocation11 + $0x298] sm:$0xf0]  ;;  %v7367_v62 = vor.u32 %v8609_v41, %v7364_v9  ;;  %v7420_v29 = vld [vmem:[#allocation11 + $0x288] sm:$0xf0]  ;;  %v3297_v38 = vor.u32 %v3296_v3, %v3292_v43 }
 0x24e   : > { %4155 = vmatpush.bf16.msrb.mxu2 %v7383_v27  ;;  %4169 = vmatpush.bf16.msrb.mxu3 %v7447_v57  ;;  %v7431_v7 = vor.u32 %v8625_v36, %v7428_v16  ;;  %v8654_v49 = vld [vmem:[#allocation11 + $0x374] sm:$0xf0]  ;;  %v7603_v32 = vld [vmem:[#allocation11 + $0x3f0] sm:$0xf]  ;;  %v7423_v42 = vor.u32 %v8623_v55, %v7420_v29  ;;  %v3304_v20 = vor.u32 %v3303_v24, %v3299_v23  ;;  %v7531_v14 = vld [vmem:[#allocation11 + $0x360] sm:$0xf] }
 0x24f   : > { %v8670_v30 = vld [vmem:[#allocation11 + $0x3f4] sm:$0xf0]  ;;  %v7667_v6 = vld [vmem:[#allocation11 + $0x470] sm:$0xf]  ;;  %v7540_v59 = vor.u32 %v8654_v49, %v7539_v4  ;;  %v8652_v27 = vld [vmem:[#allocation11 + $0x364] sm:$0xf0] }
 0x250   : > { %v8686_v35 = vld [vmem:[#allocation11 + $0x474] sm:$0xf0]  ;;  %v7731_v61 = vld [vmem:[#allocation11 + $0x4f0] sm:$0xf]  ;;  %v7604_v40 = vor.u32 %v8670_v30, %v7603_v32  ;;  %v7595_v8 = vld [vmem:[#allocation11 + $0x3e0] sm:$0xf]  ;;  %v7532_v37 = vor.u32 %v8652_v27, %v7531_v14 }
 0x251   : > { %4128 = vmatpush.bf16.msrb.mxu0 %v7247_v0  ;;  %4142 = vmatpush.bf16.msrb.mxu1 %v7311_v26  ;;  %v8702_v5 = vld [vmem:[#allocation11 + $0x4f4] sm:$0xf0]  ;;  %v7668_v57 = vor.u32 %v8686_v35, %v7667_v6  ;;  %v8668_v31 = vld [vmem:[#allocation11 + $0x3e4] sm:$0xf0]  ;;  %v7659_v48 = vld [vmem:[#allocation11 + $0x460] sm:$0xf] }
 0x252   : > { %4156 = vmatpush.bf16.msrb.mxu2 %v7375_v50  ;;  %4170 = vmatpush.bf16.msrb.mxu3 %v7439_v1  ;;  %v7732_v51 = vor.u32 %v8702_v5, %v7731_v61  ;;  %v8684_v0 = vld [vmem:[#allocation11 + $0x464] sm:$0xf0]  ;;  %v7723_v18 = vld [vmem:[#allocation11 + $0x4e0] sm:$0xf]  ;;  %v4969_v2 = vrot.slane %v3190_v47, 6  ;;  %v4970_v50 = vrot.slane %v3297_v38, 4  ;;  %v7596_v39 = vor.u32 %v8668_v31, %v7595_v8 }
 0x253   : > { %v8700_v26 = vld [vmem:[#allocation11 + $0x4e4] sm:$0xf0]  ;;  %v4971_v1 = vrot.slane %v3304_v20, 2  ;;  %v7523_v41 = vld [vmem:[#allocation11 + $0x350] sm:$0xf]  ;;  %v7660_v36 = vor.u32 %v8684_v0, %v7659_v48 }
 0x254   : > { %v8650_v9 = vld [vmem:[#allocation11 + $0x354] sm:$0xf0]  ;;  %v7724_v16 = vor.u32 %v8700_v26, %v7723_v18  ;;  %v7587_v43 = vld [vmem:[#allocation11 + $0x3d0] sm:$0xf]  ;;  %v7515_v63 = vld [vmem:[#allocation11 + $0x340] sm:$0xf] }
 0x255   : > { %4129 = vmatpush.bf16.msrb.mxu0 %v7239_v44  ;;  %4143 = vmatpush.bf16.msrb.mxu1 %v7303_v19  ;;  %v8666_v3 = vld [vmem:[#allocation11 + $0x3d4] sm:$0xf0]  ;;  %v7651_v23 = vld [vmem:[#allocation11 + $0x450] sm:$0xf]  ;;  %v4975_v19 = vsel %vm585_vm0, %v3189_v60, %v4969_v2  ;;  %v8648_v17 = vld [vmem:[#allocation11 + $0x344] sm:$0xf0] }
 0x256   : > { %4157 = vmatpush.bf16.msrb.mxu2 %v7367_v62  ;;  %4171 = vmatpush.bf16.msrb.mxu3 %v7431_v7  ;;  %v8682_v24 = vld [vmem:[#allocation11 + $0x454] sm:$0xf0]  ;;  %v7715_v12 = vld [vmem:[#allocation11 + $0x4d0] sm:$0xf]  ;;  %v7579_v25 = vld [vmem:[#allocation11 + $0x3c0] sm:$0xf]  ;;  %v4978_v62 = vsel %vm589_vm1, %v4970_v50, %v4971_v1  ;;  %v7588_v7 = vor.u32 %v8666_v3, %v7587_v43 }
 0x257   : > { %v8698_v44 = vld [vmem:[#allocation11 + $0x4d4] sm:$0xf0]  ;;  %v8664_v54 = vld [vmem:[#allocation11 + $0x3c4] sm:$0xf0]  ;;  %v7707_v58 = vld [vmem:[#allocation11 + $0x4c0] sm:$0xf]  ;;  %v7652_v29 = vor.u32 %v8682_v24, %v7651_v23  ;;  %v4979_v30 = vsel %vm593_vm2, %v4975_v19, %v4978_v62 }
 0x258   : > { %v8680_v13 = vld [vmem:[#allocation11 + $0x444] sm:$0xf0]  ;;  %v10076_v49 = vld.sshfl [vmem:[#allocation1 + $0x10] sm:$0xff pattern:$0x73625140]  ;;  %v7580_v35 = vor.u32 %v8664_v54, %v7579_v25 }
 0x259   : > { %4130 = vmatpush.bf16.msrb.mxu0 %v7231_v11  ;;  %4144 = vmatpush.bf16.msrb.mxu1 %v7295_v56  ;;  %v8696_v55 = vld [vmem:[#allocation11 + $0x4c4] sm:$0xf0]  ;;  %v10078_v32 = vld.sshfl [vmem:[#allocation1 + $0x18] sm:$0xff pattern:$0x73625140]  ;;  %v7516_v56 = vor.u32 %v8648_v17, %v7515_v63 }
 0x25a   : > { %4158 = vmatpush.bf16.msrb.mxu2 %v7359_v15  ;;  %4172 = vmatpush.bf16.msrb.mxu3 %v7423_v42  ;;  %v10072_v4 = vld.sshfl [vmem:[#allocation1] sm:$0xff pattern:$0x73625140]  ;;  %v7507_v6 = vld [vmem:[#allocation11 + $0x330] sm:$0xf]  ;;  %v7708_v47 = vor.u32 %v8696_v55, %v7707_v58 }
 0x25b   : > { %v8646_v11 = vld [vmem:[#allocation11 + $0x334] sm:$0xf0]  ;;  %v7571_v61 = vld [vmem:[#allocation11 + $0x3b0] sm:$0xf]  ;;  %v8644_v14 = vld [vmem:[#allocation11 + $0x324] sm:$0xf0] }
 0x25c   : > { %4131 = vmatmul.bf16.vlgmr.msrb.gmra.mxu0 %v10017_v45  ;;  %4145 = vmatmul.bf16.vlgmr.msrb.gmra.mxu1 %v10019_v10  ;;  %v7524_v45 = vor.u32 %v8650_v9, %v7523_v41  ;;  %v7643_v10 = vld [vmem:[#allocation11 + $0x440] sm:$0xf]  ;;  %v8662_v5 = vld [vmem:[#allocation11 + $0x3b4] sm:$0xf0]  ;;  %v7635_v15 = vld [vmem:[#allocation11 + $0x430] sm:$0xf] }
 0x25d   : > { %4797 = vmatpush.bf16.msra.mxu0 %v7540_v59  ;;  %4811 = vmatpush.bf16.msra.mxu1 %v7604_v40  ;;  %v7644_v22 = vor.u32 %v8680_v13, %v7643_v10  ;;  %v8678_v42 = vld [vmem:[#allocation11 + $0x434] sm:$0xf0]  ;;  %v7699_v38 = vld [vmem:[#allocation11 + $0x4b0] sm:$0xf]  ;;  %v7572_v59 = vor.u32 %v8662_v5, %v7571_v61  ;;  %v7499_v40 = vld [vmem:[#allocation11 + $0x320] sm:$0xf] }
 0x25e   : > { %4825 = vmatpush.bf16.msra.mxu2 %v7668_v57  ;;  %4839 = vmatpush.bf16.msra.mxu3 %v7732_v51  ;;  %v8694_v20 = vld [vmem:[#allocation11 + $0x4b4] sm:$0xf0]  ;;  %v7563_v57 = vld [vmem:[#allocation11 + $0x3a0] sm:$0xf]  ;;  %v8660_v51 = vld [vmem:[#allocation11 + $0x3a4] sm:$0xf0] }
 0x25f   : > { %4159 = vmatmul.bf16.vlgmr.msrb.gmra.mxu2 %v10047_v53  ;;  %4173 = vmatmul.bf16.vlgmr.msrb.gmra.mxu3 %v10049_v52  ;;  %v7716_v53 = vor.u32 %v8698_v44, %v7715_v12  ;;  %v10074_v52 = vld.sshfl [vmem:[#allocation1 + $0x8] sm:$0xff pattern:$0x73625140]  ;;  %v7700_v27 = vor.u32 %v8694_v20, %v7699_v38  ;;  %v7627_v8 = vld [vmem:[#allocation11 + $0x420] sm:$0xf]  ;;  %v7564_v18 = vor.u32 %v8660_v51, %v7563_v57 }
 0x260   : > { %5080 = vst [vmem:[#allocation1] ss:$4 sm:$0xff] %v9970_v28  ;;  %v7508_v28 = vor.u32 %v8646_v11, %v7507_v6  ;;  %v8676_v31 = vld [vmem:[#allocation11 + $0x424] sm:$0xf0]  ;;  %v7691_v48 = vld [vmem:[#allocation11 + $0x4a0] sm:$0xf] }
 0x261   : > { %4798 = vmatpush.bf16.msra.mxu0 %v7532_v37  ;;  %4812 = vmatpush.bf16.msra.mxu1 %v7596_v39  ;;  %5082 = vst [vmem:[#allocation1 + $0x1] ss:$4 sm:$0xff] %v9991_v46  ;;  %v7636_v46 = vor.u32 %v8678_v42, %v7635_v15  ;;  %v8692_v0 = vld [vmem:[#allocation11 + $0x4a4] sm:$0xf0]  ;;  %v7491_v26 = vld [vmem:[#allocation11 + $0x310] sm:$0xf]  ;;  %v7628_v2 = vor.u32 %v8676_v31, %v7627_v8 }
 0x262   : > { %4826 = vmatpush.bf16.msra.mxu2 %v7660_v36  ;;  %4840 = vmatpush.bf16.msra.mxu3 %v7724_v16  ;;  %5084 = vst [vmem:[#allocation1 + $0x2] ss:$4 sm:$0xff] %v10022_v33  ;;  %v7500_v33 = vor.u32 %v8644_v14, %v7499_v40  ;;  %v8642_v60 = vld [vmem:[#allocation11 + $0x314] sm:$0xf0]  ;;  %v7692_v50 = vor.u32 %v8692_v0, %v7691_v48  ;;  %v7555_v1 = vld [vmem:[#allocation11 + $0x390] sm:$0xf] }
 0x263   : > { %5086 = vst [vmem:[#allocation1 + $0x3] ss:$4 sm:$0xff] %v4979_v30  ;;  %v8658_v37 = vld [vmem:[#allocation11 + $0x394] sm:$0xf0]  ;;  %v7619_v39 = vld [vmem:[#allocation11 + $0x410] sm:$0xf]  ;;  %v7492_v43 = vor.u32 %v8642_v60, %v7491_v26 }
 0x264   : > { %v8674_v41 = vld [vmem:[#allocation11 + $0x414] sm:$0xf0]  ;;  %v7683_v9 = vld [vmem:[#allocation11 + $0x490] sm:$0xf]  ;;  %v7483_v16 = vld [vmem:[#allocation11 + $0x300] sm:$0xf]  ;;  %v7556_v3 = vor.u32 %v8658_v37, %v7555_v1 }
 0x265   : > { %4799 = vmatpush.bf16.msra.mxu0 %v7524_v45  ;;  %4813 = vmatpush.bf16.msra.mxu1 %v7588_v7  ;;  %v8690_v36 = vld [vmem:[#allocation11 + $0x494] sm:$0xf0]  ;;  %v8640_v23 = vld [vmem:[#allocation11 + $0x304] sm:$0xf0]  ;;  %v7547_v24 = vld [vmem:[#allocation11 + $0x380] sm:$0xf]  ;;  %v7620_v44 = vor.u32 %v8674_v41, %v7619_v39 }
 0x266   : > { %4827 = vmatpush.bf16.msra.mxu2 %v7652_v29  ;;  %4841 = vmatpush.bf16.msra.mxu3 %v7716_v53  ;;  %v8656_v12 = vld [vmem:[#allocation11 + $0x384] sm:$0xf0]  ;;  %v7684_v19 = vor.u32 %v8690_v36, %v7683_v9  ;;  %v7611_v63 = vld [vmem:[#allocation11 + $0x400] sm:$0xf]  ;;  %v7795_v62 = vld [vmem:[#allocation11 + $0x570] sm:$0xf]  ;;  %v7484_v58 = vor.u32 %v8640_v23, %v7483_v16 }
 0x267   : > { %v8672_v17 = vld [vmem:[#allocation11 + $0x404] sm:$0xf0]  ;;  %v7675_v25 = vld [vmem:[#allocation11 + $0x480] sm:$0xf]  ;;  %v8718_v45 = vld [vmem:[#allocation11 + $0x574] sm:$0xf0]  ;;  %v7548_v55 = vor.u32 %v8656_v12, %v7547_v24 }
 0x268   : > { %v8688_v54 = vld [vmem:[#allocation11 + $0x484] sm:$0xf0]  ;;  %v7859_v7 = vld [vmem:[#allocation11 + $0x5f0] sm:$0xf]  ;;  %v8734_v10 = vld [vmem:[#allocation11 + $0x5f4] sm:$0xf0]  ;;  %v7612_v6 = vor.u32 %v8672_v17, %v7611_v63 }
 0x269   : > { %4800 = vmatpush.bf16.msra.mxu0 %v7516_v56  ;;  %4814 = vmatpush.bf16.msra.mxu1 %v7580_v35  ;;  %v8653_v13 = vld [vmem:[#allocation11 + $0x374] sm:$0xf]  ;;  %v7541_v29 = vld [vmem:[#allocation11 + $0x378] sm:$0xf0]  ;;  %v7676_v11 = vor.u32 %v8688_v54, %v7675_v25  ;;  %v3159_v56 = vld [vmem:[#allocation2 + $0x18] sm:$0x66]  ;;  %v7796_v35 = vor.u32 %v8718_v45, %v7795_v62  ;;  %v7860_v61 = vor.u32 %v8734_v10, %v7859_v7 }
 0x26a   : > { %4828 = vmatpush.bf16.msra.mxu2 %v7644_v22  ;;  %4842 = vmatpush.bf16.msra.mxu3 %v7708_v47  ;;  %v8669_v53 = vld [vmem:[#allocation11 + $0x3f4] sm:$0xf]  ;;  %v7605_v30 = vld [vmem:[#allocation11 + $0x3f8] sm:$0xf0]  ;;  %v7787_v5 = vld [vmem:[#allocation11 + $0x560] sm:$0xf]  ;;  %v3319_v47 = vunpack.c.l.b16 %v3159_v56  ;;  %v3320_v15 = vunpack.c.h.b16 %v3159_v56  ;;  %v7544_v42 = vor.u32 %v8653_v13, %v7541_v29 }
 0x26b   : > { %v8716_v22 = vld [vmem:[#allocation11 + $0x564] sm:$0xf0]  ;;  %v7608_v38 = vor.u32 %v8669_v53, %v7605_v30  ;;  %v7851_v20 = vld [vmem:[#allocation11 + $0x5e0] sm:$0xf]  ;;  %v7533_v40 = vld [vmem:[#allocation11 + $0x368] sm:$0xf0] }
 0x26c   : > { %v8667_v14 = vld [vmem:[#allocation11 + $0x3e4] sm:$0xf]  ;;  %v7779_v57 = vld [vmem:[#allocation11 + $0x550] sm:$0xf]  ;;  %v3332_v51 = vpack.c.b16 %v3320_v15, %v3320_v15  ;;  %v3160_v8 = vld [vmem:[#allocation2 + $0x8] sm:$0x66]  ;;  %v7788_v31 = vor.u32 %v8716_v22, %v7787_v5 }
 0x26d   : > { %4801 = vmatpush.bf16.msra.mxu0 %v7508_v28  ;;  %4815 = vmatpush.bf16.msra.mxu1 %v7572_v59  ;;  %v8732_v28 = vld [vmem:[#allocation11 + $0x5e4] sm:$0xf0]  ;;  %v8651_v59 = vld [vmem:[#allocation11 + $0x364] sm:$0xf]  ;;  %v8714_v0 = vld [vmem:[#allocation11 + $0x554] sm:$0xf0]  ;;  %v3321_v9 = vunpack.c.l.b16 %v3160_v8  ;;  %v3322_v36 = vunpack.c.h.b16 %v3160_v8 }
 0x26e   : > { %4829 = vmatpush.bf16.msra.mxu2 %v7636_v46  ;;  %4843 = vmatpush.bf16.msra.mxu3 %v7700_v27  ;;  %v7597_v46 = vld [vmem:[#allocation11 + $0x3e8] sm:$0xf0]  ;;  %v3331_v27 = vpack.c.b16 %v3319_v47, %v3319_v47  ;;  %v7852_v48 = vor.u32 %v8732_v28, %v7851_v20  ;;  %v7536_v26 = vor.u32 %v8651_v59, %v7533_v40  ;;  %v7480_v1 = vrot.slane %v3332_v51, 7  ;;  %v7525_v37 = vld [vmem:[#allocation11 + $0x358] sm:$0xf0] }
 0x26f   : > { %v7600_v60 = vor.u32 %v8667_v14, %v7597_v46  ;;  %v8665_v39 = vld [vmem:[#allocation11 + $0x3d4] sm:$0xf]  ;;  %v7589_v41 = vld [vmem:[#allocation11 + $0x3d8] sm:$0xf0]  ;;  %v7771_v23 = vld [vmem:[#allocation11 + $0x540] sm:$0xf]  ;;  %v3333_v45 = vpack.c.b16 %v3321_v9, %v3321_v9  ;;  %v3334_v7 = vpack.c.b16 %v3322_v36, %v3322_v36 }
 0x270   : > { %v8712_v24 = vld [vmem:[#allocation11 + $0x544] sm:$0xf0]  ;;  %v8647_v17 = vld [vmem:[#allocation11 + $0x344] sm:$0xf]  ;;  %v7517_v25 = vld [vmem:[#allocation11 + $0x348] sm:$0xf0] }
 0x271   : > { %4802 = vmatpush.bf16.msra.mxu0 %v7500_v33  ;;  %4816 = vmatpush.bf16.msra.mxu1 %v7564_v18  ;;  %v7843_v33 = vld [vmem:[#allocation11 + $0x5d0] sm:$0xf]  ;;  %v3343_v18 = vrot.slane %v3331_v27, 1  ;;  %v8728_v63 = vld [vmem:[#allocation11 + $0x5c4] sm:$0xf0]  ;;  %v7772_v10 = vor.u32 %v8712_v24, %v7771_v23  ;;  %v7520_v53 = vor.u32 %v8647_v17, %v7517_v25  ;;  %v3345_v5 = vrot.slane %v3333_v45, 1 }
 0x272   : > { %4830 = vmatpush.bf16.msra.mxu2 %v7628_v2  ;;  %4844 = vmatpush.bf16.msra.mxu3 %v7692_v50  ;;  %v8730_v2 = vld [vmem:[#allocation11 + $0x5d4] sm:$0xf0]  ;;  %v8649_v50 = vld [vmem:[#allocation11 + $0x354] sm:$0xf]  ;;  %v8663_v54 = vld [vmem:[#allocation11 + $0x3c4] sm:$0xf] }
 0x273   : > { %v4192_v16 = vsel %vm585_vm0, %v3343_v18, %v7480_v1  ;;  %v7528_v12 = vor.u32 %v8649_v50, %v7525_v37  ;;  %v7581_v62 = vld [vmem:[#allocation11 + $0x3c8] sm:$0xf0]  ;;  %v7827_v29 = vld [vmem:[#allocation11 + $0x5b0] sm:$0xf]  ;;  %v7509_v56 = vld [vmem:[#allocation11 + $0x338] sm:$0xf0] }
 0x274   : > { %4304 = vst [vmem:[#allocation1 + $0x23] ss:$4 sm:$0xff] %v4192_v16  ;;  %v7584_v30 = vor.u32 %v8663_v54, %v7581_v62  ;;  %v7865_v22 = vrot.slane %v3334_v7, 7  ;;  %v7755_v47 = vld [vmem:[#allocation11 + $0x520] sm:$0xf] }
 0x275   : > { %4803 = vmatpush.bf16.msra.mxu0 %v7492_v43  ;;  %4817 = vmatpush.bf16.msra.mxu1 %v7556_v3  ;;  %v7780_v43 = vor.u32 %v8714_v0, %v7779_v57  ;;  %v7844_v3 = vor.u32 %v8730_v2, %v7843_v33  ;;  %v8708_v15 = vld [vmem:[#allocation11 + $0x524] sm:$0xf0]  ;;  %v7819_v59 = vld [vmem:[#allocation11 + $0x5a0] sm:$0xf]  ;;  %v8643_v27 = vld [vmem:[#allocation11 + $0x324] sm:$0xf] }
 0x276   : > { %4831 = vmatpush.bf16.msra.mxu2 %v7620_v44  ;;  %4845 = vmatpush.bf16.msra.mxu3 %v7684_v19  ;;  %v7592_v44 = vor.u32 %v8665_v39, %v7589_v41  ;;  %v7835_v19 = vld [vmem:[#allocation11 + $0x5c0] sm:$0xf]  ;;  %v8724_v40 = vld [vmem:[#allocation11 + $0x5a4] sm:$0xf0]  ;;  %v7501_v57 = vld [vmem:[#allocation11 + $0x328] sm:$0xf0] }
 0x277   : > { %v7836_v13 = vor.u32 %v8728_v63, %v7835_v19  ;;  %v8659_v51 = vld [vmem:[#allocation11 + $0x3a4] sm:$0xf]  ;;  %v7565_v8 = vld [vmem:[#allocation11 + $0x3a8] sm:$0xf0]  ;;  %v7820_v0 = vor.u32 %v8724_v40, %v7819_v59  ;;  %v7747_v33 = vld [vmem:[#allocation11 + $0x510] sm:$0xf] }
 0x278   : > { %v8706_v18 = vld [vmem:[#allocation11 + $0x514] sm:$0xf0]  ;;  %v8641_v50 = vld [vmem:[#allocation11 + $0x314] sm:$0xf]  ;;  %v7557_v37 = vld [vmem:[#allocation11 + $0x398] sm:$0xf0] }
 0x279   : > { %4804 = vmatpush.bf16.msra.mxu0 %v7484_v58  ;;  %4818 = vmatpush.bf16.msra.mxu1 %v7548_v55  ;;  %v7763_v58 = vld [vmem:[#allocation11 + $0x530] sm:$0xf]  ;;  %v8710_v55 = vld [vmem:[#allocation11 + $0x534] sm:$0xf0]  ;;  %v8657_v1 = vld [vmem:[#allocation11 + $0x394] sm:$0xf]  ;;  %v7748_v41 = vor.u32 %v8706_v18, %v7747_v33 }
 0x27a   : > { %4832 = vmatpush.bf16.msra.mxu2 %v7612_v6  ;;  %4846 = vmatpush.bf16.msra.mxu3 %v7676_v11  ;;  %v8726_v6 = vld [vmem:[#allocation11 + $0x5b4] sm:$0xf0]  ;;  %v8645_v11 = vld [vmem:[#allocation11 + $0x334] sm:$0xf]  ;;  %v7764_v20 = vor.u32 %v8710_v55, %v7763_v58  ;;  %v7739_v39 = vld [vmem:[#allocation11 + $0x500] sm:$0xf]  ;;  %v7560_v23 = vor.u32 %v8657_v1, %v7557_v37 }
 0x27b   : > { %v7828_v28 = vor.u32 %v8726_v6, %v7827_v29  ;;  %v7512_v14 = vor.u32 %v8645_v11, %v7509_v56  ;;  %v8722_v2 = vld [vmem:[#allocation11 + $0x594] sm:$0xf0]  ;;  %v8704_v36 = vld [vmem:[#allocation11 + $0x504] sm:$0xf0]  ;;  %v8639_v24 = vld [vmem:[#allocation11 + $0x304] sm:$0xf] }
 0x27c   : > { %4805 = vmatmul.bf16.vlgmr.msra.gmra.mxu0 %v10072_v4  ;;  %4819 = vmatmul.bf16.vlgmr.msra.gmra.mxu1 %v10074_v52  ;;  %v7549_v19 = vld [vmem:[#allocation11 + $0x388] sm:$0xf0]  ;;  %v8685_v63 = vld [vmem:[#allocation11 + $0x474] sm:$0xf]  ;;  %v7669_v17 = vld [vmem:[#allocation11 + $0x478] sm:$0xf0]  ;;  %v7740_v45 = vor.u32 %v8704_v36, %v7739_v39 }
 0x27d   : > { %4853 = vmatpush.bf16.msrb.mxu0 %v7796_v35  ;;  %4867 = vmatpush.bf16.msrb.mxu1 %v7860_v61  ;;  %v8661_v35 = vld [vmem:[#allocation11 + $0x3b4] sm:$0xf]  ;;  %v7573_v61 = vld [vmem:[#allocation11 + $0x3b8] sm:$0xf0]  ;;  %v8683_v6 = vld [vmem:[#allocation11 + $0x464] sm:$0xf] }
 0x27e   : > { %4881 = vmatpush.bf16.msrb.mxu2 %v7544_v42  ;;  %4895 = vmatpush.bf16.msrb.mxu3 %v7608_v38  ;;  %v10089_v42 = vld.sshfl [vmem:[#allocation1 + $0x20] sm:$0xff pattern:$0x73625140]  ;;  %v10091_v38 = vld.sshfl [vmem:[#allocation1 + $0x28] sm:$0xff pattern:$0x73625140]  ;;  %v7576_v46 = vor.u32 %v8661_v35, %v7573_v61 }
 0x27f   : > { %4833 = vmatmul.bf16.vlgmr.msra.gmra.mxu2 %v10076_v49  ;;  %4847 = vmatmul.bf16.vlgmr.msra.gmra.mxu3 %v10078_v32  ;;  %5088 = vst [vmem:[#allocation1 + $0x20] ss:$4 sm:$0xff] %v10035_v34  ;;  %v7811_v34 = vld [vmem:[#allocation11 + $0x590] sm:$0xf]  ;;  %v8701_v25 = vld [vmem:[#allocation11 + $0x4f4] sm:$0xf] }
 0x280   : > { %5090 = vst [vmem:[#allocation1 + $0x21] ss:$4 sm:$0xff] %v10038_v21  ;;  %v7493_v21 = vld [vmem:[#allocation11 + $0x318] sm:$0xf0]  ;;  %v7812_v9 = vor.u32 %v8722_v2, %v7811_v34  ;;  %v8717_v62 = vld [vmem:[#allocation11 + $0x574] sm:$0xf] }
 0x281   : > { %4854 = vmatpush.bf16.msrb.mxu0 %v7788_v31  ;;  %4868 = vmatpush.bf16.msrb.mxu1 %v7852_v48  ;;  %5092 = vst [vmem:[#allocation1 + $0x22] ss:$4 sm:$0xff] %v4192_v16  ;;  %v4982_v31 = vsel %vm585_vm0, %v3345_v5, %v7865_v22  ;;  %v7756_v48 = vor.u32 %v8708_v15, %v7755_v47  ;;  %v7803_v16 = vld [vmem:[#allocation11 + $0x580] sm:$0xf]  ;;  %v7733_v54 = vld [vmem:[#allocation11 + $0x4f8] sm:$0xf0] }
 0x282   : > { %4882 = vmatpush.bf16.msrb.mxu2 %v7536_v26  ;;  %4896 = vmatpush.bf16.msrb.mxu3 %v7600_v60  ;;  %v7504_v26 = vor.u32 %v8643_v27, %v7501_v57  ;;  %v7568_v60 = vor.u32 %v8659_v51, %v7565_v8  ;;  %5094 = vst [vmem:[#allocation1 + $0x23] ss:$4 sm:$0xff] %v4982_v31  ;;  %v7861_v58 = vld [vmem:[#allocation11 + $0x5f8] sm:$0xf0]  ;;  %v7661_v11 = vld [vmem:[#allocation11 + $0x468] sm:$0xf0] }
 0x283   : > { %v8699_v61 = vld [vmem:[#allocation11 + $0x4e4] sm:$0xf]  ;;  %v7725_v5 = vld [vmem:[#allocation11 + $0x4e8] sm:$0xf0]  ;;  %v8681_v40 = vld [vmem:[#allocation11 + $0x454] sm:$0xf] }
 0x284   : > { %v8715_v22 = vld [vmem:[#allocation11 + $0x564] sm:$0xf]  ;;  %v7789_v47 = vld [vmem:[#allocation11 + $0x568] sm:$0xf0]  ;;  %v7728_v59 = vor.u32 %v8699_v61, %v7725_v5  ;;  %v8697_v57 = vld [vmem:[#allocation11 + $0x4d4] sm:$0xf] }
 0x285   : > { %4855 = vmatpush.bf16.msrb.mxu0 %v7780_v43  ;;  %4869 = vmatpush.bf16.msrb.mxu1 %v7844_v3  ;;  %v8720_v43 = vld [vmem:[#allocation11 + $0x584] sm:$0xf0]  ;;  %v7496_v3 = vor.u32 %v8641_v50, %v7493_v21  ;;  %v8731_v15 = vld [vmem:[#allocation11 + $0x5e4] sm:$0xf]  ;;  %v7717_v51 = vld [vmem:[#allocation11 + $0x4d8] sm:$0xf0] }
 0x286   : > { %4883 = vmatpush.bf16.msrb.mxu2 %v7528_v12  ;;  %4897 = vmatpush.bf16.msrb.mxu3 %v7592_v44  ;;  %v7485_v12 = vld [vmem:[#allocation11 + $0x308] sm:$0xf0]  ;;  %v8655_v44 = vld [vmem:[#allocation11 + $0x384] sm:$0xf]  ;;  %v7804_v7 = vor.u32 %v8720_v43, %v7803_v16  ;;  %v8713_v8 = vld [vmem:[#allocation11 + $0x554] sm:$0xf]  ;;  %v7720_v18 = vor.u32 %v8697_v57, %v7717_v51 }
 0x287   : > { %v7488_v55 = vor.u32 %v8639_v24, %v7485_v12  ;;  %v7552_v29 = vor.u32 %v8655_v44, %v7549_v19  ;;  %v7781_v31 = vld [vmem:[#allocation11 + $0x558] sm:$0xf0]  ;;  %v8679_v34 = vld [vmem:[#allocation11 + $0x444] sm:$0xf]  ;;  %v7709_v21 = vld [vmem:[#allocation11 + $0x4c8] sm:$0xf0] }
 0x288   : > { %v8695_v50 = vld [vmem:[#allocation11 + $0x4c4] sm:$0xf]  ;;  %v7773_v37 = vld [vmem:[#allocation11 + $0x548] sm:$0xf0]  ;;  %v7637_v36 = vld [vmem:[#allocation11 + $0x438] sm:$0xf0] }
 0x289   : > { %4856 = vmatpush.bf16.msrb.mxu0 %v7772_v10  ;;  %4870 = vmatpush.bf16.msrb.mxu1 %v7836_v13  ;;  %v7797_v10 = vld [vmem:[#allocation11 + $0x578] sm:$0xf0]  ;;  %v8733_v13 = vld [vmem:[#allocation11 + $0x5f4] sm:$0xf]  ;;  %v8711_v1 = vld [vmem:[#allocation11 + $0x544] sm:$0xf] }
 0x28a   : > { %4884 = vmatpush.bf16.msrb.mxu2 %v7520_v53  ;;  %4898 = vmatpush.bf16.msrb.mxu3 %v7584_v30  ;;  %v7672_v53 = vor.u32 %v8685_v63, %v7669_v17  ;;  %v7736_v30 = vor.u32 %v8701_v25, %v7733_v54  ;;  %v7800_v56 = vor.u32 %v8717_v62, %v7797_v10  ;;  %v8727_v39 = vld [vmem:[#allocation11 + $0x5c4] sm:$0xf]  ;;  %v8709_v24 = vld [vmem:[#allocation11 + $0x534] sm:$0xf]  ;;  %v7765_v12 = vld [vmem:[#allocation11 + $0x538] sm:$0xf0] }
 0x28b   : > { %v7864_v35 = vor.u32 %v8733_v13, %v7861_v58  ;;  %v7776_v16 = vor.u32 %v8711_v1, %v7773_v37  ;;  %v8725_v44 = vld [vmem:[#allocation11 + $0x5b4] sm:$0xf]  ;;  %v7829_v19 = vld [vmem:[#allocation11 + $0x5b8] sm:$0xf0]  ;;  %v8675_v25 = vld [vmem:[#allocation11 + $0x424] sm:$0xf]  ;;  %v7768_v62 = vor.u32 %v8709_v24, %v7765_v12 }
 0x28c   : > { %v7629_v54 = vld [vmem:[#allocation11 + $0x428] sm:$0xf0]  ;;  %v8707_v13 = vld [vmem:[#allocation11 + $0x524] sm:$0xf]  ;;  %v8689_v61 = vld [vmem:[#allocation11 + $0x494] sm:$0xf] }
 0x28d   : > { %4857 = vmatpush.bf16.msrb.mxu0 %v7764_v20  ;;  %4871 = vmatpush.bf16.msrb.mxu1 %v7828_v28  ;;  %v7853_v20 = vld [vmem:[#allocation11 + $0x5e8] sm:$0xf0]  ;;  %v7664_v28 = vor.u32 %v8683_v6, %v7661_v11  ;;  %v8673_v6 = vld [vmem:[#allocation11 + $0x414] sm:$0xf]  ;;  %v7621_v11 = vld [vmem:[#allocation11 + $0x418] sm:$0xf0] }
 0x28e   : > { %4885 = vmatpush.bf16.msrb.mxu2 %v7512_v14  ;;  %4899 = vmatpush.bf16.msrb.mxu3 %v7576_v46  ;;  %v7653_v14 = vld [vmem:[#allocation11 + $0x458] sm:$0xf0]  ;;  %v7792_v46 = vor.u32 %v8715_v22, %v7789_v47  ;;  %v7856_v27 = vor.u32 %v8731_v15, %v7853_v20  ;;  %v7693_v10 = vld [vmem:[#allocation11 + $0x4a8] sm:$0xf0]  ;;  %v8705_v22 = vld [vmem:[#allocation11 + $0x514] sm:$0xf] }
 0x28f   : > { %v7656_v33 = vor.u32 %v8681_v40, %v7653_v14  ;;  %v7757_v58 = vld [vmem:[#allocation11 + $0x528] sm:$0xf0]  ;;  %v7685_v5 = vld [vmem:[#allocation11 + $0x498] sm:$0xf0]  ;;  %v8721_v15 = vld [vmem:[#allocation11 + $0x594] sm:$0xf] }
 0x290   : > { %v7749_v47 = vld [vmem:[#allocation11 + $0x518] sm:$0xf0]  ;;  %v7688_v40 = vor.u32 %v8689_v61, %v7685_v5  ;;  %v7613_v14 = vld [vmem:[#allocation11 + $0x408] sm:$0xf0]  ;;  %v8116_v1 = vld [vmem:[#allocation11 + $0x7f0] sm:$0xf] }
 0x291   : > { %4858 = vmatpush.bf16.msrb.mxu0 %v7756_v48  ;;  %4872 = vmatpush.bf16.msrb.mxu1 %v7820_v0  ;;  %v8729_v48 = vld [vmem:[#allocation11 + $0x5d4] sm:$0xf]  ;;  %v7845_v0 = vld [vmem:[#allocation11 + $0x5d8] sm:$0xf0]  ;;  %v7752_v57 = vor.u32 %v8705_v22, %v7749_v47  ;;  %v8798_v37 = vld [vmem:[#allocation11 + $0x7f4] sm:$0xf0] }
 0x292   : > { %4886 = vmatpush.bf16.msrb.mxu2 %v7504_v26  ;;  %4900 = vmatpush.bf16.msrb.mxu3 %v7568_v60  ;;  %v7645_v26 = vld [vmem:[#allocation11 + $0x448] sm:$0xf0]  ;;  %v7784_v60 = vor.u32 %v8713_v8, %v7781_v31  ;;  %v7848_v2 = vor.u32 %v8729_v48, %v7845_v0  ;;  %v7813_v20 = vld [vmem:[#allocation11 + $0x598] sm:$0xf0]  ;;  %v8703_v8 = vld [vmem:[#allocation11 + $0x504] sm:$0xf] }
 0x293   : > { %v7816_v51 = vor.u32 %v8721_v15, %v7813_v20  ;;  %v7741_v31 = vld [vmem:[#allocation11 + $0x508] sm:$0xf0]  ;;  %v8719_v48 = vld [vmem:[#allocation11 + $0x584] sm:$0xf]  ;;  %v8044_v24 = vld [vmem:[#allocation11 + $0x760] sm:$0xf] }
 0x294   : > { %v7805_v0 = vld [vmem:[#allocation11 + $0x588] sm:$0xf0]  ;;  %v10100_v12 = vld [vmem:[#allocation13] sm:$0x3]  ;;  %v8744_v22 = vld [vmem:[#allocation11 + $0x644] sm:$0xf0] }
 0x295   : > { %4859 = vmatpush.bf16.msrb.mxu0 %v7748_v41  ;;  %4873 = vmatpush.bf16.msrb.mxu1 %v7812_v9  ;;  %v7837_v41 = vld [vmem:[#allocation11 + $0x5c8] sm:$0xf0]  ;;  %v8677_v9 = vld [vmem:[#allocation11 + $0x434] sm:$0xf]  ;;  %v7900_v5 = vld [vmem:[#allocation11 + $0x640] sm:$0xf] }
 0x296   : > { %4887 = vmatpush.bf16.msrb.mxu2 %v7496_v3  ;;  %4901 = vmatpush.bf16.msrb.mxu3 %v7560_v23  ;;  %v7840_v43 = vor.u32 %v8727_v39, %v7837_v41  ;;  %v8693_v3 = vld [vmem:[#allocation11 + $0x4b4] sm:$0xf]  ;;  %v7701_v23 = vld [vmem:[#allocation11 + $0x4b8] sm:$0xf0]  ;;  %v7640_v63 = vor.u32 %v8677_v9, %v7637_v36  ;;  %v7744_v39 = vor.u32 %v8703_v8, %v7741_v31  ;;  %v7916_v9 = vld [vmem:[#allocation11 + $0x660] sm:$0xf] }
 0x297   : > { %v7704_v17 = vor.u32 %v8693_v3, %v7701_v23  ;;  %v7808_v41 = vor.u32 %v8719_v48, %v7805_v0  ;;  %v8748_v36 = vld [vmem:[#allocation11 + $0x664] sm:$0xf0]  ;;  %v8117_v3 = vor.u32 %v8798_v37, %v8116_v1  ;;  %v7964_v47 = vld [vmem:[#allocation11 + $0x6c0] sm:$0xf]  ;;  %v7956_v8 = vld [vmem:[#allocation11 + $0x6b0] sm:$0xf] }
 0x298   : > { %v8764_v23 = vld [vmem:[#allocation11 + $0x6e4] sm:$0xf0]  ;;  %v8028_v20 = vld [vmem:[#allocation11 + $0x740] sm:$0xf]  ;;  %v8758_v31 = vld [vmem:[#allocation11 + $0x6b4] sm:$0xf0] }
 0x299   : > { %4860 = vmatpush.bf16.msrb.mxu0 %v7740_v45  ;;  %4874 = vmatpush.bf16.msrb.mxu1 %v7804_v7  ;;  %v7832_v45 = vor.u32 %v8725_v44, %v7829_v19  ;;  %v8691_v7 = vld [vmem:[#allocation11 + $0x4a4] sm:$0xf]  ;;  %v8780_v44 = vld [vmem:[#allocation11 + $0x764] sm:$0xf0]  ;;  %v8108_v19 = vld [vmem:[#allocation11 + $0x7e0] sm:$0xf]  ;;  %v7957_v1 = vor.u32 %v8758_v31, %v7956_v8 }
 0x29a   : > { %4888 = vmatpush.bf16.msrb.mxu2 %v7488_v55  ;;  %4902 = vmatpush.bf16.msrb.mxu3 %v7552_v29  ;;  %v8723_v55 = vld [vmem:[#allocation11 + $0x5a4] sm:$0xf]  ;;  %v7821_v29 = vld [vmem:[#allocation11 + $0x5a8] sm:$0xf0]  ;;  %v8760_v15 = vld [vmem:[#allocation11 + $0x6c4] sm:$0xf0] }
 0x29b   : > { %v8020_v48 = vld [vmem:[#allocation11 + $0x730] sm:$0xf]  ;;  %v3501_v8 = vperm.slane %v10100_v12, 1 }
 0x29c   : > { %4861 = vmatmul.bf16.vlgmr.msrb.gmra.mxu0 %v10089_v42  ;;  %4875 = vmatmul.bf16.vlgmr.msrb.gmra.mxu1 %v10091_v38 }
 0x29d   : > { %4909 = vmatpush.bf16.msra.mxu0 %v7672_v53  ;;  %4923 = vmatpush.bf16.msra.mxu1 %v7736_v30  ;;  %v7632_v53 = vor.u32 %v8675_v25, %v7629_v54  ;;  %v7696_v30 = vor.u32 %v8691_v7, %v7693_v10  ;;  %v7908_v54 = vld [vmem:[#allocation11 + $0x650] sm:$0xf]  ;;  %v8045_v7 = vor.u32 %v8780_v44, %v8044_v24  ;;  %v8076_v24 = vld [vmem:[#allocation11 + $0x7a0] sm:$0xf]  ;;  %v8788_v44 = vld [vmem:[#allocation11 + $0x7a4] sm:$0xf0] }
 0x29e   : > { %4937 = vmatpush.bf16.msra.mxu2 %v7800_v56  ;;  %4951 = vmatpush.bf16.msra.mxu3 %v7864_v35  ;;  %v7760_v56 = vor.u32 %v8707_v13, %v7757_v58  ;;  %v7824_v35 = vor.u32 %v8723_v55, %v7821_v29  ;;  %v7972_v13 = vld [vmem:[#allocation11 + $0x6d0] sm:$0xf]  ;;  %v8762_v58 = vld [vmem:[#allocation11 + $0x6d4] sm:$0xf0] }
 0x29f   : > { %4889 = vmatmul.bf16.vlgmr.msrb.gmra.mxu2 %v10072_v4  ;;  %4903 = vmatmul.bf16.vlgmr.msrb.gmra.mxu3 %v10074_v52  ;;  %v7648_v4 = vor.u32 %v8679_v34, %v7645_v26  ;;  %v7712_v52 = vor.u32 %v8695_v50, %v7709_v21  ;;  %v7988_v34 = vld [vmem:[#allocation11 + $0x6f0] sm:$0xf]  ;;  %v8766_v26 = vld [vmem:[#allocation11 + $0x6f4] sm:$0xf0] }
 0x2a0   : > { %v8782_v21 = vld [vmem:[#allocation11 + $0x774] sm:$0xf0]  ;;  %v8036_v55 = vld [vmem:[#allocation11 + $0x750] sm:$0xf] }
 0x2a1   : > { %4910 = vmatpush.bf16.msra.mxu0 %v7664_v28  ;;  %4924 = vmatpush.bf16.msra.mxu1 %v7728_v59  ;;  %v8671_v28 = vld [vmem:[#allocation11 + $0x404] sm:$0xf]  ;;  %v7624_v59 = vor.u32 %v8673_v6, %v7621_v11  ;;  %v8778_v29 = vld [vmem:[#allocation11 + $0x754] sm:$0xf0] }
 0x2a2   : > { %4938 = vmatpush.bf16.msra.mxu2 %v7792_v46  ;;  %4952 = vmatpush.bf16.msra.mxu3 %v7856_v27  ;;  %v8687_v46 = vld [vmem:[#allocation11 + $0x484] sm:$0xf]  ;;  %v7677_v27 = vld [vmem:[#allocation11 + $0x488] sm:$0xf0] }
 0x2a3   : > { %v7680_v50 = vor.u32 %v8687_v46, %v7677_v27  ;;  %v7892_v46 = vld [vmem:[#allocation11 + $0x630] sm:$0xf]  ;;  %v8742_v27 = vld [vmem:[#allocation11 + $0x634] sm:$0xf0] }
 0x2a5   : > { %4911 = vmatpush.bf16.msra.mxu0 %v7656_v33  ;;  %4925 = vmatpush.bf16.msra.mxu1 %v7720_v18  ;;  %v7924_v33 = vld [vmem:[#allocation11 + $0x670] sm:$0xf]  ;;  %v8750_v18 = vld [vmem:[#allocation11 + $0x674] sm:$0xf0] }
 0x2a6   : > { %4939 = vmatpush.bf16.msra.mxu2 %v7784_v60  ;;  %4953 = vmatpush.bf16.msra.mxu3 %v7848_v2  ;;  %v8052_v60 = vld [vmem:[#allocation11 + $0x770] sm:$0xf]  ;;  %v7616_v2 = vor.u32 %v8671_v28, %v7613_v14  ;;  %v7965_v14 = vor.u32 %v8760_v15, %v7964_v47  ;;  %v7996_v47 = vld [vmem:[#allocation11 + $0x700] sm:$0xf] }
 0x2a9   : > { %4912 = vmatpush.bf16.msra.mxu0 %v7648_v4  ;;  %4926 = vmatpush.bf16.msra.mxu1 %v7712_v52  ;;  %v7925_v4 = vor.u32 %v8750_v18, %v7924_v33  ;;  %v7989_v52 = vor.u32 %v8766_v26, %v7988_v34  ;;  %v8774_v18 = vld [vmem:[#allocation11 + $0x734] sm:$0xf0]  ;;  %v8084_v34 = vld [vmem:[#allocation11 + $0x7b0] sm:$0xf] }
 0x2aa   : > { %4940 = vmatpush.bf16.msra.mxu2 %v7776_v16  ;;  %4954 = vmatpush.bf16.msra.mxu3 %v7840_v43  ;;  %v7980_v16 = vld [vmem:[#allocation11 + $0x6e0] sm:$0xf]  ;;  %v8053_v43 = vor.u32 %v8782_v21, %v8052_v60  ;;  %v8790_v26 = vld [vmem:[#allocation11 + $0x7b4] sm:$0xf0]  ;;  %v7893_v21 = vor.u32 %v8742_v27, %v7892_v46  ;;  %v8244_v27 = vld [vmem:[#allocation11 + $0x8f0] sm:$0xf] }
 0x2ab   : > { %v7981_v25 = vor.u32 %v8764_v23, %v7980_v16  ;;  %v8756_v16 = vld [vmem:[#allocation11 + $0x6a4] sm:$0xf0]  ;;  %v8814_v46 = vld [vmem:[#allocation11 + $0x874] sm:$0xf0] }
 0x2ac   : > { %v8772_v23 = vld [vmem:[#allocation11 + $0x724] sm:$0xf0] }
 0x2ad   : > { %4913 = vmatpush.bf16.msra.mxu0 %v7640_v63  ;;  %4927 = vmatpush.bf16.msra.mxu1 %v7704_v17  ;;  %v8796_v63 = vld [vmem:[#allocation11 + $0x7e4] sm:$0xf0]  ;;  %v7917_v17 = vor.u32 %v8748_v36, %v7916_v9  ;;  %v8085_v9 = vor.u32 %v8790_v26, %v8084_v34  ;;  %v7948_v36 = vld [vmem:[#allocation11 + $0x6a0] sm:$0xf] }
 0x2ae   : > { %4941 = vmatpush.bf16.msra.mxu2 %v7768_v62  ;;  %4955 = vmatpush.bf16.msra.mxu3 %v7832_v45  ;;  %v8746_v62 = vld [vmem:[#allocation11 + $0x654] sm:$0xf0]  ;;  %v3500_v45 = vperm.slane %v10100_v12, 0  ;;  %v8109_v10 = vor.u32 %v8796_v63, %v8108_v19  ;;  %v7949_v63 = vor.u32 %v8756_v16, %v7948_v36  ;;  %v8236_v36 = vld [vmem:[#allocation11 + $0x8e0] sm:$0xf] }
 0x2af   : > { %v8828_v16 = vld [vmem:[#allocation11 + $0x8e4] sm:$0xf0] }
 0x2b1   : > { %4914 = vmatpush.bf16.msra.mxu0 %v7632_v53  ;;  %4928 = vmatpush.bf16.msra.mxu1 %v7696_v30  ;;  %v8100_v53 = vld [vmem:[#allocation11 + $0x7d0] sm:$0xf]  ;;  %v8794_v30 = vld [vmem:[#allocation11 + $0x7d4] sm:$0xf0] }
 0x2b2   : > { %4942 = vmatpush.bf16.msra.mxu2 %v7760_v56  ;;  %4956 = vmatpush.bf16.msra.mxu3 %v7824_v35  ;;  %v7909_v56 = vor.u32 %v8746_v62, %v7908_v54  ;;  %v7973_v35 = vor.u32 %v8762_v58, %v7972_v13  ;;  %v8077_v62 = vor.u32 %v8788_v44, %v8076_v24  ;;  %v8763_v24 = vld [vmem:[#allocation11 + $0x6e4] sm:$0xf]  ;;  %v7982_v44 = vld [vmem:[#allocation11 + $0x6e8] sm:$0xf0] }
 0x2b5   : > { %4915 = vmatpush.bf16.msra.mxu0 %v7624_v59  ;;  %4929 = vmatpush.bf16.msra.mxu1 %v7688_v40  ;;  %v8092_v59 = vld [vmem:[#allocation11 + $0x7c0] sm:$0xf]  ;;  %v7901_v40 = vor.u32 %v8744_v22, %v7900_v5 }
 0x2b6   : > { %4943 = vmatpush.bf16.msra.mxu2 %v7752_v57  ;;  %4957 = vmatpush.bf16.msra.mxu3 %v7816_v51 }
 0x2b8   : > { %v4020_v6 = vpop.f32.mrf.mxu0  ;;  %v4034_v11 = vpop.f32.mrf.mxu1 }
 0x2b9   : > { %4916 = vmatpush.bf16.msra.mxu0 %v7616_v2  ;;  %4930 = vmatpush.bf16.msra.mxu1 %v7680_v50  ;;  %v4021_v61 = vadd.f32 %v4020_v6, %v3500_v45 }
 0x2ba   : > { %4944 = vmatpush.bf16.msra.mxu2 %v7744_v39  ;;  %4958 = vmatpush.bf16.msra.mxu3 %v7808_v41  ;;  %v7884_v39 = vld [vmem:[#allocation11 + $0x620] sm:$0xf]  ;;  %v8740_v41 = vld [vmem:[#allocation11 + $0x624] sm:$0xf0] }
 0x2bb   : > { %v4035_v28 = vadd.f32 %v4034_v11, %v4021_v61  ;;  %v7885_v19 = vor.u32 %v8740_v41, %v7884_v39 }
 0x2bc   : > { %4917 = vmatmul.bf16.vlgmr.msra.gmra.mxu0 %v10076_v49  ;;  %4931 = vmatmul.bf16.vlgmr.msra.gmra.mxu1 %v10078_v32  ;;  %v8037_v49 = vor.u32 %v8778_v29, %v8036_v55  ;;  %v8101_v32 = vor.u32 %v8794_v30, %v8100_v53  ;;  %v8770_v55 = vld [vmem:[#allocation11 + $0x714] sm:$0xf0]  ;;  %v8068_v29 = vld [vmem:[#allocation11 + $0x790] sm:$0xf] }
 0x2bd   : > { %5587 = vmatpush.bf16.msrb.mxu0 %v7925_v4  ;;  %5601 = vmatpush.bf16.msrb.mxu1 %v7989_v52  ;;  %v8021_v52 = vor.u32 %v8774_v18, %v8020_v48  ;;  %v8786_v53 = vld [vmem:[#allocation11 + $0x794] sm:$0xf0]  ;;  %v7990_v18 = vld [vmem:[#allocation11 + $0x6f8] sm:$0xf0] }
 0x2be   : > { %5615 = vmatpush.bf16.msrb.mxu2 %v8053_v43  ;;  %5629 = vmatpush.bf16.msrb.mxu3 %v8117_v3  ;;  %v8012_v43 = vld [vmem:[#allocation11 + $0x720] sm:$0xf] }
 0x2bf   : > { %4945 = vmatmul.bf16.vlgmr.msra.gmra.mxu2 %v10089_v42  ;;  %4959 = vmatmul.bf16.vlgmr.msra.gmra.mxu3 %v10091_v38  ;;  %v8776_v42 = vld [vmem:[#allocation11 + $0x744] sm:$0xf0]  ;;  %v4048_v0 = vpop.f32.mrf.mxu2  ;;  %v4062_v33 = vpop.f32.mrf.mxu3  ;;  %v8013_v54 = vor.u32 %v8772_v23, %v8012_v43  ;;  %v8747_v43 = vld [vmem:[#allocation11 + $0x664] sm:$0xf]  ;;  %v7918_v23 = vld [vmem:[#allocation11 + $0x668] sm:$0xf0] }
 0x2c0   : > { %v8792_v38 = vld [vmem:[#allocation11 + $0x7c4] sm:$0xf0]  ;;  %v8029_v57 = vor.u32 %v8776_v42, %v8028_v20  ;;  %v4049_v60 = vadd.f32 %v4048_v0, %v4035_v28  ;;  %v4022_v2 = vpop.f32.mrf.mxu0  ;;  %v4036_v50 = vpop.f32.mrf.mxu1  ;;  %v8069_v28 = vor.u32 %v8786_v53, %v8068_v29  ;;  %v7926_v0 = vld [vmem:[#allocation11 + $0x678] sm:$0xf0]  ;;  %v8228_v29 = vld [vmem:[#allocation11 + $0x8d0] sm:$0xf] }
 0x2c1   : > { %5588 = vmatpush.bf16.msrb.mxu0 %v7917_v17  ;;  %5602 = vmatpush.bf16.msrb.mxu1 %v7981_v25  ;;  %v8093_v51 = vor.u32 %v8792_v38, %v8092_v59  ;;  %v4023_v37 = vadd.f32 %v4022_v2, %v3500_v45  ;;  %v7876_v17 = vld [vmem:[#allocation11 + $0x610] sm:$0xf]  ;;  %v8738_v25 = vld [vmem:[#allocation11 + $0x614] sm:$0xf0]  ;;  %v8768_v42 = vld [vmem:[#allocation11 + $0x704] sm:$0xf0] }
 0x2c2   : > { %5616 = vmatpush.bf16.msrb.mxu2 %v8045_v7  ;;  %5630 = vmatpush.bf16.msrb.mxu3 %v8109_v10  ;;  %v4063_v4 = vadd.f32 %v4062_v33, %v4049_v60  ;;  %v7940_v45 = vld [vmem:[#allocation11 + $0x690] sm:$0xf]  ;;  %v8754_v7 = vld [vmem:[#allocation11 + $0x694] sm:$0xf0]  ;;  %v7877_v61 = vor.u32 %v8738_v25, %v7876_v17  ;;  %v8060_v59 = vld [vmem:[#allocation11 + $0x780] sm:$0xf]  ;;  %v7997_v34 = vor.u32 %v8768_v42, %v7996_v47 }
 0x2c3   : > { %v4037_v3 = vadd.f32 %v4036_v50, %v4023_v37  ;;  %v8004_v10 = vld [vmem:[#allocation11 + $0x710] sm:$0xf]  ;;  %v7941_v5 = vor.u32 %v8754_v7, %v7940_v45  ;;  %v8784_v38 = vld [vmem:[#allocation11 + $0x784] sm:$0xf0]  ;;  %v8765_v33 = vld [vmem:[#allocation11 + $0x6f4] sm:$0xf]  ;;  %v8237_v7 = vor.u32 %v8828_v16, %v8236_v36 }
 0x2c4   : > { %v8005_v20 = vor.u32 %v8770_v55, %v8004_v10  ;;  %v8061_v26 = vor.u32 %v8784_v38, %v8060_v59  ;;  %v8812_v37 = vld [vmem:[#allocation11 + $0x864] sm:$0xf0]  ;;  %v7993_v41 = vor.u32 %v8765_v33, %v7990_v18  ;;  %v10114_v17 = vld.sshfl [vmem:[#allocation1 + $0x8] sm:$0xff pattern:$0x73625140]  ;;  %v7985_v55 = vor.u32 %v8763_v24, %v7982_v44 }
 0x2c5   : > { %5589 = vmatpush.bf16.msrb.mxu0 %v7909_v56  ;;  %5603 = vmatpush.bf16.msrb.mxu1 %v7973_v35  ;;  %v7868_v56 = vld [vmem:[#allocation11 + $0x600] sm:$0xf]  ;;  %v8736_v35 = vld [vmem:[#allocation11 + $0x604] sm:$0xf0]  ;;  %v8164_v10 = vld [vmem:[#allocation11 + $0x850] sm:$0xf] }
 0x2c6   : > { %5617 = vmatpush.bf16.msrb.mxu2 %v8037_v49  ;;  %5631 = vmatpush.bf16.msrb.mxu3 %v8101_v32  ;;  %v7932_v49 = vld [vmem:[#allocation11 + $0x680] sm:$0xf]  ;;  %v8752_v32 = vld [vmem:[#allocation11 + $0x684] sm:$0xf0]  ;;  %v7869_v31 = vor.u32 %v8736_v35, %v7868_v56  ;;  %v8826_v53 = vld [vmem:[#allocation11 + $0x8d4] sm:$0xf0] }
 0x2c7   : > { %v4050_v13 = vpop.f32.mrf.mxu2  ;;  %v4064_v58 = vpop.f32.mrf.mxu3  ;;  %v7933_v48 = vor.u32 %v8752_v32, %v7932_v49  ;;  %v10116_v25 = vld.sshfl [vmem:[#allocation1 + $0x10] sm:$0xff pattern:$0x73625140]  ;;  %v8156_v49 = vld [vmem:[#allocation11 + $0x840] sm:$0xf] }
 0x2c8   : > { %v4051_v30 = vadd.f32 %v4050_v13, %v4037_v3  ;;  %v4076_v6 = vpop.f32.mrf.mxu0  ;;  %v4090_v11 = vpop.f32.mrf.mxu1  ;;  %v8810_v13 = vld [vmem:[#allocation11 + $0x854] sm:$0xf0]  ;;  %v7974_v56 = vld [vmem:[#allocation11 + $0x6d8] sm:$0xf0]  ;;  %v8808_v32 = vld [vmem:[#allocation11 + $0x844] sm:$0xf0] }
 0x2c9   : > { %5590 = vmatpush.bf16.msrb.mxu0 %v7901_v40  ;;  %5604 = vmatpush.bf16.msrb.mxu1 %v7965_v14  ;;  %v4077_v22 = vadd.f32 %v4076_v6, %v4063_v4  ;;  %v8180_v14 = vld [vmem:[#allocation11 + $0x870] sm:$0xf]  ;;  %v7910_v6 = vld [vmem:[#allocation11 + $0x658] sm:$0xf0]  ;;  %v8165_v35 = vor.u32 %v8810_v13, %v8164_v10  ;;  %v8824_v42 = vld [vmem:[#allocation11 + $0x8c4] sm:$0xf0] }
 0x2ca   : > { %5618 = vmatpush.bf16.msrb.mxu2 %v8029_v57  ;;  %5632 = vmatpush.bf16.msrb.mxu3 %v8093_v51  ;;  %v4065_v15 = vadd.f32 %v4064_v58, %v4051_v30  ;;  %v8830_v57 = vld [vmem:[#allocation11 + $0x8f4] sm:$0xf0]  ;;  %v8749_v51 = vld [vmem:[#allocation11 + $0x674] sm:$0xf]  ;;  %v8181_v60 = vor.u32 %v8814_v46, %v8180_v14  ;;  %v7921_v58 = vor.u32 %v8747_v43, %v7918_v23  ;;  %v8743_v59 = vld [vmem:[#allocation11 + $0x644] sm:$0xf] }
 0x2cb   : > { %v10107_v40 = vadd.f32 %v4090_v11, %v4077_v22  ;;  %v8245_v2 = vor.u32 %v8830_v57, %v8244_v27  ;;  %v7929_v39 = vor.u32 %v8749_v51, %v7926_v0  ;;  %v8745_v30 = vld [vmem:[#allocation11 + $0x654] sm:$0xf]  ;;  %v7902_v38 = vld [vmem:[#allocation11 + $0x648] sm:$0xf0]  ;;  %v8759_v14 = vld [vmem:[#allocation11 + $0x6c4] sm:$0xf] }
 0x2cc   : > { %v8761_v11 = vld [vmem:[#allocation11 + $0x6d4] sm:$0xf]  ;;  %v7913_v47 = vor.u32 %v8745_v30, %v7910_v6  ;;  %v7966_v46 = vld [vmem:[#allocation11 + $0x6c8] sm:$0xf0]  ;;  %v8148_v33 = vld [vmem:[#allocation11 + $0x830] sm:$0xf]  ;;  %v7905_v12 = vor.u32 %v8743_v59, %v7902_v38 }
 0x2cd   : > { %5591 = vmatpush.bf16.msrb.mxu0 %v7893_v21  ;;  %5605 = vmatpush.bf16.msrb.mxu1 %v7957_v1  ;;  %v8172_v1 = vld [vmem:[#allocation11 + $0x860] sm:$0xf]  ;;  %v8806_v18 = vld [vmem:[#allocation11 + $0x834] sm:$0xf0]  ;;  %v8820_v16 = vld [vmem:[#allocation11 + $0x8a4] sm:$0xf0] }
 0x2ce   : > { %5619 = vmatpush.bf16.msrb.mxu2 %v8021_v52  ;;  %5633 = vmatpush.bf16.msrb.mxu3 %v8085_v9  ;;  %v8173_v45 = vor.u32 %v8812_v37, %v8172_v1  ;;  %v7958_v1 = vld [vmem:[#allocation11 + $0x6b8] sm:$0xf0]  ;;  %v8149_v37 = vor.u32 %v8806_v18, %v8148_v33  ;;  %v8204_v36 = vld [vmem:[#allocation11 + $0x8a0] sm:$0xf]  ;;  %v8739_v43 = vld [vmem:[#allocation11 + $0x624] sm:$0xf] }
 0x2cf   : > { %v4104_v50 = vpop.f32.mrf.mxu2  ;;  %v4118_v21 = vpop.f32.mrf.mxu3  ;;  %v7886_v24 = vld [vmem:[#allocation11 + $0x628] sm:$0xf0]  ;;  %v8755_v44 = vld [vmem:[#allocation11 + $0x6a4] sm:$0xf]  ;;  %v8816_v59 = vld [vmem:[#allocation11 + $0x884] sm:$0xf0] }
 0x2d0   : > { %v4105_v4 = vadd.f32 %v4104_v50, %v3501_v8  ;;  %v4078_v52 = vpop.f32.mrf.mxu0  ;;  %v4092_v9 = vpop.f32.mrf.mxu1  ;;  %v7894_v50 = vld [vmem:[#allocation11 + $0x638] sm:$0xf0]  ;;  %v7889_v6 = vor.u32 %v8739_v43, %v7886_v24  ;;  %v8797_v18 = vld [vmem:[#allocation11 + $0x7f4] sm:$0xf]  ;;  %v8795_v43 = vld [vmem:[#allocation11 + $0x7e4] sm:$0xf] }
 0x2d1   : > { %5592 = vmatpush.bf16.msrb.mxu0 %v7885_v19  ;;  %5606 = vmatpush.bf16.msrb.mxu1 %v7949_v63  ;;  %v4079_v3 = vadd.f32 %v4078_v52, %v4065_v15  ;;  %v10112_v63 = vld.sshfl [vmem:[#allocation1] sm:$0xff pattern:$0x73625140]  ;;  %v7977_v15 = vor.u32 %v8761_v11, %v7974_v56  ;;  %v8196_v56 = vld [vmem:[#allocation11 + $0x890] sm:$0xf] }
 0x2d2   : > { %5620 = vmatpush.bf16.msrb.mxu2 %v8013_v54  ;;  %5634 = vmatpush.bf16.msrb.mxu3 %v8077_v62  ;;  %v4119_v19 = vadd.f32 %v4118_v21, %v4105_v4  ;;  %v10118_v54 = vld.sshfl [vmem:[#allocation1 + $0x18] sm:$0xff pattern:$0x73625140]  ;;  %v8757_v21 = vld [vmem:[#allocation11 + $0x6b4] sm:$0xf] }
 0x2d3   : > { %v10120_v62 = vadd.f32 %v4092_v9, %v4079_v3  ;;  %v8804_v4 = vld [vmem:[#allocation11 + $0x824] sm:$0xf0]  ;;  %v7961_v9 = vor.u32 %v8757_v21, %v7958_v1  ;;  %v8246_v21 = vld [vmem:[#allocation11 + $0x8f8] sm:$0xf0]  ;;  %v8174_v24 = vld [vmem:[#allocation11 + $0x868] sm:$0xf0] }
 0x2d5   : > { %5593 = vmatpush.bf16.msrb.mxu0 %v7877_v61  ;;  %5607 = vmatpush.bf16.msrb.mxu1 %v7941_v5  ;;  %v8229_v61 = vor.u32 %v8826_v53, %v8228_v29  ;;  %v8802_v29 = vld [vmem:[#allocation11 + $0x814] sm:$0xf0] }
 0x2d6   : > { %5621 = vmatpush.bf16.msrb.mxu2 %v8005_v20  ;;  %5635 = vmatpush.bf16.msrb.mxu3 %v8069_v28  ;;  %v8220_v28 = vld [vmem:[#allocation11 + $0x8c0] sm:$0xf] }
 0x2d7   : > { %v4106_v5 = vpop.f32.mrf.mxu2  ;;  %v4120_v22 = vpop.f32.mrf.mxu3  ;;  %v8221_v0 = vor.u32 %v8824_v42, %v8220_v28  ;;  %v8800_v28 = vld [vmem:[#allocation11 + $0x804] sm:$0xf0]  ;;  %v8188_v42 = vld [vmem:[#allocation11 + $0x880] sm:$0xf] }
 0x2d8   : > { %v4107_v20 = vadd.f32 %v4106_v5, %v3501_v8  ;;  %v7969_v8 = vor.u32 %v8759_v14, %v7966_v46  ;;  %v8735_v46 = vld [vmem:[#allocation11 + $0x604] sm:$0xf] }
 0x2d9   : > { %5594 = vmatpush.bf16.msrb.mxu0 %v7869_v31  ;;  %5608 = vmatpush.bf16.msrb.mxu1 %v7933_v48  ;;  %v4132_v57 = vpop.f32.mrf.mxu0  ;;  %v4146_v51 = vpop.f32.mrf.mxu1  ;;  %v8157_v48 = vor.u32 %v8808_v32, %v8156_v49  ;;  %v8753_v49 = vld [vmem:[#allocation11 + $0x694] sm:$0xf]  ;;  %v7942_v32 = vld [vmem:[#allocation11 + $0x698] sm:$0xf0] }
 0x2da   : > { %5622 = vmatpush.bf16.msrb.mxu2 %v7997_v34  ;;  %5636 = vmatpush.bf16.msrb.mxu3 %v8061_v26  ;;  %v4121_v27 = vadd.f32 %v4120_v22, %v4107_v20  ;;  %v4133_v31 = vadd.f32 %v4132_v57, %v4119_v19  ;;  %v8212_v34 = vld [vmem:[#allocation11 + $0x8b0] sm:$0xf]  ;;  %v8822_v26 = vld [vmem:[#allocation11 + $0x8b4] sm:$0xf0]  ;;  %v7950_v19 = vld [vmem:[#allocation11 + $0x6a8] sm:$0xf0]  ;;  %v7945_v14 = vor.u32 %v8753_v49, %v7942_v32 }
 0x2db   : > { %v7953_v11 = vor.u32 %v8755_v44, %v7950_v19  ;;  %v7878_v22 = vld [vmem:[#allocation11 + $0x618] sm:$0xf0]  ;;  %v8751_v57 = vld [vmem:[#allocation11 + $0x684] sm:$0xf]  ;;  %v8238_v19 = vld [vmem:[#allocation11 + $0x8e8] sm:$0xf0] }
 0x2dc   : > { %5595 = vmatmul.bf16.vlgmr.msrb.gmra.mxu0 %v10112_v63  ;;  %5609 = vmatmul.bf16.vlgmr.msrb.gmra.mxu1 %v10114_v17  ;;  %v8827_v44 = vld [vmem:[#allocation11 + $0x8e4] sm:$0xf] }
 0x2dd   : > { %5643 = vmatpush.bf16.msra.mxu0 %v8181_v60  ;;  %5657 = vmatpush.bf16.msra.mxu1 %v8245_v2  ;;  %v8741_v60 = vld [vmem:[#allocation11 + $0x634] sm:$0xf]  ;;  %v4147_v2 = vadd.f32 %v4146_v51, %v4133_v31  ;;  %v7934_v31 = vld [vmem:[#allocation11 + $0x688] sm:$0xf0]  ;;  %v8775_v32 = vld [vmem:[#allocation11 + $0x744] sm:$0xf] }
 0x2de   : > { %5671 = vmatpush.bf16.msra.mxu2 %v7929_v39  ;;  %5685 = vmatpush.bf16.msra.mxu3 %v7993_v41  ;;  %v8213_v39 = vor.u32 %v8822_v26, %v8212_v34  ;;  %v8140_v41 = vld [vmem:[#allocation11 + $0x820] sm:$0xf]  ;;  %v7897_v52 = vor.u32 %v8741_v60, %v7894_v50  ;;  %v8189_v60 = vor.u32 %v8816_v59, %v8188_v42  ;;  %v8829_v50 = vld [vmem:[#allocation11 + $0x8f4] sm:$0xf]  ;;  %v8094_v42 = vld [vmem:[#allocation11 + $0x7c8] sm:$0xf0] }
 0x2df   : > { %5623 = vmatmul.bf16.vlgmr.msrb.gmra.mxu2 %v10116_v25  ;;  %5637 = vmatmul.bf16.vlgmr.msrb.gmra.mxu3 %v10118_v54  ;;  %v8141_v13 = vor.u32 %v8804_v4, %v8140_v41  ;;  %v8807_v59 = vld [vmem:[#allocation11 + $0x844] sm:$0xf] }
 0x2e1   : > { %5644 = vmatpush.bf16.msra.mxu0 %v8173_v45  ;;  %5658 = vmatpush.bf16.msra.mxu1 %v8237_v7  ;;  %v4134_v7 = vpop.f32.mrf.mxu0  ;;  %v4148_v30 = vpop.f32.mrf.mxu1 }
 0x2e2   : > { %5672 = vmatpush.bf16.msra.mxu2 %v7921_v58  ;;  %5686 = vmatpush.bf16.msra.mxu3 %v7985_v55  ;;  %v4160_v3 = vpop.f32.mrf.mxu2  ;;  %v4174_v23 = vpop.f32.mrf.mxu3  ;;  %v4135_v10 = vadd.f32 %v4134_v7, %v4121_v27  ;;  %v8205_v58 = vor.u32 %v8820_v16, %v8204_v36  ;;  %v8132_v55 = vld [vmem:[#allocation11 + $0x810] sm:$0xf]  ;;  %v7870_v27 = vld [vmem:[#allocation11 + $0x608] sm:$0xf0]  ;;  %v8249_v16 = vor.u32 %v8829_v50, %v8246_v21  ;;  %v8771_v21 = vld [vmem:[#allocation11 + $0x724] sm:$0xf] }
 0x2e3   : > { %v4161_v45 = vadd.f32 %v4160_v3, %v4147_v2  ;;  %v8182_v2 = vld [vmem:[#allocation11 + $0x878] sm:$0xf0]  ;;  %v8110_v3 = vld [vmem:[#allocation11 + $0x7e8] sm:$0xf0] }
 0x2e4   : > { %v4149_v5 = vadd.f32 %v4148_v30, %v4135_v10  ;;  %v10134_v7 = vld.sshfl [vmem:[#allocation1 + $0x28] sm:$0xff pattern:$0x73625140]  ;;  %v8241_v30 = vor.u32 %v8827_v44, %v8238_v19 }
 0x2e5   : > { %5645 = vmatpush.bf16.msra.mxu0 %v8165_v35  ;;  %5659 = vmatpush.bf16.msra.mxu1 %v8229_v61  ;;  %v10128_v53 = vadd.f32 %v4174_v23, %v4161_v45  ;;  %v8818_v35 = vld [vmem:[#allocation11 + $0x894] sm:$0xf0]  ;;  %v8737_v61 = vld [vmem:[#allocation11 + $0x614] sm:$0xf]  ;;  %v8811_v23 = vld [vmem:[#allocation11 + $0x864] sm:$0xf] }
 0x2e6   : > { %5673 = vmatpush.bf16.msra.mxu2 %v7913_v47  ;;  %5687 = vmatpush.bf16.msra.mxu3 %v7977_v15  ;;  %v8124_v47 = vld [vmem:[#allocation11 + $0x800] sm:$0xf]  ;;  %v8133_v15 = vor.u32 %v8802_v29, %v8132_v55  ;;  %v8197_v20 = vor.u32 %v8818_v35, %v8196_v56  ;;  %v7881_v38 = vor.u32 %v8737_v61, %v7878_v22  ;;  %v10132_v45 = vld.sshfl [vmem:[#allocation1 + $0x20] sm:$0xff pattern:$0x73625140] }
 0x2e7   : > { %v8125_v26 = vor.u32 %v8800_v28, %v8124_v47  ;;  %v8038_v55 = vld [vmem:[#allocation11 + $0x758] sm:$0xf0]  ;;  %v8177_v29 = vor.u32 %v8811_v23, %v8174_v24  ;;  %v8809_v56 = vld [vmem:[#allocation11 + $0x854] sm:$0xf]  ;;  %v8030_v47 = vld [vmem:[#allocation11 + $0x748] sm:$0xf0] }
 0x2e8   : > { %v8166_v35 = vld [vmem:[#allocation11 + $0x858] sm:$0xf0]  ;;  %v8825_v61 = vld [vmem:[#allocation11 + $0x8d4] sm:$0xf]  ;;  %v8791_v28 = vld [vmem:[#allocation11 + $0x7c4] sm:$0xf] }
 0x2e9   : > { %5646 = vmatpush.bf16.msra.mxu0 %v8157_v48  ;;  %5660 = vmatpush.bf16.msra.mxu1 %v8221_v0  ;;  %v8781_v48 = vld [vmem:[#allocation11 + $0x774] sm:$0xf]  ;;  %v8054_v0 = vld [vmem:[#allocation11 + $0x778] sm:$0xf0]  ;;  %v8206_v23 = vld [vmem:[#allocation11 + $0x8a8] sm:$0xf0] }
 0x2ea   : > { %5674 = vmatpush.bf16.msra.mxu2 %v7905_v12  ;;  %5688 = vmatpush.bf16.msra.mxu3 %v7969_v8  ;;  %v4162_v51 = vpop.f32.mrf.mxu2  ;;  %v8118_v12 = vld [vmem:[#allocation11 + $0x7f8] sm:$0xf0]  ;;  %v8813_v8 = vld [vmem:[#allocation11 + $0x874] sm:$0xf]  ;;  %v4176_v34 = vpop.f32.mrf.mxu3  ;;  %v8057_v41 = vor.u32 %v8781_v48, %v8054_v0 }
 0x2eb   : > { %v4163_v33 = vadd.f32 %v4162_v51, %v4149_v5  ;;  %v8121_v4 = vor.u32 %v8797_v18, %v8118_v12  ;;  %v8185_v36 = vor.u32 %v8813_v8, %v8182_v2  ;;  %v8230_v5 = vld [vmem:[#allocation11 + $0x8d8] sm:$0xf0]  ;;  %v8097_v51 = vor.u32 %v8791_v28, %v8094_v42  ;;  %v8789_v18 = vld [vmem:[#allocation11 + $0x7b4] sm:$0xf] }
 0x2ec   : > { %v8022_v48 = vld [vmem:[#allocation11 + $0x738] sm:$0xf0]  ;;  %v8805_v8 = vld [vmem:[#allocation11 + $0x834] sm:$0xf] }
 0x2ed   : > { %5647 = vmatpush.bf16.msra.mxu0 %v8149_v37  ;;  %5661 = vmatpush.bf16.msra.mxu1 %v8213_v39  ;;  %v10130_v1 = vadd.f32 %v4176_v34, %v4163_v33  ;;  %v7873_v37 = vor.u32 %v8735_v46, %v7870_v27  ;;  %v7937_v39 = vor.u32 %v8751_v57, %v7934_v31  ;;  %v8222_v46 = vld [vmem:[#allocation11 + $0x8c8] sm:$0xf0]  ;;  %v8773_v31 = vld [vmem:[#allocation11 + $0x734] sm:$0xf]  ;;  %v8086_v12 = vld [vmem:[#allocation11 + $0x7b8] sm:$0xf0] }
 0x2ee   : > { %5675 = vmatpush.bf16.msra.mxu2 %v7897_v52  ;;  %5689 = vmatpush.bf16.msra.mxu3 %v7961_v9  ;;  %v8779_v52 = vld [vmem:[#allocation11 + $0x764] sm:$0xf]  ;;  %v8046_v9 = vld [vmem:[#allocation11 + $0x768] sm:$0xf0]  ;;  %v8033_v57 = vor.u32 %v8775_v32, %v8030_v47  ;;  %v8150_v34 = vld [vmem:[#allocation11 + $0x838] sm:$0xf0]  ;;  %v8025_v2 = vor.u32 %v8773_v31, %v8022_v48  ;;  %v8089_v50 = vor.u32 %v8789_v18, %v8086_v12 }
 0x2ef   : > { %v8049_v10 = vor.u32 %v8779_v52, %v8046_v9  ;;  %v8078_v52 = vld [vmem:[#allocation11 + $0x7a8] sm:$0xf0]  ;;  %v8803_v9 = vld [vmem:[#allocation11 + $0x824] sm:$0xf] }
 0x2f1   : > { %5648 = vmatpush.bf16.msra.mxu0 %v8141_v13  ;;  %5662 = vmatpush.bf16.msra.mxu1 %v8205_v58  ;;  %v8113_v13 = vor.u32 %v8795_v43, %v8110_v3  ;;  %v8777_v58 = vld [vmem:[#allocation11 + $0x754] sm:$0xf]  ;;  %v8142_v43 = vld [vmem:[#allocation11 + $0x828] sm:$0xf0]  ;;  %v8819_v3 = vld [vmem:[#allocation11 + $0x8a4] sm:$0xf] }
 0x2f2   : > { %5676 = vmatpush.bf16.msra.mxu2 %v7889_v6  ;;  %5690 = vmatpush.bf16.msra.mxu3 %v7953_v11  ;;  %v8793_v6 = vld [vmem:[#allocation11 + $0x7d4] sm:$0xf]  ;;  %v8102_v11 = vld [vmem:[#allocation11 + $0x7d8] sm:$0xf0]  ;;  %v8041_v22 = vor.u32 %v8777_v58, %v8038_v55 }
 0x2f3   : > { %v8105_v49 = vor.u32 %v8793_v6, %v8102_v11  ;;  %v8769_v55 = vld [vmem:[#allocation11 + $0x714] sm:$0xf]  ;;  %v8145_v6 = vor.u32 %v8803_v9, %v8142_v43  ;;  %v8209_v11 = vor.u32 %v8819_v3, %v8206_v23 }
 0x2f5   : > { %5649 = vmatpush.bf16.msra.mxu0 %v8133_v15  ;;  %5663 = vmatpush.bf16.msra.mxu1 %v8197_v20  ;;  %v8169_v15 = vor.u32 %v8809_v56, %v8166_v35  ;;  %v8233_v20 = vor.u32 %v8825_v61, %v8230_v5  ;;  %v8785_v56 = vld [vmem:[#allocation11 + $0x794] sm:$0xf]  ;;  %v8070_v35 = vld [vmem:[#allocation11 + $0x798] sm:$0xf0] }
 0x2f6   : > { %5677 = vmatpush.bf16.msra.mxu2 %v7881_v38  ;;  %5691 = vmatpush.bf16.msra.mxu3 %v7945_v14  ;;  %v8158_v38 = vld [vmem:[#allocation11 + $0x848] sm:$0xf0]  ;;  %v8823_v14 = vld [vmem:[#allocation11 + $0x8c4] sm:$0xf]  ;;  %v8801_v61 = vld [vmem:[#allocation11 + $0x814] sm:$0xf]  ;;  %v8073_v47 = vor.u32 %v8785_v56, %v8070_v35 }
 0x2f7   : > { %v8161_v0 = vor.u32 %v8807_v59, %v8158_v38  ;;  %v8225_v33 = vor.u32 %v8823_v14, %v8222_v46  ;;  %v8134_v5 = vld [vmem:[#allocation11 + $0x818] sm:$0xf0]  ;;  %v8783_v59 = vld [vmem:[#allocation11 + $0x784] sm:$0xf]  ;;  %v8062_v38 = vld [vmem:[#allocation11 + $0x788] sm:$0xf0] }
 0x2f8   : > { %v8137_v28 = vor.u32 %v8801_v61, %v8134_v5  ;;  %v8799_v14 = vld [vmem:[#allocation11 + $0x804] sm:$0xf]  ;;  %v8065_v48 = vor.u32 %v8783_v59, %v8062_v38 }
 0x2f9   : > { %5650 = vmatpush.bf16.msra.mxu0 %v8125_v26  ;;  %5664 = vmatpush.bf16.msra.mxu1 %v8189_v60  ;;  %v4806_v27 = vpop.f32.mrf.mxu0  ;;  %v8821_v26 = vld [vmem:[#allocation11 + $0x8b4] sm:$0xf]  ;;  %v8214_v60 = vld [vmem:[#allocation11 + $0x8b8] sm:$0xf0] }
 0x2fa   : > { %5678 = vmatpush.bf16.msra.mxu2 %v7873_v37  ;;  %5692 = vmatpush.bf16.msra.mxu3 %v7937_v39  ;;  %v8014_v37 = vld [vmem:[#allocation11 + $0x728] sm:$0xf0]  ;;  %v8153_v39 = vor.u32 %v8805_v8, %v8150_v34 }
 0x2fc   : > { %5651 = vmatmul.bf16.vlgmr.msra.gmra.mxu0 %v10132_v45  ;;  %5665 = vmatmul.bf16.vlgmr.msra.gmra.mxu1 %v10134_v7 }
 0x2fd   : > { %5699 = vmatpush.bf16.msrb.mxu0 %v8057_v41  ;;  %5713 = vmatpush.bf16.msrb.mxu1 %v8121_v4  ;;  %v8217_v41 = vor.u32 %v8821_v26, %v8214_v60  ;;  %v8787_v4 = vld [vmem:[#allocation11 + $0x7a4] sm:$0xf] }
 0x2fe   : > { %5727 = vmatpush.bf16.msrb.mxu2 %v8185_v36  ;;  %5741 = vmatpush.bf16.msrb.mxu3 %v8249_v16  ;;  %v8081_v58 = vor.u32 %v8787_v4, %v8078_v52 }
 0x2ff   : > { %5679 = vmatmul.bf16.vlgmr.msra.gmra.mxu2 %v10112_v63  ;;  %5693 = vmatmul.bf16.vlgmr.msra.gmra.mxu3 %v10114_v17  ;;  %v4820_v63 = vpop.f32.mrf.mxu1 }
 0x300   : > { %v4821_v17 = vadd.f32 %v4820_v63, %v4806_v27  ;;  %v8126_v27 = vld [vmem:[#allocation11 + $0x808] sm:$0xf0]  ;;  %v8815_v63 = vld [vmem:[#allocation11 + $0x884] sm:$0xf] }
 0x301   : > { %5700 = vmatpush.bf16.msrb.mxu0 %v8049_v10  ;;  %5714 = vmatpush.bf16.msrb.mxu1 %v8113_v13  ;;  %v4808_v44 = vpop.f32.mrf.mxu0  ;;  %v8017_v13 = vor.u32 %v8771_v21, %v8014_v37 }
 0x302   : > { %5728 = vmatpush.bf16.msrb.mxu2 %v8177_v29  ;;  %5742 = vmatpush.bf16.msrb.mxu3 %v8241_v30  ;;  %v4834_v36 = vpop.f32.mrf.mxu2  ;;  %v4848_v16 = vpop.f32.mrf.mxu3  ;;  %v8006_v29 = vld [vmem:[#allocation11 + $0x718] sm:$0xf0] }
 0x303   : > { %v4835_v24 = vadd.f32 %v4834_v36, %v4821_v17  ;;  %v8009_v32 = vor.u32 %v8769_v55, %v8006_v29  ;;  %v8190_v17 = vld [vmem:[#allocation11 + $0x888] sm:$0xf0] }
 0x304   : > { %v8193_v18 = vor.u32 %v8815_v63, %v8190_v17 }
 0x305   : > { %5701 = vmatpush.bf16.msrb.mxu0 %v8041_v22  ;;  %5715 = vmatpush.bf16.msrb.mxu1 %v8105_v49  ;;  %v4849_v30 = vadd.f32 %v4848_v16, %v4835_v24  ;;  %v8817_v22 = vld [vmem:[#allocation11 + $0x894] sm:$0xf]  ;;  %v8198_v49 = vld [vmem:[#allocation11 + $0x898] sm:$0xf0] }
 0x306   : > { %5729 = vmatpush.bf16.msrb.mxu2 %v8169_v15  ;;  %5743 = vmatpush.bf16.msrb.mxu3 %v8233_v20  ;;  %v8767_v15 = vld [vmem:[#allocation11 + $0x704] sm:$0xf]  ;;  %v7998_v20 = vld [vmem:[#allocation11 + $0x708] sm:$0xf0]  ;;  %v8201_v42 = vor.u32 %v8817_v22, %v8198_v49 }
 0x307   : > { %v4822_v19 = vpop.f32.mrf.mxu1  ;;  %v8001_v31 = vor.u32 %v8767_v15, %v7998_v20 }
 0x308   : > { %v4823_v10 = vadd.f32 %v4822_v19, %v4808_v44 }
 0x309   : > { %5702 = vmatpush.bf16.msrb.mxu0 %v8033_v57  ;;  %5716 = vmatpush.bf16.msrb.mxu1 %v8097_v51 }
 0x30a   : > { %5730 = vmatpush.bf16.msrb.mxu2 %v8161_v0  ;;  %5744 = vmatpush.bf16.msrb.mxu3 %v8225_v33  ;;  %v4836_v46 = vpop.f32.mrf.mxu2  ;;  %v4850_v51 = vpop.f32.mrf.mxu3  ;;  %v8129_v33 = vor.u32 %v8799_v14, %v8126_v27 }
 0x30b   : > { %v4837_v57 = vadd.f32 %v4836_v46, %v4823_v10 }
 0x30d   : > { %5703 = vmatpush.bf16.msrb.mxu0 %v8025_v2  ;;  %5717 = vmatpush.bf16.msrb.mxu1 %v8089_v50  ;;  %v4851_v0 = vadd.f32 %v4850_v51, %v4837_v57 }
 0x30e   : > { %5731 = vmatpush.bf16.msrb.mxu2 %v8153_v39  ;;  %5745 = vmatpush.bf16.msrb.mxu3 %v8217_v41 }
 0x311   : > { %5704 = vmatpush.bf16.msrb.mxu0 %v8017_v13  ;;  %5718 = vmatpush.bf16.msrb.mxu1 %v8081_v58 }
 0x312   : > { %5732 = vmatpush.bf16.msrb.mxu2 %v8145_v6  ;;  %5746 = vmatpush.bf16.msrb.mxu3 %v8209_v11 }
 0x315   : > { %5705 = vmatpush.bf16.msrb.mxu0 %v8009_v32  ;;  %5719 = vmatpush.bf16.msrb.mxu1 %v8073_v47 }
 0x316   : > { %5733 = vmatpush.bf16.msrb.mxu2 %v8137_v28  ;;  %5747 = vmatpush.bf16.msrb.mxu3 %v8201_v42 }
 0x319   : > { %5706 = vmatpush.bf16.msrb.mxu0 %v8001_v31  ;;  %5720 = vmatpush.bf16.msrb.mxu1 %v8065_v48  ;;  %v4862_v12 = vpop.f32.mrf.mxu0  ;;  %v4876_v8 = vpop.f32.mrf.mxu1 }
 0x31a   : > { %5734 = vmatpush.bf16.msrb.mxu2 %v8129_v33  ;;  %5748 = vmatpush.bf16.msrb.mxu3 %v8193_v18  ;;  %v4863_v34 = vadd.f32 %v4862_v12, %v4849_v30 }
 0x31c   : > { %5707 = vmatmul.bf16.vlgmr.msrb.gmra.mxu0 %v10116_v25  ;;  %5721 = vmatmul.bf16.vlgmr.msrb.gmra.mxu1 %v10118_v54  ;;  %v4877_v26 = vadd.f32 %v4876_v8, %v4863_v34 }
 0x31d   : > { %5735 = vmatmul.bf16.vlgmr.msrb.gmra.mxu2 %v10132_v45  ;;  %5749 = vmatmul.bf16.vlgmr.msrb.gmra.mxu3 %v10134_v7 }
 0x31e   : > { %v10145_v60 = vadd.f32 %v4877_v26, %v10107_v40 }
 0x321   : > { %v4864_v2 = vpop.f32.mrf.mxu0  ;;  %v4878_v21 = vpop.f32.mrf.mxu1 }
 0x322   : > { %v4865_v50 = vadd.f32 %v4864_v2, %v4851_v0  ;;  %v4890_v25 = vpop.f32.mrf.mxu2  ;;  %v4904_v54 = vpop.f32.mrf.mxu3 }
 0x323   : > { %v4905_v11 = vadd.f32 %v4904_v54, %v4890_v25 }
 0x324   : > { %v4879_v37 = vadd.f32 %v4878_v21, %v4865_v50  ;;  %v5764_v50 = vstv %s5763_s14 }
 0x326   : > { %v10148_v39 = vadd.f32 %v4879_v37, %v10120_v62 }
 0x32a   : > { %v4892_v41 = vpop.f32.mrf.mxu2  ;;  %v4906_v45 = vpop.f32.mrf.mxu3 }
 0x32b   : > { %v4907_v28 = vadd.f32 %v4906_v45, %v4892_v41 }
 0x339   : > { %v4918_v4 = vpop.f32.mrf.mxu0  ;;  %v4932_v7 = vpop.f32.mrf.mxu1 }
 0x33a   : > { %v4919_v35 = vadd.f32 %v4918_v4, %v4905_v11 }
 0x33c   : > { %v4933_v22 = vadd.f32 %v4932_v7, %v4919_v35 }
 0x341   : > { %v4920_v36 = vpop.f32.mrf.mxu0  ;;  %v4934_v16 = vpop.f32.mrf.mxu1 }
 0x342   : > { %v4946_v52 = vpop.f32.mrf.mxu2  ;;  %v4960_v9 = vpop.f32.mrf.mxu3  ;;  %v4921_v46 = vadd.f32 %v4920_v36, %v4907_v28 }
 0x343   : > { %v4947_v42 = vadd.f32 %v4946_v52, %v4933_v22 }
 0x344   : > { %v4935_v31 = vadd.f32 %v4934_v16, %v4921_v46 }
 0x345   : > { %v4961_v17 = vadd.f32 %v4960_v9, %v4947_v42 }
 0x347   : > { %v4966_v34 = vadd.f32 %v4961_v17, %v10128_v53 }
 0x34a   : > { %v4948_v43 = vpop.f32.mrf.mxu2  ;;  %v4962_v40 = vpop.f32.mrf.mxu3 }
 0x34b   : > { %v4949_v26 = vadd.f32 %v4948_v43, %v4935_v31 }
 0x34d   : > { %v4963_v41 = vadd.f32 %v4962_v40, %v4949_v26 }
 0x359   : > { %v5596_v3 = vpop.f32.mrf.mxu0  ;;  %v5610_v23 = vpop.f32.mrf.mxu1 }
 0x35a   : > { %v5611_v56 = vadd.f32 %v5610_v23, %v5596_v3  ;;  %v4968_v3 = vadd.f32 %v4963_v41, %v10130_v1 }
 0x361   : > { %v5598_v19 = vpop.f32.mrf.mxu0  ;;  %v5612_v10 = vpop.f32.mrf.mxu1 }
 0x362   : > { %v5624_v24 = vpop.f32.mrf.mxu2  ;;  %v5638_v44 = vpop.f32.mrf.mxu3  ;;  %v5613_v38 = vadd.f32 %v5612_v10, %v5598_v19 }
 0x363   : > { %v5625_v61 = vadd.f32 %v5624_v24, %v5611_v56 }
 0x365   : > { %v5639_v49 = vadd.f32 %v5638_v44, %v5625_v61 }
 0x36a   : > { %v5626_v62 = vpop.f32.mrf.mxu2  ;;  %v5640_v13 = vpop.f32.mrf.mxu3 }
 0x36b   : > { %v5627_v63 = vadd.f32 %v5626_v62, %v5613_v38 }
 0x36d   : > { %v5641_v33 = vadd.f32 %v5640_v13, %v5627_v63 }
 0x379   : > { %v5652_v58 = vpop.f32.mrf.mxu0  ;;  %v5666_v55 = vpop.f32.mrf.mxu1 }
 0x37a   : > { %v5653_v59 = vadd.f32 %v5652_v58, %v5639_v49 }
 0x37c   : > { %v5667_v57 = vadd.f32 %v5666_v55, %v5653_v59 }
 0x37e   : > { %v5755_v2 = vadd.f32 %v5667_v57, %v10145_v60 }
 0x380   : > { %v5765_v45 = vmul.f32 %v5764_v50, %v5755_v2  ;;  %vm5759_vm1 = vcmp.ge.f32.partialorder %v5755_v2, 0.0 }
 0x381   : > { %v5654_v6 = vpop.f32.mrf.mxu0  ;;  %v5668_v5 = vpop.f32.mrf.mxu1 }
 0x382   : > { %v5680_v29 = vpop.f32.mrf.mxu2  ;;  %v5694_v30 = vpop.f32.mrf.mxu3  ;;  %v5655_v21 = vadd.f32 %v5654_v6, %v5641_v33  ;;  %v5769_v23 = vsel %vm5759_vm1, %v5755_v2, %v5765_v45 }
 0x383   : > { %v5695_v15 = vadd.f32 %v5694_v30, %v5680_v29 }
 0x384   : > { %v5669_v7 = vadd.f32 %v5668_v5, %v5655_v21 }
 0x386   : > { %v5757_v24 = vadd.f32 %v5669_v7, %v10148_v39 }
 0x388   : > { %v5767_v13 = vmul.f32 %v5764_v50, %v5757_v24  ;;  %vm5761_vm3 = vcmp.ge.f32.partialorder %v5757_v24, 0.0 }
 0x38a   : > { %v5682_v32 = vpop.f32.mrf.mxu2  ;;  %v5696_v47 = vpop.f32.mrf.mxu3  ;;  %v5771_v55 = vsel %vm5761_vm3, %v5757_v24, %v5767_v13 }
 0x38b   : > { %v5697_v18 = vadd.f32 %v5696_v47, %v5682_v32 }
 0x399   : > { %v5708_v20 = vpop.f32.mrf.mxu0  ;;  %v5722_v27 = vpop.f32.mrf.mxu1 }
 0x39a   : > { %v5709_v14 = vadd.f32 %v5708_v20, %v5695_v15 }
 0x39c   : > { %v5723_v51 = vadd.f32 %v5722_v27, %v5709_v14 }
 0x3a0   : > { %v5736_v48 = vpop.f32.mrf.mxu2  ;;  %v5750_v0 = vpop.f32.mrf.mxu3 }
 0x3a1   : > { %v5737_v12 = vadd.f32 %v5736_v48, %v5723_v51  ;;  %v5710_v8 = vpop.f32.mrf.mxu0  ;;  %v5724_v4 = vpop.f32.mrf.mxu1 }
 0x3a2   : > { %v5711_v25 = vadd.f32 %v5710_v8, %v5697_v18 }
 0x3a3   : > { %v5751_v37 = vadd.f32 %v5750_v0, %v5737_v12 }
 0x3a4   : > { %v5725_v9 = vadd.f32 %v5724_v4, %v5711_v25 }
 0x3a5   : > { %v5756_v54 = vadd.f32 %v5751_v37, %v4966_v34 }
 0x3a7   : > { %vm5760_vm0 = vcmp.ge.f32.partialorder %v5756_v54, 0.0  ;;  %v5766_v52 = vmul.f32 %v5764_v50, %v5756_v54 }
 0x3a8   : > { %v5738_v36 = vpop.f32.mrf.mxu2  ;;  %v5752_v60 = vpop.f32.mrf.mxu3 }
 0x3a9   : > { %v5770_v53 = vsel %vm5760_vm0, %v5756_v54, %v5766_v52  ;;  %v5739_v16 = vadd.f32 %v5738_v36, %v5725_v9 }
 0x3aa   : > { %v5777_v43 = vrot.slane %v5770_v53, 4 }
 0x3ab   : > { %v5753_v40 = vadd.f32 %v5752_v60, %v5739_v16 }
 0x3ac   : > { %v5779_v44 = vsel %vm593_vm2, %v5769_v23, %v5777_v43  ;;  %v5780_v19 = vsel %vm593_vm2, %v5777_v43, %v5769_v23 }
 0x3ad   : > { %v5781_v10 = vrot.slane %v5780_v19, 4  ;;  %5789 = vst [vmem:[%s362_s16] sm:$0xff] %v5779_v44  ;;  %v5758_v62 = vadd.f32 %v5753_v40, %v4968_v3 }
 0x3af   : > { %5790 = vst [vmem:[%s362_s16 + $0x8] sm:$0xff] %v5781_v10  ;;  %vm5762_vm15 = vcmp.ge.f32.partialorder %v5758_v62, 0.0  ;;  %v5768_v1 = vmul.f32 %v5764_v50, %v5758_v62 }
 0x3b1   : > { %v5772_v39 = vsel %vm5762_vm15, %v5758_v62, %v5768_v1 }
 0x3b2   : > { %v5778_v58 = vrot.slane %v5772_v39, 4 }
 0x3b4   : > { %v5782_v29 = vsel %vm593_vm2, %v5771_v55, %v5778_v58  ;;  %v5783_v30 = vsel %vm593_vm2, %v5778_v58, %v5771_v55 }
 0x3b5   : > { %v5784_v6 = vrot.slane %v5783_v30, 4  ;;  %5791 = vst [vmem:[%s362_s16 + $0x10] sm:$0xff] %v5782_v29 }
 0x3b7   : > { %5792 = vst [vmem:[%s362_s16 + $0x18] sm:$0xff] %v5784_v6 }
 0x3b8   : > { %9104 = shalt.err (!%p9101_p10)
}
 0x3b9   : > { %s9160_s1 = smov 128   ;;  %s9161_s14 = smov 8  }
 0x3ba   : > { %8853 = dma.vmem_to_hbm [thread:$0]  (%p9298_p3), %s5807_s3, 512, %s5809_s11, %s5794_s12, %s9160_s1, %s9160_s1, %s9161_s14  }
 0x3bb PF: > { %s5823_s6 = sand.u32 1, %s9139_s28   ;;  %p10220_p12 = scmp.ge.s32.totalorder %s9151_s8, 2 }
 0x3bc   : > { %s5824_s15 = scalar_lea.sflag [#allocation7], %s5823_s6 }
 0x3bd   : > { %p8873_p13 = pnand %p10220_p12, %p9243_p6 }
 0x3bf   : > { %p8874_p0 = pneg %p8873_p13 }
 0x3c1   : > { %9134 = dma.done.wait (%p8874_p0), %s5824_s15, 512  }
 0x3c2   : > { %9136 = vsyncadd (%p8874_p0), %s5824_s15, 4294966784  ;;  %p24_p5 = scmp.ge.s32.totalorder %s9288_s19, 4   ;;  %s10221_s28 = smov %s9143_s29 }
 0x3c3   : > { %s10222_s29 = smov %s9147_s30  ;;  %s10223_s30 = smov %s9304_s25 }
 0x3c4   : > { %s10224_s8 = smov %s9288_s19  ;;  %26 = sbr.rel (!%p24_p5) target bundleno = 11 (0xb), region = 160 }
 0x3c9   :  { %5830 = vsyncpa [#allocation6], 1 }
 0x3ca   :  { %5832 = vsyncpa [#allocation6 + $0x1], 1 }
 0x3cb   :  { %5833 = vsyncpa [#allocation9], 1 }
 0x3cc   :  { %5834 = vsyncpa [#allocation12], 1 }
 0x3cd   :  { %5835 = vsyncpa [#allocation7], 1 }
 0x3ce   :  { %5837 = vsyncpa [#allocation7 + $0x1], 1 }

</bundles_post_ra>
